<compile_context>
chip_gen: v5e
topology: v5e:2x2
jax: 0.10.0
libtpu: 0.0.40
codegen_flags: <defaults>
</compile_context>

<pallas_src>
import jax
import jax.numpy as jnp
from jax.experimental import pallas as pl
from jax.experimental.pallas import tpu as pltpu

_CMAX = 64          # max channel count in the net; everything is padded to this
_BN_EPS = 1e-5
_CHANNELS = [(1, 8), (8, 8), (8, 16), (16, 16), (16, 32), (32, 32), (32, 64), (64, 64)]


# ---------------------------------------------------------------------------
# Fused whole-network kernel
# ---------------------------------------------------------------------------
def _make_fused_kernel(block_has_shortcut, chunk_n, L, out_size):
    CL = chunk_n * L   # lanes per grid step (batch folded into the lane axis)

    def kernel(x_ref, w_ref, b_ref, h_ref, o_ref):
        lane = jax.lax.broadcasted_iota(jnp.int32, (1, CL), 1)
        pos = lane % L
        not_first = pos != 0            # left neighbour exists (k=3, pad=1)
        not_last = pos != (L - 1)       # right neighbour exists

        def conv3(x, wi, bi, relu):
            # x: (64, CL) f32.  Three accumulating MXU dots, one per tap (k=0,1,2);
            # weights are bf16, accumulation is f32.
            xl = jnp.where(not_first, pltpu.roll(x, 1, 1), 0.0)        # x[:, j-1]
            xr = jnp.where(not_last, pltpu.roll(x, CL - 1, 1), 0.0)    # x[:, j+1]
            y = jnp.dot(w_ref[wi], xl.astype(jnp.bfloat16),
                        preferred_element_type=jnp.float32)
            y = y + jnp.dot(w_ref[wi + 1], x.astype(jnp.bfloat16),
                            preferred_element_type=jnp.float32)
            y = y + jnp.dot(w_ref[wi + 2], xr.astype(jnp.bfloat16),
                            preferred_element_type=jnp.float32)
            y = y + b_ref[:, bi:bi + 1]                                # folded BN bias
            return jnp.maximum(y, 0.0) if relu else y

        def conv1(x, wi, bi):
            # 1x1 shortcut conv + folded BN
            y = jnp.dot(w_ref[wi], x.astype(jnp.bfloat16),
                        preferred_element_type=jnp.float32)
            return y + b_ref[:, bi:bi + 1]

        act = x_ref[...]                                               # (64, CL) f32
        wi = bi = 0
        for has_sc in block_has_shortcut:                              # 8 ResBlocks, unrolled
            h = conv3(act, wi, bi, relu=True);  wi += 3; bi += 1       # conv1 + BN + ReLU
            h2 = conv3(h, wi, bi, relu=False);  wi += 3; bi += 1       # conv2 + BN
            if has_sc:
                short = conv1(act, wi, bi);     wi += 1; bi += 1       # 1x1 shortcut + BN
            else:
                short = act
            act = short + h2                                           # x + conv2(out)

        # ---- head: AdaptiveConcatPool1d (max||avg over L) + Linear(128, out) ----
        hw = h_ref[...]                                                # (129, out_size)
        w_mx = hw[0:_CMAX, :]
        w_av = hw[_CMAX:2 * _CMAX, :]
        b_hd = hw[2 * _CMAX:2 * _CMAX + 1, :]
        inv_l = 1.0 / L
        rows = []
        for n in range(chunk_n):
            seg = act[:, n * L:(n + 1) * L]                            # static, lane-aligned slice
            mx = jnp.max(seg, axis=1, keepdims=True)                   # (64, 1)
            av = jnp.sum(seg, axis=1, keepdims=True) * inv_l           # (64, 1)
            rows.append(jnp.sum(mx * w_mx + av * w_av, axis=0, keepdims=True))   # (1, out)
        out = jnp.concatenate(rows, axis=0) + b_hd                     # (chunk_n, out_size)
        o_ref[...] = out.astype(o_ref.dtype)

    return kernel


def cnn_forward(x, fused, *, chunk_n=1):
    """x: (N, 1, L) float32 in PyTorch Conv1d NCL layout. Returns (N, out_size).

    chunk_n = samples per grid step; grid axis is "parallel" so v7x shards chunks
    across its two TensorCores.  Best if chunk_n * L is a multiple of 128.
    """
    w_slab, b_slab, h_slab, block_has_shortcut, out_size = fused
    N, c0, L = x.shape
    assert c0 == 1 and N % chunk_n == 0
    num_chunks = N // chunk_n

    # batch folded into the lane axis, channels zero-padded to 64 sublanes
    x2 = jnp.transpose(x, (1, 0, 2)).reshape(c0, N * L)
    x2 = jnp.pad(x2, ((0, _CMAX - c0), (0, 0)))                        # (64, N*L)

    kernel = _make_fused_kernel(block_has_shortcut, chunk_n, L, out_size)
    out = pl.pallas_call(
        kernel,
        out_shape=jax.ShapeDtypeStruct((num_chunks, chunk_n, out_size), x.dtype),
        grid=(num_chunks,),
        in_specs=[
            pl.BlockSpec((_CMAX, chunk_n * L), lambda i: (0, i)),      # activations
            pl.BlockSpec(w_slab.shape, lambda i: (0, 0, 0)),           # conv-weight slab (bf16)
            pl.BlockSpec(b_slab.shape, lambda i: (0, 0)),              # bias slab (f32)
            pl.BlockSpec(h_slab.shape, lambda i: (0, 0)),              # head slab (f32)
        ],
        out_specs=pl.BlockSpec((None, chunk_n, out_size), lambda i: (i, 0, 0)),
        compiler_params=pltpu.CompilerParams(dimension_semantics=("parallel",)),
    )(x2, w_slab, b_slab, h_slab)
    return out.reshape(N, out_size)


# ---------------------------------------------------------------------------
# Parameters (deterministic synthetic init, PyTorch layouts) + BN folding/packing
# ---------------------------------------------------------------------------
def _make_bn(key, c):
    k1, k2, k3, k4 = jax.random.split(key, 4)
    gamma = 1.0 + 0.1 * jax.random.normal(k1, (c,), jnp.float32)
    beta = 0.1 * jax.random.normal(k2, (c,), jnp.float32)
    mean = 0.1 * jax.random.normal(k3, (c,), jnp.float32)
    var = 1.0 + 0.1 * jnp.abs(jax.random.normal(k4, (c,), jnp.float32))
    scale = gamma / jnp.sqrt(var + _BN_EPS)          # inference-mode (running stats) BN
    bias = beta - mean * scale
    return scale, bias


def init_params(key, out_size):
    """Conv weights (Cout, Cin, K), linear weight (out_size, 128) -- PyTorch layouts."""
    blocks = []
    for cin, cout in _CHANNELS:
        key, k1, k2, k3, k4, k5, k6 = jax.random.split(key, 7)
        blk = {
            "conv1_w": 0.1 * jax.random.normal(k1, (cout, cin, 3), jnp.float32),
            "conv2_w": 0.1 * jax.random.normal(k2, (cout, cout, 3), jnp.float32),
        }
        blk["bn1_scale"], blk["bn1_bias"] = _make_bn(k3, cout)
        blk["bn2_scale"], blk["bn2_bias"] = _make_bn(k4, cout)
        if cin != cout:
            blk["sc_w"] = 0.1 * jax.random.normal(k5, (cout, cin, 1), jnp.float32)
            blk["sc_scale"], blk["sc_bias"] = _make_bn(k6, cout)
        blocks.append(blk)
    key, kw, kb = jax.random.split(key, 3)
    head_p = {"w": 0.1 * jax.random.normal(kw, (out_size, 128), jnp.float32),
              "b": 0.1 * jax.random.normal(kb, (out_size,), jnp.float32)}
    return {"blocks": blocks, "head": head_p}


def prepare_fused_params(params):
    """Fold BN into conv weights and pack everything into three VMEM-friendly slabs."""
    def pad_mat(a):      # (cout, cin) -> (64, 64), zero padded
        return jnp.pad(a, ((0, _CMAX - a.shape[0]), (0, _CMAX - a.shape[1])))

    def pad_vec(v):      # (cout,) -> (64,), zero padded
        return jnp.pad(v, (0, _CMAX - v.shape[0]))

    mats, biases, has_sc = [], [], []
    for blk in params["blocks"]:
        w1 = blk["conv1_w"] * blk["bn1_scale"][:, None, None]          # (cout, cin, 3)
        w2 = blk["conv2_w"] * blk["bn2_scale"][:, None, None]
        mats += [pad_mat(w1[:, :, k]) for k in range(3)]               # taps k=0,1,2
        biases.append(pad_vec(blk["bn1_bias"]))
        mats += [pad_mat(w2[:, :, k]) for k in range(3)]
        biases.append(pad_vec(blk["bn2_bias"]))
        sc = "sc_w" in blk
        has_sc.append(sc)
        if sc:
            mats.append(pad_mat(blk["sc_w"][:, :, 0] * blk["sc_scale"][:, None]))
            biases.append(pad_vec(blk["sc_bias"]))

    w_slab = jnp.stack(mats).astype(jnp.bfloat16)                      # (M, 64, 64) bf16
    b_slab = jnp.stack(biases, axis=1)                                 # (64, n_bias) f32

    w = params["head"]["w"]                                            # (out_size, 128); cat = [max||avg]
    out_size = w.shape[0]
    h_slab = jnp.concatenate(
        [w[:, :_CMAX].T, w[:, _CMAX:].T, params["head"]["b"].reshape(1, out_size)],
        axis=0)                                                        # (129, out_size) f32
    return w_slab, b_slab, h_slab, tuple(has_sc), out_size


# ---------------------------------------------------------------------------
# Pure-JAX reference (for correctness check only)
# ---------------------------------------------------------------------------
def _ref_conv_bn(x, w, scale, bias, relu):
    pad = (w.shape[-1] - 1) // 2
    y = jax.lax.conv_general_dilated(
        x, w, window_strides=(1,), padding=[(pad, pad)],
        dimension_numbers=("NCH", "OIH", "NCH"),
        precision=jax.lax.Precision.HIGHEST)
    y = y * scale[None, :, None] + bias[None, :, None]
    return jnp.maximum(y, 0.0) if relu else y


def ref_forward(x, params):
    out = x
    for blk in params["blocks"]:
        h = _ref_conv_bn(out, blk["conv1_w"], blk["bn1_scale"], blk["bn1_bias"], True)
        short = (_ref_conv_bn(out, blk["sc_w"], blk["sc_scale"], blk["sc_bias"], False)
                 if "sc_w" in blk else out)
        out = short + _ref_conv_bn(h, blk["conv2_w"], blk["bn2_scale"], blk["bn2_bias"], False)
    feat = jnp.concatenate([jnp.max(out, axis=-1), jnp.mean(out, axis=-1)], axis=1)
    return jnp.dot(feat, params["head"]["w"].T,
                   precision=jax.lax.Precision.HIGHEST) + params["head"]["b"]


# ---------------------------------------------------------------------------
if __name__ == "__main__":
    key = jax.random.PRNGKey(0)
    k_x, k_p = jax.random.split(key)

    N, L, out_size = 2, 128, 4                       # input (N, 1, L), Conv1d NCL
    x = jax.random.normal(k_x, (N, 1, L), jnp.float32)
    params = init_params(k_p, out_size)
    fused = prepare_fused_params(params)

    fwd = jax.jit(lambda inp: cnn_forward(inp, fused, chunk_n=1))
    y = fwd(x)
    jax.block_until_ready(y)

    y_ref = ref_forward(x, params)
    assert y.shape == (N, out_size)
    assert bool(jnp.all(jnp.isfinite(y)))
    rel = float(jnp.max(jnp.abs(y - y_ref)) / (jnp.max(jnp.abs(y_ref)) + 1e-6))
    # bf16 weights/activations on the MXU (f32 accumulate) -> ~1e-2 level error is expected
    assert rel < 5e-2, f"mismatch vs pure-JAX reference: rel={rel}"
    print("KERNEL_OK")
</pallas_src>

<mosaic_0001>
module attributes {stable_mosaic.version = 11 : i64} {
  func.func @kernel(%arg0: i32, %arg1: memref<64x128xf32, #tpu.memory_space<vmem>>, %arg2: memref<52x64x64xbf16, #tpu.memory_space<vmem>>, %arg3: memref<64x20xf32, #tpu.memory_space<vmem>>, %arg4: memref<129x4xf32, #tpu.memory_space<vmem>>, %arg5: memref<1x1x4xf32, #tpu.memory_space<vmem>>) attributes {dimension_semantics = [#tpu.dimension_semantics<parallel>], iteration_bounds = array<i64: 2>, scalar_prefetch = 0 : i64, scratch_operands = 0 : i64, tpu.core_type = #tpu.core_type<tc>, window_params = [{transform_indices = @transform_0, window_bounds = array<i64: 64, 128>}, {pipeline_mode = #tpu.pipeline_mode<synchronous>, transform_indices = @transform_1, window_bounds = array<i64: 52, 64, 64>}, {pipeline_mode = #tpu.pipeline_mode<synchronous>, transform_indices = @transform_2, window_bounds = array<i64: 64, 20>}, {pipeline_mode = #tpu.pipeline_mode<synchronous>, transform_indices = @transform_3, window_bounds = array<i64: 129, 4>}, {transform_indices = @transform_4, window_bounds = array<i64: 1, 1, 4>}]} {
    %0 = tpu.iota {dimensions = array<i32: 1>} : vector<1x128xi32>
    %c128_i32 = arith.constant 128 : i32
    %c0_i32 = arith.constant 0 : i32
    %1 = arith.cmpi eq, %c128_i32, %c0_i32 : i32
    %c1_i32 = arith.constant 1 : i32
    %2 = arith.select %1, %c1_i32, %c128_i32 : i32
    %3 = vector.broadcast %2 : i32 to vector<1x128xi32>
    %4 = arith.remsi %0, %3 : vector<1x128xi32>
    %c0_i32_0 = arith.constant 0 : i32
    %5 = vector.broadcast %c0_i32_0 : i32 to vector<1x128xi32>
    %6 = arith.cmpi ne, %4, %5 : vector<1x128xi32>
    %c0_i32_1 = arith.constant 0 : i32
    %7 = vector.broadcast %c0_i32_1 : i32 to vector<1x128xi32>
    %8 = arith.cmpi slt, %4, %7 : vector<1x128xi32>
    %c0_i32_2 = arith.constant 0 : i32
    %9 = arith.cmpi slt, %2, %c0_i32_2 : i32
    %10 = vector.broadcast %9 : i1 to vector<1x128xi1>
    %11 = vector.broadcast %10 : vector<1x128xi1> to vector<1x128xi1>
    %12 = arith.xori %8, %11 : vector<1x128xi1>
    %13 = arith.andi %12, %6 : vector<1x128xi1>
    %14 = vector.broadcast %2 : i32 to vector<1x128xi32>
    %15 = arith.addi %4, %14 : vector<1x128xi32>
    %16 = arith.select %13, %15, %4 : vector<1x128xi1>, vector<1x128xi32>
    %c0_i32_3 = arith.constant 0 : i32
    %17 = vector.broadcast %c0_i32_3 : i32 to vector<1x128xi32>
    %18 = arith.cmpi ne, %16, %17 : vector<1x128xi32>
    %c127_i32 = arith.constant 127 : i32
    %19 = vector.broadcast %c127_i32 : i32 to vector<1x128xi32>
    %20 = arith.cmpi ne, %16, %19 : vector<1x128xi32>
    %c0 = arith.constant 0 : index
    %c0_4 = arith.constant 0 : index
    %21 = vector.load %arg1[%c0, %c0_4] : memref<64x128xf32, #tpu.memory_space<vmem>>, vector<64x128xf32>
    %c1_i32_5 = arith.constant 1 : i32
    %22 = tpu.dynamic_rotate %21 by %c1_i32_5 dim 1 : vector<64x128xf32>, i32 -> vector<64x128xf32>
    %cst = arith.constant 0.000000e+00 : f32
    %23 = vector.shape_cast %18 : vector<1x128xi1> to vector<1x128xi1>
    %24 = vector.broadcast %23 : vector<1x128xi1> to vector<64x128xi1>
    %25 = vector.broadcast %cst : f32 to vector<64x128xf32>
    %26 = arith.select %24, %22, %25 : vector<64x128xi1>, vector<64x128xf32>
    %c127_i32_6 = arith.constant 127 : i32
    %27 = tpu.dynamic_rotate %21 by %c127_i32_6 dim 1 : vector<64x128xf32>, i32 -> vector<64x128xf32>
    %cst_7 = arith.constant 0.000000e+00 : f32
    %28 = vector.shape_cast %20 : vector<1x128xi1> to vector<1x128xi1>
    %29 = vector.broadcast %28 : vector<1x128xi1> to vector<64x128xi1>
    %30 = vector.broadcast %cst_7 : f32 to vector<64x128xf32>
    %31 = arith.select %29, %27, %30 : vector<64x128xi1>, vector<64x128xf32>
    %c0_8 = arith.constant 0 : index
    %c0_9 = arith.constant 0 : index
    %c0_10 = arith.constant 0 : index
    %32 = vector.load %arg2[%c0_8, %c0_9, %c0_10] : memref<52x64x64xbf16, #tpu.memory_space<vmem>>, vector<1x64x64xbf16>
    %33 = vector.shape_cast %32 : vector<1x64x64xbf16> to vector<64x64xbf16>
    %34 = arith.truncf %26 : vector<64x128xf32> to vector<64x128xbf16>
    %cst_11 = arith.constant dense<0.000000e+00> : vector<64x128xf32>
    %35 = tpu.matmul %33, %34, %cst_11 {dimension_numbers = #tpu.dot_dimension_numbers<[1], [0], [0], [1], [0, 0, 1, 1], [], []>} : vector<64x64xbf16>, vector<64x128xbf16>, vector<64x128xf32> -> vector<64x128xf32>
    %c1 = arith.constant 1 : index
    %c0_12 = arith.constant 0 : index
    %c0_13 = arith.constant 0 : index
    %36 = vector.load %arg2[%c1, %c0_12, %c0_13] : memref<52x64x64xbf16, #tpu.memory_space<vmem>>, vector<1x64x64xbf16>
    %37 = vector.shape_cast %36 : vector<1x64x64xbf16> to vector<64x64xbf16>
    %38 = arith.truncf %21 : vector<64x128xf32> to vector<64x128xbf16>
    %cst_14 = arith.constant dense<0.000000e+00> : vector<64x128xf32>
    %39 = tpu.matmul %37, %38, %cst_14 {dimension_numbers = #tpu.dot_dimension_numbers<[1], [0], [0], [1], [0, 0, 1, 1], [], []>} : vector<64x64xbf16>, vector<64x128xbf16>, vector<64x128xf32> -> vector<64x128xf32>
    %40 = arith.addf %35, %39 : vector<64x128xf32>
    %c2 = arith.constant 2 : index
    %c0_15 = arith.constant 0 : index
    %c0_16 = arith.constant 0 : index
    %41 = vector.load %arg2[%c2, %c0_15, %c0_16] : memref<52x64x64xbf16, #tpu.memory_space<vmem>>, vector<1x64x64xbf16>
    %42 = vector.shape_cast %41 : vector<1x64x64xbf16> to vector<64x64xbf16>
    %43 = arith.truncf %31 : vector<64x128xf32> to vector<64x128xbf16>
    %cst_17 = arith.constant dense<0.000000e+00> : vector<64x128xf32>
    %44 = tpu.matmul %42, %43, %cst_17 {dimension_numbers = #tpu.dot_dimension_numbers<[1], [0], [0], [1], [0, 0, 1, 1], [], []>} : vector<64x64xbf16>, vector<64x128xbf16>, vector<64x128xf32> -> vector<64x128xf32>
    %45 = arith.addf %40, %44 : vector<64x128xf32>
    %c0_18 = arith.constant 0 : index
    %c0_19 = arith.constant 0 : index
    %46 = vector.load %arg3[%c0_18, %c0_19] : memref<64x20xf32, #tpu.memory_space<vmem>>, vector<64x1xf32>
    %47 = vector.broadcast %46 : vector<64x1xf32> to vector<64x128xf32>
    %48 = arith.addf %45, %47 : vector<64x128xf32>
    %cst_20 = arith.constant 0.000000e+00 : f32
    %49 = vector.broadcast %cst_20 : f32 to vector<64x128xf32>
    %50 = arith.maximumf %48, %49 : vector<64x128xf32>
    %c1_i32_21 = arith.constant 1 : i32
    %51 = tpu.dynamic_rotate %50 by %c1_i32_21 dim 1 : vector<64x128xf32>, i32 -> vector<64x128xf32>
    %cst_22 = arith.constant 0.000000e+00 : f32
    %52 = vector.shape_cast %18 : vector<1x128xi1> to vector<1x128xi1>
    %53 = vector.broadcast %52 : vector<1x128xi1> to vector<64x128xi1>
    %54 = vector.broadcast %cst_22 : f32 to vector<64x128xf32>
    %55 = arith.select %53, %51, %54 : vector<64x128xi1>, vector<64x128xf32>
    %c127_i32_23 = arith.constant 127 : i32
    %56 = tpu.dynamic_rotate %50 by %c127_i32_23 dim 1 : vector<64x128xf32>, i32 -> vector<64x128xf32>
    %cst_24 = arith.constant 0.000000e+00 : f32
    %57 = vector.shape_cast %20 : vector<1x128xi1> to vector<1x128xi1>
    %58 = vector.broadcast %57 : vector<1x128xi1> to vector<64x128xi1>
    %59 = vector.broadcast %cst_24 : f32 to vector<64x128xf32>
    %60 = arith.select %58, %56, %59 : vector<64x128xi1>, vector<64x128xf32>
    %c3 = arith.constant 3 : index
    %c0_25 = arith.constant 0 : index
    %c0_26 = arith.constant 0 : index
    %61 = vector.load %arg2[%c3, %c0_25, %c0_26] : memref<52x64x64xbf16, #tpu.memory_space<vmem>>, vector<1x64x64xbf16>
    %62 = vector.shape_cast %61 : vector<1x64x64xbf16> to vector<64x64xbf16>
    %63 = arith.truncf %55 : vector<64x128xf32> to vector<64x128xbf16>
    %cst_27 = arith.constant dense<0.000000e+00> : vector<64x128xf32>
    %64 = tpu.matmul %62, %63, %cst_27 {dimension_numbers = #tpu.dot_dimension_numbers<[1], [0], [0], [1], [0, 0, 1, 1], [], []>} : vector<64x64xbf16>, vector<64x128xbf16>, vector<64x128xf32> -> vector<64x128xf32>
    %c4 = arith.constant 4 : index
    %c0_28 = arith.constant 0 : index
    %c0_29 = arith.constant 0 : index
    %65 = vector.load %arg2[%c4, %c0_28, %c0_29] : memref<52x64x64xbf16, #tpu.memory_space<vmem>>, vector<1x64x64xbf16>
    %66 = vector.shape_cast %65 : vector<1x64x64xbf16> to vector<64x64xbf16>
    %67 = arith.truncf %50 : vector<64x128xf32> to vector<64x128xbf16>
    %cst_30 = arith.constant dense<0.000000e+00> : vector<64x128xf32>
    %68 = tpu.matmul %66, %67, %cst_30 {dimension_numbers = #tpu.dot_dimension_numbers<[1], [0], [0], [1], [0, 0, 1, 1], [], []>} : vector<64x64xbf16>, vector<64x128xbf16>, vector<64x128xf32> -> vector<64x128xf32>
    %69 = arith.addf %64, %68 : vector<64x128xf32>
    %c5 = arith.constant 5 : index
    %c0_31 = arith.constant 0 : index
    %c0_32 = arith.constant 0 : index
    %70 = vector.load %arg2[%c5, %c0_31, %c0_32] : memref<52x64x64xbf16, #tpu.memory_space<vmem>>, vector<1x64x64xbf16>
    %71 = vector.shape_cast %70 : vector<1x64x64xbf16> to vector<64x64xbf16>
    %72 = arith.truncf %60 : vector<64x128xf32> to vector<64x128xbf16>
    %cst_33 = arith.constant dense<0.000000e+00> : vector<64x128xf32>
    %73 = tpu.matmul %71, %72, %cst_33 {dimension_numbers = #tpu.dot_dimension_numbers<[1], [0], [0], [1], [0, 0, 1, 1], [], []>} : vector<64x64xbf16>, vector<64x128xbf16>, vector<64x128xf32> -> vector<64x128xf32>
    %74 = arith.addf %69, %73 : vector<64x128xf32>
    %c0_34 = arith.constant 0 : index
    %c1_35 = arith.constant 1 : index
    %75 = vector.load %arg3[%c0_34, %c1_35] : memref<64x20xf32, #tpu.memory_space<vmem>>, vector<64x1xf32>
    %76 = vector.broadcast %75 : vector<64x1xf32> to vector<64x128xf32>
    %77 = arith.addf %74, %76 : vector<64x128xf32>
    %c6 = arith.constant 6 : index
    %c0_36 = arith.constant 0 : index
    %c0_37 = arith.constant 0 : index
    %78 = vector.load %arg2[%c6, %c0_36, %c0_37] : memref<52x64x64xbf16, #tpu.memory_space<vmem>>, vector<1x64x64xbf16>
    %79 = vector.shape_cast %78 : vector<1x64x64xbf16> to vector<64x64xbf16>
    %80 = arith.truncf %21 : vector<64x128xf32> to vector<64x128xbf16>
    %cst_38 = arith.constant dense<0.000000e+00> : vector<64x128xf32>
    %81 = tpu.matmul %79, %80, %cst_38 {dimension_numbers = #tpu.dot_dimension_numbers<[1], [0], [0], [1], [0, 0, 1, 1], [], []>} : vector<64x64xbf16>, vector<64x128xbf16>, vector<64x128xf32> -> vector<64x128xf32>
    %c0_39 = arith.constant 0 : index
    %c2_40 = arith.constant 2 : index
    %82 = vector.load %arg3[%c0_39, %c2_40] : memref<64x20xf32, #tpu.memory_space<vmem>>, vector<64x1xf32>
    %83 = vector.broadcast %82 : vector<64x1xf32> to vector<64x128xf32>
    %84 = arith.addf %81, %83 : vector<64x128xf32>
    %85 = arith.addf %84, %77 : vector<64x128xf32>
    %c1_i32_41 = arith.constant 1 : i32
    %86 = tpu.dynamic_rotate %85 by %c1_i32_41 dim 1 : vector<64x128xf32>, i32 -> vector<64x128xf32>
    %cst_42 = arith.constant 0.000000e+00 : f32
    %87 = vector.shape_cast %18 : vector<1x128xi1> to vector<1x128xi1>
    %88 = vector.broadcast %87 : vector<1x128xi1> to vector<64x128xi1>
    %89 = vector.broadcast %cst_42 : f32 to vector<64x128xf32>
    %90 = arith.select %88, %86, %89 : vector<64x128xi1>, vector<64x128xf32>
    %c127_i32_43 = arith.constant 127 : i32
    %91 = tpu.dynamic_rotate %85 by %c127_i32_43 dim 1 : vector<64x128xf32>, i32 -> vector<64x128xf32>
    %cst_44 = arith.constant 0.000000e+00 : f32
    %92 = vector.shape_cast %20 : vector<1x128xi1> to vector<1x128xi1>
    %93 = vector.broadcast %92 : vector<1x128xi1> to vector<64x128xi1>
    %94 = vector.broadcast %cst_44 : f32 to vector<64x128xf32>
    %95 = arith.select %93, %91, %94 : vector<64x128xi1>, vector<64x128xf32>
    %c7 = arith.constant 7 : index
    %c0_45 = arith.constant 0 : index
    %c0_46 = arith.constant 0 : index
    %96 = vector.load %arg2[%c7, %c0_45, %c0_46] : memref<52x64x64xbf16, #tpu.memory_space<vmem>>, vector<1x64x64xbf16>
    %97 = vector.shape_cast %96 : vector<1x64x64xbf16> to vector<64x64xbf16>
    %98 = arith.truncf %90 : vector<64x128xf32> to vector<64x128xbf16>
    %cst_47 = arith.constant dense<0.000000e+00> : vector<64x128xf32>
    %99 = tpu.matmul %97, %98, %cst_47 {dimension_numbers = #tpu.dot_dimension_numbers<[1], [0], [0], [1], [0, 0, 1, 1], [], []>} : vector<64x64xbf16>, vector<64x128xbf16>, vector<64x128xf32> -> vector<64x128xf32>
    %c8 = arith.constant 8 : index
    %c0_48 = arith.constant 0 : index
    %c0_49 = arith.constant 0 : index
    %100 = vector.load %arg2[%c8, %c0_48, %c0_49] : memref<52x64x64xbf16, #tpu.memory_space<vmem>>, vector<1x64x64xbf16>
    %101 = vector.shape_cast %100 : vector<1x64x64xbf16> to vector<64x64xbf16>
    %102 = arith.truncf %85 : vector<64x128xf32> to vector<64x128xbf16>
    %cst_50 = arith.constant dense<0.000000e+00> : vector<64x128xf32>
    %103 = tpu.matmul %101, %102, %cst_50 {dimension_numbers = #tpu.dot_dimension_numbers<[1], [0], [0], [1], [0, 0, 1, 1], [], []>} : vector<64x64xbf16>, vector<64x128xbf16>, vector<64x128xf32> -> vector<64x128xf32>
    %104 = arith.addf %99, %103 : vector<64x128xf32>
    %c9 = arith.constant 9 : index
    %c0_51 = arith.constant 0 : index
    %c0_52 = arith.constant 0 : index
    %105 = vector.load %arg2[%c9, %c0_51, %c0_52] : memref<52x64x64xbf16, #tpu.memory_space<vmem>>, vector<1x64x64xbf16>
    %106 = vector.shape_cast %105 : vector<1x64x64xbf16> to vector<64x64xbf16>
    %107 = arith.truncf %95 : vector<64x128xf32> to vector<64x128xbf16>
    %cst_53 = arith.constant dense<0.000000e+00> : vector<64x128xf32>
    %108 = tpu.matmul %106, %107, %cst_53 {dimension_numbers = #tpu.dot_dimension_numbers<[1], [0], [0], [1], [0, 0, 1, 1], [], []>} : vector<64x64xbf16>, vector<64x128xbf16>, vector<64x128xf32> -> vector<64x128xf32>
    %109 = arith.addf %104, %108 : vector<64x128xf32>
    %c0_54 = arith.constant 0 : index
    %c3_55 = arith.constant 3 : index
    %110 = vector.load %arg3[%c0_54, %c3_55] : memref<64x20xf32, #tpu.memory_space<vmem>>, vector<64x1xf32>
    %111 = vector.broadcast %110 : vector<64x1xf32> to vector<64x128xf32>
    %112 = arith.addf %109, %111 : vector<64x128xf32>
    %cst_56 = arith.constant 0.000000e+00 : f32
    %113 = vector.broadcast %cst_56 : f32 to vector<64x128xf32>
    %114 = arith.maximumf %112, %113 : vector<64x128xf32>
    %c1_i32_57 = arith.constant 1 : i32
    %115 = tpu.dynamic_rotate %114 by %c1_i32_57 dim 1 : vector<64x128xf32>, i32 -> vector<64x128xf32>
    %cst_58 = arith.constant 0.000000e+00 : f32
    %116 = vector.shape_cast %18 : vector<1x128xi1> to vector<1x128xi1>
    %117 = vector.broadcast %116 : vector<1x128xi1> to vector<64x128xi1>
    %118 = vector.broadcast %cst_58 : f32 to vector<64x128xf32>
    %119 = arith.select %117, %115, %118 : vector<64x128xi1>, vector<64x128xf32>
    %c127_i32_59 = arith.constant 127 : i32
    %120 = tpu.dynamic_rotate %114 by %c127_i32_59 dim 1 : vector<64x128xf32>, i32 -> vector<64x128xf32>
    %cst_60 = arith.constant 0.000000e+00 : f32
    %121 = vector.shape_cast %20 : vector<1x128xi1> to vector<1x128xi1>
    %122 = vector.broadcast %121 : vector<1x128xi1> to vector<64x128xi1>
    %123 = vector.broadcast %cst_60 : f32 to vector<64x128xf32>
    %124 = arith.select %122, %120, %123 : vector<64x128xi1>, vector<64x128xf32>
    %c10 = arith.constant 10 : index
    %c0_61 = arith.constant 0 : index
    %c0_62 = arith.constant 0 : index
    %125 = vector.load %arg2[%c10, %c0_61, %c0_62] : memref<52x64x64xbf16, #tpu.memory_space<vmem>>, vector<1x64x64xbf16>
    %126 = vector.shape_cast %125 : vector<1x64x64xbf16> to vector<64x64xbf16>
    %127 = arith.truncf %119 : vector<64x128xf32> to vector<64x128xbf16>
    %cst_63 = arith.constant dense<0.000000e+00> : vector<64x128xf32>
    %128 = tpu.matmul %126, %127, %cst_63 {dimension_numbers = #tpu.dot_dimension_numbers<[1], [0], [0], [1], [0, 0, 1, 1], [], []>} : vector<64x64xbf16>, vector<64x128xbf16>, vector<64x128xf32> -> vector<64x128xf32>
    %c11 = arith.constant 11 : index
    %c0_64 = arith.constant 0 : index
    %c0_65 = arith.constant 0 : index
    %129 = vector.load %arg2[%c11, %c0_64, %c0_65] : memref<52x64x64xbf16, #tpu.memory_space<vmem>>, vector<1x64x64xbf16>
    %130 = vector.shape_cast %129 : vector<1x64x64xbf16> to vector<64x64xbf16>
    %131 = arith.truncf %114 : vector<64x128xf32> to vector<64x128xbf16>
    %cst_66 = arith.constant dense<0.000000e+00> : vector<64x128xf32>
    %132 = tpu.matmul %130, %131, %cst_66 {dimension_numbers = #tpu.dot_dimension_numbers<[1], [0], [0], [1], [0, 0, 1, 1], [], []>} : vector<64x64xbf16>, vector<64x128xbf16>, vector<64x128xf32> -> vector<64x128xf32>
    %133 = arith.addf %128, %132 : vector<64x128xf32>
    %c12 = arith.constant 12 : index
    %c0_67 = arith.constant 0 : index
    %c0_68 = arith.constant 0 : index
    %134 = vector.load %arg2[%c12, %c0_67, %c0_68] : memref<52x64x64xbf16, #tpu.memory_space<vmem>>, vector<1x64x64xbf16>
    %135 = vector.shape_cast %134 : vector<1x64x64xbf16> to vector<64x64xbf16>
    %136 = arith.truncf %124 : vector<64x128xf32> to vector<64x128xbf16>
    %cst_69 = arith.constant dense<0.000000e+00> : vector<64x128xf32>
    %137 = tpu.matmul %135, %136, %cst_69 {dimension_numbers = #tpu.dot_dimension_numbers<[1], [0], [0], [1], [0, 0, 1, 1], [], []>} : vector<64x64xbf16>, vector<64x128xbf16>, vector<64x128xf32> -> vector<64x128xf32>
    %138 = arith.addf %133, %137 : vector<64x128xf32>
    %c0_70 = arith.constant 0 : index
    %c4_71 = arith.constant 4 : index
    %139 = vector.load %arg3[%c0_70, %c4_71] : memref<64x20xf32, #tpu.memory_space<vmem>>, vector<64x1xf32>
    %140 = vector.broadcast %139 : vector<64x1xf32> to vector<64x128xf32>
    %141 = arith.addf %138, %140 : vector<64x128xf32>
    %142 = arith.addf %85, %141 : vector<64x128xf32>
    %c1_i32_72 = arith.constant 1 : i32
    %143 = tpu.dynamic_rotate %142 by %c1_i32_72 dim 1 : vector<64x128xf32>, i32 -> vector<64x128xf32>
    %cst_73 = arith.constant 0.000000e+00 : f32
    %144 = vector.shape_cast %18 : vector<1x128xi1> to vector<1x128xi1>
    %145 = vector.broadcast %144 : vector<1x128xi1> to vector<64x128xi1>
    %146 = vector.broadcast %cst_73 : f32 to vector<64x128xf32>
    %147 = arith.select %145, %143, %146 : vector<64x128xi1>, vector<64x128xf32>
    %c127_i32_74 = arith.constant 127 : i32
    %148 = tpu.dynamic_rotate %142 by %c127_i32_74 dim 1 : vector<64x128xf32>, i32 -> vector<64x128xf32>
    %cst_75 = arith.constant 0.000000e+00 : f32
    %149 = vector.shape_cast %20 : vector<1x128xi1> to vector<1x128xi1>
    %150 = vector.broadcast %149 : vector<1x128xi1> to vector<64x128xi1>
    %151 = vector.broadcast %cst_75 : f32 to vector<64x128xf32>
    %152 = arith.select %150, %148, %151 : vector<64x128xi1>, vector<64x128xf32>
    %c13 = arith.constant 13 : index
    %c0_76 = arith.constant 0 : index
    %c0_77 = arith.constant 0 : index
    %153 = vector.load %arg2[%c13, %c0_76, %c0_77] : memref<52x64x64xbf16, #tpu.memory_space<vmem>>, vector<1x64x64xbf16>
    %154 = vector.shape_cast %153 : vector<1x64x64xbf16> to vector<64x64xbf16>
    %155 = arith.truncf %147 : vector<64x128xf32> to vector<64x128xbf16>
    %cst_78 = arith.constant dense<0.000000e+00> : vector<64x128xf32>
    %156 = tpu.matmul %154, %155, %cst_78 {dimension_numbers = #tpu.dot_dimension_numbers<[1], [0], [0], [1], [0, 0, 1, 1], [], []>} : vector<64x64xbf16>, vector<64x128xbf16>, vector<64x128xf32> -> vector<64x128xf32>
    %c14 = arith.constant 14 : index
    %c0_79 = arith.constant 0 : index
    %c0_80 = arith.constant 0 : index
    %157 = vector.load %arg2[%c14, %c0_79, %c0_80] : memref<52x64x64xbf16, #tpu.memory_space<vmem>>, vector<1x64x64xbf16>
    %158 = vector.shape_cast %157 : vector<1x64x64xbf16> to vector<64x64xbf16>
    %159 = arith.truncf %142 : vector<64x128xf32> to vector<64x128xbf16>
    %cst_81 = arith.constant dense<0.000000e+00> : vector<64x128xf32>
    %160 = tpu.matmul %158, %159, %cst_81 {dimension_numbers = #tpu.dot_dimension_numbers<[1], [0], [0], [1], [0, 0, 1, 1], [], []>} : vector<64x64xbf16>, vector<64x128xbf16>, vector<64x128xf32> -> vector<64x128xf32>
    %161 = arith.addf %156, %160 : vector<64x128xf32>
    %c15 = arith.constant 15 : index
    %c0_82 = arith.constant 0 : index
    %c0_83 = arith.constant 0 : index
    %162 = vector.load %arg2[%c15, %c0_82, %c0_83] : memref<52x64x64xbf16, #tpu.memory_space<vmem>>, vector<1x64x64xbf16>
    %163 = vector.shape_cast %162 : vector<1x64x64xbf16> to vector<64x64xbf16>
    %164 = arith.truncf %152 : vector<64x128xf32> to vector<64x128xbf16>
    %cst_84 = arith.constant dense<0.000000e+00> : vector<64x128xf32>
    %165 = tpu.matmul %163, %164, %cst_84 {dimension_numbers = #tpu.dot_dimension_numbers<[1], [0], [0], [1], [0, 0, 1, 1], [], []>} : vector<64x64xbf16>, vector<64x128xbf16>, vector<64x128xf32> -> vector<64x128xf32>
    %166 = arith.addf %161, %165 : vector<64x128xf32>
    %c0_85 = arith.constant 0 : index
    %c5_86 = arith.constant 5 : index
    %167 = vector.load %arg3[%c0_85, %c5_86] : memref<64x20xf32, #tpu.memory_space<vmem>>, vector<64x1xf32>
    %168 = vector.broadcast %167 : vector<64x1xf32> to vector<64x128xf32>
    %169 = arith.addf %166, %168 : vector<64x128xf32>
    %cst_87 = arith.constant 0.000000e+00 : f32
    %170 = vector.broadcast %cst_87 : f32 to vector<64x128xf32>
    %171 = arith.maximumf %169, %170 : vector<64x128xf32>
    %c1_i32_88 = arith.constant 1 : i32
    %172 = tpu.dynamic_rotate %171 by %c1_i32_88 dim 1 : vector<64x128xf32>, i32 -> vector<64x128xf32>
    %cst_89 = arith.constant 0.000000e+00 : f32
    %173 = vector.shape_cast %18 : vector<1x128xi1> to vector<1x128xi1>
    %174 = vector.broadcast %173 : vector<1x128xi1> to vector<64x128xi1>
    %175 = vector.broadcast %cst_89 : f32 to vector<64x128xf32>
    %176 = arith.select %174, %172, %175 : vector<64x128xi1>, vector<64x128xf32>
    %c127_i32_90 = arith.constant 127 : i32
    %177 = tpu.dynamic_rotate %171 by %c127_i32_90 dim 1 : vector<64x128xf32>, i32 -> vector<64x128xf32>
    %cst_91 = arith.constant 0.000000e+00 : f32
    %178 = vector.shape_cast %20 : vector<1x128xi1> to vector<1x128xi1>
    %179 = vector.broadcast %178 : vector<1x128xi1> to vector<64x128xi1>
    %180 = vector.broadcast %cst_91 : f32 to vector<64x128xf32>
    %181 = arith.select %179, %177, %180 : vector<64x128xi1>, vector<64x128xf32>
    %c16 = arith.constant 16 : index
    %c0_92 = arith.constant 0 : index
    %c0_93 = arith.constant 0 : index
    %182 = vector.load %arg2[%c16, %c0_92, %c0_93] : memref<52x64x64xbf16, #tpu.memory_space<vmem>>, vector<1x64x64xbf16>
    %183 = vector.shape_cast %182 : vector<1x64x64xbf16> to vector<64x64xbf16>
    %184 = arith.truncf %176 : vector<64x128xf32> to vector<64x128xbf16>
    %cst_94 = arith.constant dense<0.000000e+00> : vector<64x128xf32>
    %185 = tpu.matmul %183, %184, %cst_94 {dimension_numbers = #tpu.dot_dimension_numbers<[1], [0], [0], [1], [0, 0, 1, 1], [], []>} : vector<64x64xbf16>, vector<64x128xbf16>, vector<64x128xf32> -> vector<64x128xf32>
    %c17 = arith.constant 17 : index
    %c0_95 = arith.constant 0 : index
    %c0_96 = arith.constant 0 : index
    %186 = vector.load %arg2[%c17, %c0_95, %c0_96] : memref<52x64x64xbf16, #tpu.memory_space<vmem>>, vector<1x64x64xbf16>
    %187 = vector.shape_cast %186 : vector<1x64x64xbf16> to vector<64x64xbf16>
    %188 = arith.truncf %171 : vector<64x128xf32> to vector<64x128xbf16>
    %cst_97 = arith.constant dense<0.000000e+00> : vector<64x128xf32>
    %189 = tpu.matmul %187, %188, %cst_97 {dimension_numbers = #tpu.dot_dimension_numbers<[1], [0], [0], [1], [0, 0, 1, 1], [], []>} : vector<64x64xbf16>, vector<64x128xbf16>, vector<64x128xf32> -> vector<64x128xf32>
    %190 = arith.addf %185, %189 : vector<64x128xf32>
    %c18 = arith.constant 18 : index
    %c0_98 = arith.constant 0 : index
    %c0_99 = arith.constant 0 : index
    %191 = vector.load %arg2[%c18, %c0_98, %c0_99] : memref<52x64x64xbf16, #tpu.memory_space<vmem>>, vector<1x64x64xbf16>
    %192 = vector.shape_cast %191 : vector<1x64x64xbf16> to vector<64x64xbf16>
    %193 = arith.truncf %181 : vector<64x128xf32> to vector<64x128xbf16>
    %cst_100 = arith.constant dense<0.000000e+00> : vector<64x128xf32>
    %194 = tpu.matmul %192, %193, %cst_100 {dimension_numbers = #tpu.dot_dimension_numbers<[1], [0], [0], [1], [0, 0, 1, 1], [], []>} : vector<64x64xbf16>, vector<64x128xbf16>, vector<64x128xf32> -> vector<64x128xf32>
    %195 = arith.addf %190, %194 : vector<64x128xf32>
    %c0_101 = arith.constant 0 : index
    %c6_102 = arith.constant 6 : index
    %196 = vector.load %arg3[%c0_101, %c6_102] : memref<64x20xf32, #tpu.memory_space<vmem>>, vector<64x1xf32>
    %197 = vector.broadcast %196 : vector<64x1xf32> to vector<64x128xf32>
    %198 = arith.addf %195, %197 : vector<64x128xf32>
    %c19 = arith.constant 19 : index
    %c0_103 = arith.constant 0 : index
    %c0_104 = arith.constant 0 : index
    %199 = vector.load %arg2[%c19, %c0_103, %c0_104] : memref<52x64x64xbf16, #tpu.memory_space<vmem>>, vector<1x64x64xbf16>
    %200 = vector.shape_cast %199 : vector<1x64x64xbf16> to vector<64x64xbf16>
    %201 = arith.truncf %142 : vector<64x128xf32> to vector<64x128xbf16>
    %cst_105 = arith.constant dense<0.000000e+00> : vector<64x128xf32>
    %202 = tpu.matmul %200, %201, %cst_105 {dimension_numbers = #tpu.dot_dimension_numbers<[1], [0], [0], [1], [0, 0, 1, 1], [], []>} : vector<64x64xbf16>, vector<64x128xbf16>, vector<64x128xf32> -> vector<64x128xf32>
    %c0_106 = arith.constant 0 : index
    %c7_107 = arith.constant 7 : index
    %203 = vector.load %arg3[%c0_106, %c7_107] : memref<64x20xf32, #tpu.memory_space<vmem>>, vector<64x1xf32>
    %204 = vector.broadcast %203 : vector<64x1xf32> to vector<64x128xf32>
    %205 = arith.addf %202, %204 : vector<64x128xf32>
    %206 = arith.addf %205, %198 : vector<64x128xf32>
    %c1_i32_108 = arith.constant 1 : i32
    %207 = tpu.dynamic_rotate %206 by %c1_i32_108 dim 1 : vector<64x128xf32>, i32 -> vector<64x128xf32>
    %cst_109 = arith.constant 0.000000e+00 : f32
    %208 = vector.shape_cast %18 : vector<1x128xi1> to vector<1x128xi1>
    %209 = vector.broadcast %208 : vector<1x128xi1> to vector<64x128xi1>
    %210 = vector.broadcast %cst_109 : f32 to vector<64x128xf32>
    %211 = arith.select %209, %207, %210 : vector<64x128xi1>, vector<64x128xf32>
    %c127_i32_110 = arith.constant 127 : i32
    %212 = tpu.dynamic_rotate %206 by %c127_i32_110 dim 1 : vector<64x128xf32>, i32 -> vector<64x128xf32>
    %cst_111 = arith.constant 0.000000e+00 : f32
    %213 = vector.shape_cast %20 : vector<1x128xi1> to vector<1x128xi1>
    %214 = vector.broadcast %213 : vector<1x128xi1> to vector<64x128xi1>
    %215 = vector.broadcast %cst_111 : f32 to vector<64x128xf32>
    %216 = arith.select %214, %212, %215 : vector<64x128xi1>, vector<64x128xf32>
    %c20 = arith.constant 20 : index
    %c0_112 = arith.constant 0 : index
    %c0_113 = arith.constant 0 : index
    %217 = vector.load %arg2[%c20, %c0_112, %c0_113] : memref<52x64x64xbf16, #tpu.memory_space<vmem>>, vector<1x64x64xbf16>
    %218 = vector.shape_cast %217 : vector<1x64x64xbf16> to vector<64x64xbf16>
    %219 = arith.truncf %211 : vector<64x128xf32> to vector<64x128xbf16>
    %cst_114 = arith.constant dense<0.000000e+00> : vector<64x128xf32>
    %220 = tpu.matmul %218, %219, %cst_114 {dimension_numbers = #tpu.dot_dimension_numbers<[1], [0], [0], [1], [0, 0, 1, 1], [], []>} : vector<64x64xbf16>, vector<64x128xbf16>, vector<64x128xf32> -> vector<64x128xf32>
    %c21 = arith.constant 21 : index
    %c0_115 = arith.constant 0 : index
    %c0_116 = arith.constant 0 : index
    %221 = vector.load %arg2[%c21, %c0_115, %c0_116] : memref<52x64x64xbf16, #tpu.memory_space<vmem>>, vector<1x64x64xbf16>
    %222 = vector.shape_cast %221 : vector<1x64x64xbf16> to vector<64x64xbf16>
    %223 = arith.truncf %206 : vector<64x128xf32> to vector<64x128xbf16>
    %cst_117 = arith.constant dense<0.000000e+00> : vector<64x128xf32>
    %224 = tpu.matmul %222, %223, %cst_117 {dimension_numbers = #tpu.dot_dimension_numbers<[1], [0], [0], [1], [0, 0, 1, 1], [], []>} : vector<64x64xbf16>, vector<64x128xbf16>, vector<64x128xf32> -> vector<64x128xf32>
    %225 = arith.addf %220, %224 : vector<64x128xf32>
    %c22 = arith.constant 22 : index
    %c0_118 = arith.constant 0 : index
    %c0_119 = arith.constant 0 : index
    %226 = vector.load %arg2[%c22, %c0_118, %c0_119] : memref<52x64x64xbf16, #tpu.memory_space<vmem>>, vector<1x64x64xbf16>
    %227 = vector.shape_cast %226 : vector<1x64x64xbf16> to vector<64x64xbf16>
    %228 = arith.truncf %216 : vector<64x128xf32> to vector<64x128xbf16>
    %cst_120 = arith.constant dense<0.000000e+00> : vector<64x128xf32>
    %229 = tpu.matmul %227, %228, %cst_120 {dimension_numbers = #tpu.dot_dimension_numbers<[1], [0], [0], [1], [0, 0, 1, 1], [], []>} : vector<64x64xbf16>, vector<64x128xbf16>, vector<64x128xf32> -> vector<64x128xf32>
    %230 = arith.addf %225, %229 : vector<64x128xf32>
    %c0_121 = arith.constant 0 : index
    %c8_122 = arith.constant 8 : index
    %231 = vector.load %arg3[%c0_121, %c8_122] : memref<64x20xf32, #tpu.memory_space<vmem>>, vector<64x1xf32>
    %232 = vector.broadcast %231 : vector<64x1xf32> to vector<64x128xf32>
    %233 = arith.addf %230, %232 : vector<64x128xf32>
    %cst_123 = arith.constant 0.000000e+00 : f32
    %234 = vector.broadcast %cst_123 : f32 to vector<64x128xf32>
    %235 = arith.maximumf %233, %234 : vector<64x128xf32>
    %c1_i32_124 = arith.constant 1 : i32
    %236 = tpu.dynamic_rotate %235 by %c1_i32_124 dim 1 : vector<64x128xf32>, i32 -> vector<64x128xf32>
    %cst_125 = arith.constant 0.000000e+00 : f32
    %237 = vector.shape_cast %18 : vector<1x128xi1> to vector<1x128xi1>
    %238 = vector.broadcast %237 : vector<1x128xi1> to vector<64x128xi1>
    %239 = vector.broadcast %cst_125 : f32 to vector<64x128xf32>
    %240 = arith.select %238, %236, %239 : vector<64x128xi1>, vector<64x128xf32>
    %c127_i32_126 = arith.constant 127 : i32
    %241 = tpu.dynamic_rotate %235 by %c127_i32_126 dim 1 : vector<64x128xf32>, i32 -> vector<64x128xf32>
    %cst_127 = arith.constant 0.000000e+00 : f32
    %242 = vector.shape_cast %20 : vector<1x128xi1> to vector<1x128xi1>
    %243 = vector.broadcast %242 : vector<1x128xi1> to vector<64x128xi1>
    %244 = vector.broadcast %cst_127 : f32 to vector<64x128xf32>
    %245 = arith.select %243, %241, %244 : vector<64x128xi1>, vector<64x128xf32>
    %c23 = arith.constant 23 : index
    %c0_128 = arith.constant 0 : index
    %c0_129 = arith.constant 0 : index
    %246 = vector.load %arg2[%c23, %c0_128, %c0_129] : memref<52x64x64xbf16, #tpu.memory_space<vmem>>, vector<1x64x64xbf16>
    %247 = vector.shape_cast %246 : vector<1x64x64xbf16> to vector<64x64xbf16>
    %248 = arith.truncf %240 : vector<64x128xf32> to vector<64x128xbf16>
    %cst_130 = arith.constant dense<0.000000e+00> : vector<64x128xf32>
    %249 = tpu.matmul %247, %248, %cst_130 {dimension_numbers = #tpu.dot_dimension_numbers<[1], [0], [0], [1], [0, 0, 1, 1], [], []>} : vector<64x64xbf16>, vector<64x128xbf16>, vector<64x128xf32> -> vector<64x128xf32>
    %c24 = arith.constant 24 : index
    %c0_131 = arith.constant 0 : index
    %c0_132 = arith.constant 0 : index
    %250 = vector.load %arg2[%c24, %c0_131, %c0_132] : memref<52x64x64xbf16, #tpu.memory_space<vmem>>, vector<1x64x64xbf16>
    %251 = vector.shape_cast %250 : vector<1x64x64xbf16> to vector<64x64xbf16>
    %252 = arith.truncf %235 : vector<64x128xf32> to vector<64x128xbf16>
    %cst_133 = arith.constant dense<0.000000e+00> : vector<64x128xf32>
    %253 = tpu.matmul %251, %252, %cst_133 {dimension_numbers = #tpu.dot_dimension_numbers<[1], [0], [0], [1], [0, 0, 1, 1], [], []>} : vector<64x64xbf16>, vector<64x128xbf16>, vector<64x128xf32> -> vector<64x128xf32>
    %254 = arith.addf %249, %253 : vector<64x128xf32>
    %c25 = arith.constant 25 : index
    %c0_134 = arith.constant 0 : index
    %c0_135 = arith.constant 0 : index
    %255 = vector.load %arg2[%c25, %c0_134, %c0_135] : memref<52x64x64xbf16, #tpu.memory_space<vmem>>, vector<1x64x64xbf16>
    %256 = vector.shape_cast %255 : vector<1x64x64xbf16> to vector<64x64xbf16>
    %257 = arith.truncf %245 : vector<64x128xf32> to vector<64x128xbf16>
    %cst_136 = arith.constant dense<0.000000e+00> : vector<64x128xf32>
    %258 = tpu.matmul %256, %257, %cst_136 {dimension_numbers = #tpu.dot_dimension_numbers<[1], [0], [0], [1], [0, 0, 1, 1], [], []>} : vector<64x64xbf16>, vector<64x128xbf16>, vector<64x128xf32> -> vector<64x128xf32>
    %259 = arith.addf %254, %258 : vector<64x128xf32>
    %c0_137 = arith.constant 0 : index
    %c9_138 = arith.constant 9 : index
    %260 = vector.load %arg3[%c0_137, %c9_138] : memref<64x20xf32, #tpu.memory_space<vmem>>, vector<64x1xf32>
    %261 = vector.broadcast %260 : vector<64x1xf32> to vector<64x128xf32>
    %262 = arith.addf %259, %261 : vector<64x128xf32>
    %263 = arith.addf %206, %262 : vector<64x128xf32>
    %c1_i32_139 = arith.constant 1 : i32
    %264 = tpu.dynamic_rotate %263 by %c1_i32_139 dim 1 : vector<64x128xf32>, i32 -> vector<64x128xf32>
    %cst_140 = arith.constant 0.000000e+00 : f32
    %265 = vector.shape_cast %18 : vector<1x128xi1> to vector<1x128xi1>
    %266 = vector.broadcast %265 : vector<1x128xi1> to vector<64x128xi1>
    %267 = vector.broadcast %cst_140 : f32 to vector<64x128xf32>
    %268 = arith.select %266, %264, %267 : vector<64x128xi1>, vector<64x128xf32>
    %c127_i32_141 = arith.constant 127 : i32
    %269 = tpu.dynamic_rotate %263 by %c127_i32_141 dim 1 : vector<64x128xf32>, i32 -> vector<64x128xf32>
    %cst_142 = arith.constant 0.000000e+00 : f32
    %270 = vector.shape_cast %20 : vector<1x128xi1> to vector<1x128xi1>
    %271 = vector.broadcast %270 : vector<1x128xi1> to vector<64x128xi1>
    %272 = vector.broadcast %cst_142 : f32 to vector<64x128xf32>
    %273 = arith.select %271, %269, %272 : vector<64x128xi1>, vector<64x128xf32>
    %c26 = arith.constant 26 : index
    %c0_143 = arith.constant 0 : index
    %c0_144 = arith.constant 0 : index
    %274 = vector.load %arg2[%c26, %c0_143, %c0_144] : memref<52x64x64xbf16, #tpu.memory_space<vmem>>, vector<1x64x64xbf16>
    %275 = vector.shape_cast %274 : vector<1x64x64xbf16> to vector<64x64xbf16>
    %276 = arith.truncf %268 : vector<64x128xf32> to vector<64x128xbf16>
    %cst_145 = arith.constant dense<0.000000e+00> : vector<64x128xf32>
    %277 = tpu.matmul %275, %276, %cst_145 {dimension_numbers = #tpu.dot_dimension_numbers<[1], [0], [0], [1], [0, 0, 1, 1], [], []>} : vector<64x64xbf16>, vector<64x128xbf16>, vector<64x128xf32> -> vector<64x128xf32>
    %c27 = arith.constant 27 : index
    %c0_146 = arith.constant 0 : index
    %c0_147 = arith.constant 0 : index
    %278 = vector.load %arg2[%c27, %c0_146, %c0_147] : memref<52x64x64xbf16, #tpu.memory_space<vmem>>, vector<1x64x64xbf16>
    %279 = vector.shape_cast %278 : vector<1x64x64xbf16> to vector<64x64xbf16>
    %280 = arith.truncf %263 : vector<64x128xf32> to vector<64x128xbf16>
    %cst_148 = arith.constant dense<0.000000e+00> : vector<64x128xf32>
    %281 = tpu.matmul %279, %280, %cst_148 {dimension_numbers = #tpu.dot_dimension_numbers<[1], [0], [0], [1], [0, 0, 1, 1], [], []>} : vector<64x64xbf16>, vector<64x128xbf16>, vector<64x128xf32> -> vector<64x128xf32>
    %282 = arith.addf %277, %281 : vector<64x128xf32>
    %c28 = arith.constant 28 : index
    %c0_149 = arith.constant 0 : index
    %c0_150 = arith.constant 0 : index
    %283 = vector.load %arg2[%c28, %c0_149, %c0_150] : memref<52x64x64xbf16, #tpu.memory_space<vmem>>, vector<1x64x64xbf16>
    %284 = vector.shape_cast %283 : vector<1x64x64xbf16> to vector<64x64xbf16>
    %285 = arith.truncf %273 : vector<64x128xf32> to vector<64x128xbf16>
    %cst_151 = arith.constant dense<0.000000e+00> : vector<64x128xf32>
    %286 = tpu.matmul %284, %285, %cst_151 {dimension_numbers = #tpu.dot_dimension_numbers<[1], [0], [0], [1], [0, 0, 1, 1], [], []>} : vector<64x64xbf16>, vector<64x128xbf16>, vector<64x128xf32> -> vector<64x128xf32>
    %287 = arith.addf %282, %286 : vector<64x128xf32>
    %c0_152 = arith.constant 0 : index
    %c10_153 = arith.constant 10 : index
    %288 = vector.load %arg3[%c0_152, %c10_153] : memref<64x20xf32, #tpu.memory_space<vmem>>, vector<64x1xf32>
    %289 = vector.broadcast %288 : vector<64x1xf32> to vector<64x128xf32>
    %290 = arith.addf %287, %289 : vector<64x128xf32>
    %cst_154 = arith.constant 0.000000e+00 : f32
    %291 = vector.broadcast %cst_154 : f32 to vector<64x128xf32>
    %292 = arith.maximumf %290, %291 : vector<64x128xf32>
    %c1_i32_155 = arith.constant 1 : i32
    %293 = tpu.dynamic_rotate %292 by %c1_i32_155 dim 1 : vector<64x128xf32>, i32 -> vector<64x128xf32>
    %cst_156 = arith.constant 0.000000e+00 : f32
    %294 = vector.shape_cast %18 : vector<1x128xi1> to vector<1x128xi1>
    %295 = vector.broadcast %294 : vector<1x128xi1> to vector<64x128xi1>
    %296 = vector.broadcast %cst_156 : f32 to vector<64x128xf32>
    %297 = arith.select %295, %293, %296 : vector<64x128xi1>, vector<64x128xf32>
    %c127_i32_157 = arith.constant 127 : i32
    %298 = tpu.dynamic_rotate %292 by %c127_i32_157 dim 1 : vector<64x128xf32>, i32 -> vector<64x128xf32>
    %cst_158 = arith.constant 0.000000e+00 : f32
    %299 = vector.shape_cast %20 : vector<1x128xi1> to vector<1x128xi1>
    %300 = vector.broadcast %299 : vector<1x128xi1> to vector<64x128xi1>
    %301 = vector.broadcast %cst_158 : f32 to vector<64x128xf32>
    %302 = arith.select %300, %298, %301 : vector<64x128xi1>, vector<64x128xf32>
    %c29 = arith.constant 29 : index
    %c0_159 = arith.constant 0 : index
    %c0_160 = arith.constant 0 : index
    %303 = vector.load %arg2[%c29, %c0_159, %c0_160] : memref<52x64x64xbf16, #tpu.memory_space<vmem>>, vector<1x64x64xbf16>
    %304 = vector.shape_cast %303 : vector<1x64x64xbf16> to vector<64x64xbf16>
    %305 = arith.truncf %297 : vector<64x128xf32> to vector<64x128xbf16>
    %cst_161 = arith.constant dense<0.000000e+00> : vector<64x128xf32>
    %306 = tpu.matmul %304, %305, %cst_161 {dimension_numbers = #tpu.dot_dimension_numbers<[1], [0], [0], [1], [0, 0, 1, 1], [], []>} : vector<64x64xbf16>, vector<64x128xbf16>, vector<64x128xf32> -> vector<64x128xf32>
    %c30 = arith.constant 30 : index
    %c0_162 = arith.constant 0 : index
    %c0_163 = arith.constant 0 : index
    %307 = vector.load %arg2[%c30, %c0_162, %c0_163] : memref<52x64x64xbf16, #tpu.memory_space<vmem>>, vector<1x64x64xbf16>
    %308 = vector.shape_cast %307 : vector<1x64x64xbf16> to vector<64x64xbf16>
    %309 = arith.truncf %292 : vector<64x128xf32> to vector<64x128xbf16>
    %cst_164 = arith.constant dense<0.000000e+00> : vector<64x128xf32>
    %310 = tpu.matmul %308, %309, %cst_164 {dimension_numbers = #tpu.dot_dimension_numbers<[1], [0], [0], [1], [0, 0, 1, 1], [], []>} : vector<64x64xbf16>, vector<64x128xbf16>, vector<64x128xf32> -> vector<64x128xf32>
    %311 = arith.addf %306, %310 : vector<64x128xf32>
    %c31 = arith.constant 31 : index
    %c0_165 = arith.constant 0 : index
    %c0_166 = arith.constant 0 : index
    %312 = vector.load %arg2[%c31, %c0_165, %c0_166] : memref<52x64x64xbf16, #tpu.memory_space<vmem>>, vector<1x64x64xbf16>
    %313 = vector.shape_cast %312 : vector<1x64x64xbf16> to vector<64x64xbf16>
    %314 = arith.truncf %302 : vector<64x128xf32> to vector<64x128xbf16>
    %cst_167 = arith.constant dense<0.000000e+00> : vector<64x128xf32>
    %315 = tpu.matmul %313, %314, %cst_167 {dimension_numbers = #tpu.dot_dimension_numbers<[1], [0], [0], [1], [0, 0, 1, 1], [], []>} : vector<64x64xbf16>, vector<64x128xbf16>, vector<64x128xf32> -> vector<64x128xf32>
    %316 = arith.addf %311, %315 : vector<64x128xf32>
    %c0_168 = arith.constant 0 : index
    %c11_169 = arith.constant 11 : index
    %317 = vector.load %arg3[%c0_168, %c11_169] : memref<64x20xf32, #tpu.memory_space<vmem>>, vector<64x1xf32>
    %318 = vector.broadcast %317 : vector<64x1xf32> to vector<64x128xf32>
    %319 = arith.addf %316, %318 : vector<64x128xf32>
    %c32 = arith.constant 32 : index
    %c0_170 = arith.constant 0 : index
    %c0_171 = arith.constant 0 : index
    %320 = vector.load %arg2[%c32, %c0_170, %c0_171] : memref<52x64x64xbf16, #tpu.memory_space<vmem>>, vector<1x64x64xbf16>
    %321 = vector.shape_cast %320 : vector<1x64x64xbf16> to vector<64x64xbf16>
    %322 = arith.truncf %263 : vector<64x128xf32> to vector<64x128xbf16>
    %cst_172 = arith.constant dense<0.000000e+00> : vector<64x128xf32>
    %323 = tpu.matmul %321, %322, %cst_172 {dimension_numbers = #tpu.dot_dimension_numbers<[1], [0], [0], [1], [0, 0, 1, 1], [], []>} : vector<64x64xbf16>, vector<64x128xbf16>, vector<64x128xf32> -> vector<64x128xf32>
    %c0_173 = arith.constant 0 : index
    %c12_174 = arith.constant 12 : index
    %324 = vector.load %arg3[%c0_173, %c12_174] : memref<64x20xf32, #tpu.memory_space<vmem>>, vector<64x1xf32>
    %325 = vector.broadcast %324 : vector<64x1xf32> to vector<64x128xf32>
    %326 = arith.addf %323, %325 : vector<64x128xf32>
    %327 = arith.addf %326, %319 : vector<64x128xf32>
    %c1_i32_175 = arith.constant 1 : i32
    %328 = tpu.dynamic_rotate %327 by %c1_i32_175 dim 1 : vector<64x128xf32>, i32 -> vector<64x128xf32>
    %cst_176 = arith.constant 0.000000e+00 : f32
    %329 = vector.shape_cast %18 : vector<1x128xi1> to vector<1x128xi1>
    %330 = vector.broadcast %329 : vector<1x128xi1> to vector<64x128xi1>
    %331 = vector.broadcast %cst_176 : f32 to vector<64x128xf32>
    %332 = arith.select %330, %328, %331 : vector<64x128xi1>, vector<64x128xf32>
    %c127_i32_177 = arith.constant 127 : i32
    %333 = tpu.dynamic_rotate %327 by %c127_i32_177 dim 1 : vector<64x128xf32>, i32 -> vector<64x128xf32>
    %cst_178 = arith.constant 0.000000e+00 : f32
    %334 = vector.shape_cast %20 : vector<1x128xi1> to vector<1x128xi1>
    %335 = vector.broadcast %334 : vector<1x128xi1> to vector<64x128xi1>
    %336 = vector.broadcast %cst_178 : f32 to vector<64x128xf32>
    %337 = arith.select %335, %333, %336 : vector<64x128xi1>, vector<64x128xf32>
    %c33 = arith.constant 33 : index
    %c0_179 = arith.constant 0 : index
    %c0_180 = arith.constant 0 : index
    %338 = vector.load %arg2[%c33, %c0_179, %c0_180] : memref<52x64x64xbf16, #tpu.memory_space<vmem>>, vector<1x64x64xbf16>
    %339 = vector.shape_cast %338 : vector<1x64x64xbf16> to vector<64x64xbf16>
    %340 = arith.truncf %332 : vector<64x128xf32> to vector<64x128xbf16>
    %cst_181 = arith.constant dense<0.000000e+00> : vector<64x128xf32>
    %341 = tpu.matmul %339, %340, %cst_181 {dimension_numbers = #tpu.dot_dimension_numbers<[1], [0], [0], [1], [0, 0, 1, 1], [], []>} : vector<64x64xbf16>, vector<64x128xbf16>, vector<64x128xf32> -> vector<64x128xf32>
    %c34 = arith.constant 34 : index
    %c0_182 = arith.constant 0 : index
    %c0_183 = arith.constant 0 : index
    %342 = vector.load %arg2[%c34, %c0_182, %c0_183] : memref<52x64x64xbf16, #tpu.memory_space<vmem>>, vector<1x64x64xbf16>
    %343 = vector.shape_cast %342 : vector<1x64x64xbf16> to vector<64x64xbf16>
    %344 = arith.truncf %327 : vector<64x128xf32> to vector<64x128xbf16>
    %cst_184 = arith.constant dense<0.000000e+00> : vector<64x128xf32>
    %345 = tpu.matmul %343, %344, %cst_184 {dimension_numbers = #tpu.dot_dimension_numbers<[1], [0], [0], [1], [0, 0, 1, 1], [], []>} : vector<64x64xbf16>, vector<64x128xbf16>, vector<64x128xf32> -> vector<64x128xf32>
    %346 = arith.addf %341, %345 : vector<64x128xf32>
    %c35 = arith.constant 35 : index
    %c0_185 = arith.constant 0 : index
    %c0_186 = arith.constant 0 : index
    %347 = vector.load %arg2[%c35, %c0_185, %c0_186] : memref<52x64x64xbf16, #tpu.memory_space<vmem>>, vector<1x64x64xbf16>
    %348 = vector.shape_cast %347 : vector<1x64x64xbf16> to vector<64x64xbf16>
    %349 = arith.truncf %337 : vector<64x128xf32> to vector<64x128xbf16>
    %cst_187 = arith.constant dense<0.000000e+00> : vector<64x128xf32>
    %350 = tpu.matmul %348, %349, %cst_187 {dimension_numbers = #tpu.dot_dimension_numbers<[1], [0], [0], [1], [0, 0, 1, 1], [], []>} : vector<64x64xbf16>, vector<64x128xbf16>, vector<64x128xf32> -> vector<64x128xf32>
    %351 = arith.addf %346, %350 : vector<64x128xf32>
    %c0_188 = arith.constant 0 : index
    %c13_189 = arith.constant 13 : index
    %352 = vector.load %arg3[%c0_188, %c13_189] : memref<64x20xf32, #tpu.memory_space<vmem>>, vector<64x1xf32>
    %353 = vector.broadcast %352 : vector<64x1xf32> to vector<64x128xf32>
    %354 = arith.addf %351, %353 : vector<64x128xf32>
    %cst_190 = arith.constant 0.000000e+00 : f32
    %355 = vector.broadcast %cst_190 : f32 to vector<64x128xf32>
    %356 = arith.maximumf %354, %355 : vector<64x128xf32>
    %c1_i32_191 = arith.constant 1 : i32
    %357 = tpu.dynamic_rotate %356 by %c1_i32_191 dim 1 : vector<64x128xf32>, i32 -> vector<64x128xf32>
    %cst_192 = arith.constant 0.000000e+00 : f32
    %358 = vector.shape_cast %18 : vector<1x128xi1> to vector<1x128xi1>
    %359 = vector.broadcast %358 : vector<1x128xi1> to vector<64x128xi1>
    %360 = vector.broadcast %cst_192 : f32 to vector<64x128xf32>
    %361 = arith.select %359, %357, %360 : vector<64x128xi1>, vector<64x128xf32>
    %c127_i32_193 = arith.constant 127 : i32
    %362 = tpu.dynamic_rotate %356 by %c127_i32_193 dim 1 : vector<64x128xf32>, i32 -> vector<64x128xf32>
    %cst_194 = arith.constant 0.000000e+00 : f32
    %363 = vector.shape_cast %20 : vector<1x128xi1> to vector<1x128xi1>
    %364 = vector.broadcast %363 : vector<1x128xi1> to vector<64x128xi1>
    %365 = vector.broadcast %cst_194 : f32 to vector<64x128xf32>
    %366 = arith.select %364, %362, %365 : vector<64x128xi1>, vector<64x128xf32>
    %c36 = arith.constant 36 : index
    %c0_195 = arith.constant 0 : index
    %c0_196 = arith.constant 0 : index
    %367 = vector.load %arg2[%c36, %c0_195, %c0_196] : memref<52x64x64xbf16, #tpu.memory_space<vmem>>, vector<1x64x64xbf16>
    %368 = vector.shape_cast %367 : vector<1x64x64xbf16> to vector<64x64xbf16>
    %369 = arith.truncf %361 : vector<64x128xf32> to vector<64x128xbf16>
    %cst_197 = arith.constant dense<0.000000e+00> : vector<64x128xf32>
    %370 = tpu.matmul %368, %369, %cst_197 {dimension_numbers = #tpu.dot_dimension_numbers<[1], [0], [0], [1], [0, 0, 1, 1], [], []>} : vector<64x64xbf16>, vector<64x128xbf16>, vector<64x128xf32> -> vector<64x128xf32>
    %c37 = arith.constant 37 : index
    %c0_198 = arith.constant 0 : index
    %c0_199 = arith.constant 0 : index
    %371 = vector.load %arg2[%c37, %c0_198, %c0_199] : memref<52x64x64xbf16, #tpu.memory_space<vmem>>, vector<1x64x64xbf16>
    %372 = vector.shape_cast %371 : vector<1x64x64xbf16> to vector<64x64xbf16>
    %373 = arith.truncf %356 : vector<64x128xf32> to vector<64x128xbf16>
    %cst_200 = arith.constant dense<0.000000e+00> : vector<64x128xf32>
    %374 = tpu.matmul %372, %373, %cst_200 {dimension_numbers = #tpu.dot_dimension_numbers<[1], [0], [0], [1], [0, 0, 1, 1], [], []>} : vector<64x64xbf16>, vector<64x128xbf16>, vector<64x128xf32> -> vector<64x128xf32>
    %375 = arith.addf %370, %374 : vector<64x128xf32>
    %c38 = arith.constant 38 : index
    %c0_201 = arith.constant 0 : index
    %c0_202 = arith.constant 0 : index
    %376 = vector.load %arg2[%c38, %c0_201, %c0_202] : memref<52x64x64xbf16, #tpu.memory_space<vmem>>, vector<1x64x64xbf16>
    %377 = vector.shape_cast %376 : vector<1x64x64xbf16> to vector<64x64xbf16>
    %378 = arith.truncf %366 : vector<64x128xf32> to vector<64x128xbf16>
    %cst_203 = arith.constant dense<0.000000e+00> : vector<64x128xf32>
    %379 = tpu.matmul %377, %378, %cst_203 {dimension_numbers = #tpu.dot_dimension_numbers<[1], [0], [0], [1], [0, 0, 1, 1], [], []>} : vector<64x64xbf16>, vector<64x128xbf16>, vector<64x128xf32> -> vector<64x128xf32>
    %380 = arith.addf %375, %379 : vector<64x128xf32>
    %c0_204 = arith.constant 0 : index
    %c14_205 = arith.constant 14 : index
    %381 = vector.load %arg3[%c0_204, %c14_205] : memref<64x20xf32, #tpu.memory_space<vmem>>, vector<64x1xf32>
    %382 = vector.broadcast %381 : vector<64x1xf32> to vector<64x128xf32>
    %383 = arith.addf %380, %382 : vector<64x128xf32>
    %384 = arith.addf %327, %383 : vector<64x128xf32>
    %c1_i32_206 = arith.constant 1 : i32
    %385 = tpu.dynamic_rotate %384 by %c1_i32_206 dim 1 : vector<64x128xf32>, i32 -> vector<64x128xf32>
    %cst_207 = arith.constant 0.000000e+00 : f32
    %386 = vector.shape_cast %18 : vector<1x128xi1> to vector<1x128xi1>
    %387 = vector.broadcast %386 : vector<1x128xi1> to vector<64x128xi1>
    %388 = vector.broadcast %cst_207 : f32 to vector<64x128xf32>
    %389 = arith.select %387, %385, %388 : vector<64x128xi1>, vector<64x128xf32>
    %c127_i32_208 = arith.constant 127 : i32
    %390 = tpu.dynamic_rotate %384 by %c127_i32_208 dim 1 : vector<64x128xf32>, i32 -> vector<64x128xf32>
    %cst_209 = arith.constant 0.000000e+00 : f32
    %391 = vector.shape_cast %20 : vector<1x128xi1> to vector<1x128xi1>
    %392 = vector.broadcast %391 : vector<1x128xi1> to vector<64x128xi1>
    %393 = vector.broadcast %cst_209 : f32 to vector<64x128xf32>
    %394 = arith.select %392, %390, %393 : vector<64x128xi1>, vector<64x128xf32>
    %c39 = arith.constant 39 : index
    %c0_210 = arith.constant 0 : index
    %c0_211 = arith.constant 0 : index
    %395 = vector.load %arg2[%c39, %c0_210, %c0_211] : memref<52x64x64xbf16, #tpu.memory_space<vmem>>, vector<1x64x64xbf16>
    %396 = vector.shape_cast %395 : vector<1x64x64xbf16> to vector<64x64xbf16>
    %397 = arith.truncf %389 : vector<64x128xf32> to vector<64x128xbf16>
    %cst_212 = arith.constant dense<0.000000e+00> : vector<64x128xf32>
    %398 = tpu.matmul %396, %397, %cst_212 {dimension_numbers = #tpu.dot_dimension_numbers<[1], [0], [0], [1], [0, 0, 1, 1], [], []>} : vector<64x64xbf16>, vector<64x128xbf16>, vector<64x128xf32> -> vector<64x128xf32>
    %c40 = arith.constant 40 : index
    %c0_213 = arith.constant 0 : index
    %c0_214 = arith.constant 0 : index
    %399 = vector.load %arg2[%c40, %c0_213, %c0_214] : memref<52x64x64xbf16, #tpu.memory_space<vmem>>, vector<1x64x64xbf16>
    %400 = vector.shape_cast %399 : vector<1x64x64xbf16> to vector<64x64xbf16>
    %401 = arith.truncf %384 : vector<64x128xf32> to vector<64x128xbf16>
    %cst_215 = arith.constant dense<0.000000e+00> : vector<64x128xf32>
    %402 = tpu.matmul %400, %401, %cst_215 {dimension_numbers = #tpu.dot_dimension_numbers<[1], [0], [0], [1], [0, 0, 1, 1], [], []>} : vector<64x64xbf16>, vector<64x128xbf16>, vector<64x128xf32> -> vector<64x128xf32>
    %403 = arith.addf %398, %402 : vector<64x128xf32>
    %c41 = arith.constant 41 : index
    %c0_216 = arith.constant 0 : index
    %c0_217 = arith.constant 0 : index
    %404 = vector.load %arg2[%c41, %c0_216, %c0_217] : memref<52x64x64xbf16, #tpu.memory_space<vmem>>, vector<1x64x64xbf16>
    %405 = vector.shape_cast %404 : vector<1x64x64xbf16> to vector<64x64xbf16>
    %406 = arith.truncf %394 : vector<64x128xf32> to vector<64x128xbf16>
    %cst_218 = arith.constant dense<0.000000e+00> : vector<64x128xf32>
    %407 = tpu.matmul %405, %406, %cst_218 {dimension_numbers = #tpu.dot_dimension_numbers<[1], [0], [0], [1], [0, 0, 1, 1], [], []>} : vector<64x64xbf16>, vector<64x128xbf16>, vector<64x128xf32> -> vector<64x128xf32>
    %408 = arith.addf %403, %407 : vector<64x128xf32>
    %c0_219 = arith.constant 0 : index
    %c15_220 = arith.constant 15 : index
    %409 = vector.load %arg3[%c0_219, %c15_220] : memref<64x20xf32, #tpu.memory_space<vmem>>, vector<64x1xf32>
    %410 = vector.broadcast %409 : vector<64x1xf32> to vector<64x128xf32>
    %411 = arith.addf %408, %410 : vector<64x128xf32>
    %cst_221 = arith.constant 0.000000e+00 : f32
    %412 = vector.broadcast %cst_221 : f32 to vector<64x128xf32>
    %413 = arith.maximumf %411, %412 : vector<64x128xf32>
    %c1_i32_222 = arith.constant 1 : i32
    %414 = tpu.dynamic_rotate %413 by %c1_i32_222 dim 1 : vector<64x128xf32>, i32 -> vector<64x128xf32>
    %cst_223 = arith.constant 0.000000e+00 : f32
    %415 = vector.shape_cast %18 : vector<1x128xi1> to vector<1x128xi1>
    %416 = vector.broadcast %415 : vector<1x128xi1> to vector<64x128xi1>
    %417 = vector.broadcast %cst_223 : f32 to vector<64x128xf32>
    %418 = arith.select %416, %414, %417 : vector<64x128xi1>, vector<64x128xf32>
    %c127_i32_224 = arith.constant 127 : i32
    %419 = tpu.dynamic_rotate %413 by %c127_i32_224 dim 1 : vector<64x128xf32>, i32 -> vector<64x128xf32>
    %cst_225 = arith.constant 0.000000e+00 : f32
    %420 = vector.shape_cast %20 : vector<1x128xi1> to vector<1x128xi1>
    %421 = vector.broadcast %420 : vector<1x128xi1> to vector<64x128xi1>
    %422 = vector.broadcast %cst_225 : f32 to vector<64x128xf32>
    %423 = arith.select %421, %419, %422 : vector<64x128xi1>, vector<64x128xf32>
    %c42 = arith.constant 42 : index
    %c0_226 = arith.constant 0 : index
    %c0_227 = arith.constant 0 : index
    %424 = vector.load %arg2[%c42, %c0_226, %c0_227] : memref<52x64x64xbf16, #tpu.memory_space<vmem>>, vector<1x64x64xbf16>
    %425 = vector.shape_cast %424 : vector<1x64x64xbf16> to vector<64x64xbf16>
    %426 = arith.truncf %418 : vector<64x128xf32> to vector<64x128xbf16>
    %cst_228 = arith.constant dense<0.000000e+00> : vector<64x128xf32>
    %427 = tpu.matmul %425, %426, %cst_228 {dimension_numbers = #tpu.dot_dimension_numbers<[1], [0], [0], [1], [0, 0, 1, 1], [], []>} : vector<64x64xbf16>, vector<64x128xbf16>, vector<64x128xf32> -> vector<64x128xf32>
    %c43 = arith.constant 43 : index
    %c0_229 = arith.constant 0 : index
    %c0_230 = arith.constant 0 : index
    %428 = vector.load %arg2[%c43, %c0_229, %c0_230] : memref<52x64x64xbf16, #tpu.memory_space<vmem>>, vector<1x64x64xbf16>
    %429 = vector.shape_cast %428 : vector<1x64x64xbf16> to vector<64x64xbf16>
    %430 = arith.truncf %413 : vector<64x128xf32> to vector<64x128xbf16>
    %cst_231 = arith.constant dense<0.000000e+00> : vector<64x128xf32>
    %431 = tpu.matmul %429, %430, %cst_231 {dimension_numbers = #tpu.dot_dimension_numbers<[1], [0], [0], [1], [0, 0, 1, 1], [], []>} : vector<64x64xbf16>, vector<64x128xbf16>, vector<64x128xf32> -> vector<64x128xf32>
    %432 = arith.addf %427, %431 : vector<64x128xf32>
    %c44 = arith.constant 44 : index
    %c0_232 = arith.constant 0 : index
    %c0_233 = arith.constant 0 : index
    %433 = vector.load %arg2[%c44, %c0_232, %c0_233] : memref<52x64x64xbf16, #tpu.memory_space<vmem>>, vector<1x64x64xbf16>
    %434 = vector.shape_cast %433 : vector<1x64x64xbf16> to vector<64x64xbf16>
    %435 = arith.truncf %423 : vector<64x128xf32> to vector<64x128xbf16>
    %cst_234 = arith.constant dense<0.000000e+00> : vector<64x128xf32>
    %436 = tpu.matmul %434, %435, %cst_234 {dimension_numbers = #tpu.dot_dimension_numbers<[1], [0], [0], [1], [0, 0, 1, 1], [], []>} : vector<64x64xbf16>, vector<64x128xbf16>, vector<64x128xf32> -> vector<64x128xf32>
    %437 = arith.addf %432, %436 : vector<64x128xf32>
    %c0_235 = arith.constant 0 : index
    %c16_236 = arith.constant 16 : index
    %438 = vector.load %arg3[%c0_235, %c16_236] : memref<64x20xf32, #tpu.memory_space<vmem>>, vector<64x1xf32>
    %439 = vector.broadcast %438 : vector<64x1xf32> to vector<64x128xf32>
    %440 = arith.addf %437, %439 : vector<64x128xf32>
    %c45 = arith.constant 45 : index
    %c0_237 = arith.constant 0 : index
    %c0_238 = arith.constant 0 : index
    %441 = vector.load %arg2[%c45, %c0_237, %c0_238] : memref<52x64x64xbf16, #tpu.memory_space<vmem>>, vector<1x64x64xbf16>
    %442 = vector.shape_cast %441 : vector<1x64x64xbf16> to vector<64x64xbf16>
    %443 = arith.truncf %384 : vector<64x128xf32> to vector<64x128xbf16>
    %cst_239 = arith.constant dense<0.000000e+00> : vector<64x128xf32>
    %444 = tpu.matmul %442, %443, %cst_239 {dimension_numbers = #tpu.dot_dimension_numbers<[1], [0], [0], [1], [0, 0, 1, 1], [], []>} : vector<64x64xbf16>, vector<64x128xbf16>, vector<64x128xf32> -> vector<64x128xf32>
    %c0_240 = arith.constant 0 : index
    %c17_241 = arith.constant 17 : index
    %445 = vector.load %arg3[%c0_240, %c17_241] : memref<64x20xf32, #tpu.memory_space<vmem>>, vector<64x1xf32>
    %446 = vector.broadcast %445 : vector<64x1xf32> to vector<64x128xf32>
    %447 = arith.addf %444, %446 : vector<64x128xf32>
    %448 = arith.addf %447, %440 : vector<64x128xf32>
    %c1_i32_242 = arith.constant 1 : i32
    %449 = tpu.dynamic_rotate %448 by %c1_i32_242 dim 1 : vector<64x128xf32>, i32 -> vector<64x128xf32>
    %cst_243 = arith.constant 0.000000e+00 : f32
    %450 = vector.shape_cast %18 : vector<1x128xi1> to vector<1x128xi1>
    %451 = vector.broadcast %450 : vector<1x128xi1> to vector<64x128xi1>
    %452 = vector.broadcast %cst_243 : f32 to vector<64x128xf32>
    %453 = arith.select %451, %449, %452 : vector<64x128xi1>, vector<64x128xf32>
    %c127_i32_244 = arith.constant 127 : i32
    %454 = tpu.dynamic_rotate %448 by %c127_i32_244 dim 1 : vector<64x128xf32>, i32 -> vector<64x128xf32>
    %cst_245 = arith.constant 0.000000e+00 : f32
    %455 = vector.shape_cast %20 : vector<1x128xi1> to vector<1x128xi1>
    %456 = vector.broadcast %455 : vector<1x128xi1> to vector<64x128xi1>
    %457 = vector.broadcast %cst_245 : f32 to vector<64x128xf32>
    %458 = arith.select %456, %454, %457 : vector<64x128xi1>, vector<64x128xf32>
    %c46 = arith.constant 46 : index
    %c0_246 = arith.constant 0 : index
    %c0_247 = arith.constant 0 : index
    %459 = vector.load %arg2[%c46, %c0_246, %c0_247] : memref<52x64x64xbf16, #tpu.memory_space<vmem>>, vector<1x64x64xbf16>
    %460 = vector.shape_cast %459 : vector<1x64x64xbf16> to vector<64x64xbf16>
    %461 = arith.truncf %453 : vector<64x128xf32> to vector<64x128xbf16>
    %cst_248 = arith.constant dense<0.000000e+00> : vector<64x128xf32>
    %462 = tpu.matmul %460, %461, %cst_248 {dimension_numbers = #tpu.dot_dimension_numbers<[1], [0], [0], [1], [0, 0, 1, 1], [], []>} : vector<64x64xbf16>, vector<64x128xbf16>, vector<64x128xf32> -> vector<64x128xf32>
    %c47 = arith.constant 47 : index
    %c0_249 = arith.constant 0 : index
    %c0_250 = arith.constant 0 : index
    %463 = vector.load %arg2[%c47, %c0_249, %c0_250] : memref<52x64x64xbf16, #tpu.memory_space<vmem>>, vector<1x64x64xbf16>
    %464 = vector.shape_cast %463 : vector<1x64x64xbf16> to vector<64x64xbf16>
    %465 = arith.truncf %448 : vector<64x128xf32> to vector<64x128xbf16>
    %cst_251 = arith.constant dense<0.000000e+00> : vector<64x128xf32>
    %466 = tpu.matmul %464, %465, %cst_251 {dimension_numbers = #tpu.dot_dimension_numbers<[1], [0], [0], [1], [0, 0, 1, 1], [], []>} : vector<64x64xbf16>, vector<64x128xbf16>, vector<64x128xf32> -> vector<64x128xf32>
    %467 = arith.addf %462, %466 : vector<64x128xf32>
    %c48 = arith.constant 48 : index
    %c0_252 = arith.constant 0 : index
    %c0_253 = arith.constant 0 : index
    %468 = vector.load %arg2[%c48, %c0_252, %c0_253] : memref<52x64x64xbf16, #tpu.memory_space<vmem>>, vector<1x64x64xbf16>
    %469 = vector.shape_cast %468 : vector<1x64x64xbf16> to vector<64x64xbf16>
    %470 = arith.truncf %458 : vector<64x128xf32> to vector<64x128xbf16>
    %cst_254 = arith.constant dense<0.000000e+00> : vector<64x128xf32>
    %471 = tpu.matmul %469, %470, %cst_254 {dimension_numbers = #tpu.dot_dimension_numbers<[1], [0], [0], [1], [0, 0, 1, 1], [], []>} : vector<64x64xbf16>, vector<64x128xbf16>, vector<64x128xf32> -> vector<64x128xf32>
    %472 = arith.addf %467, %471 : vector<64x128xf32>
    %c0_255 = arith.constant 0 : index
    %c18_256 = arith.constant 18 : index
    %473 = vector.load %arg3[%c0_255, %c18_256] : memref<64x20xf32, #tpu.memory_space<vmem>>, vector<64x1xf32>
    %474 = vector.broadcast %473 : vector<64x1xf32> to vector<64x128xf32>
    %475 = arith.addf %472, %474 : vector<64x128xf32>
    %cst_257 = arith.constant 0.000000e+00 : f32
    %476 = vector.broadcast %cst_257 : f32 to vector<64x128xf32>
    %477 = arith.maximumf %475, %476 : vector<64x128xf32>
    %c1_i32_258 = arith.constant 1 : i32
    %478 = tpu.dynamic_rotate %477 by %c1_i32_258 dim 1 : vector<64x128xf32>, i32 -> vector<64x128xf32>
    %cst_259 = arith.constant 0.000000e+00 : f32
    %479 = vector.shape_cast %18 : vector<1x128xi1> to vector<1x128xi1>
    %480 = vector.broadcast %479 : vector<1x128xi1> to vector<64x128xi1>
    %481 = vector.broadcast %cst_259 : f32 to vector<64x128xf32>
    %482 = arith.select %480, %478, %481 : vector<64x128xi1>, vector<64x128xf32>
    %c127_i32_260 = arith.constant 127 : i32
    %483 = tpu.dynamic_rotate %477 by %c127_i32_260 dim 1 : vector<64x128xf32>, i32 -> vector<64x128xf32>
    %cst_261 = arith.constant 0.000000e+00 : f32
    %484 = vector.shape_cast %20 : vector<1x128xi1> to vector<1x128xi1>
    %485 = vector.broadcast %484 : vector<1x128xi1> to vector<64x128xi1>
    %486 = vector.broadcast %cst_261 : f32 to vector<64x128xf32>
    %487 = arith.select %485, %483, %486 : vector<64x128xi1>, vector<64x128xf32>
    %c49 = arith.constant 49 : index
    %c0_262 = arith.constant 0 : index
    %c0_263 = arith.constant 0 : index
    %488 = vector.load %arg2[%c49, %c0_262, %c0_263] : memref<52x64x64xbf16, #tpu.memory_space<vmem>>, vector<1x64x64xbf16>
    %489 = vector.shape_cast %488 : vector<1x64x64xbf16> to vector<64x64xbf16>
    %490 = arith.truncf %482 : vector<64x128xf32> to vector<64x128xbf16>
    %cst_264 = arith.constant dense<0.000000e+00> : vector<64x128xf32>
    %491 = tpu.matmul %489, %490, %cst_264 {dimension_numbers = #tpu.dot_dimension_numbers<[1], [0], [0], [1], [0, 0, 1, 1], [], []>} : vector<64x64xbf16>, vector<64x128xbf16>, vector<64x128xf32> -> vector<64x128xf32>
    %c50 = arith.constant 50 : index
    %c0_265 = arith.constant 0 : index
    %c0_266 = arith.constant 0 : index
    %492 = vector.load %arg2[%c50, %c0_265, %c0_266] : memref<52x64x64xbf16, #tpu.memory_space<vmem>>, vector<1x64x64xbf16>
    %493 = vector.shape_cast %492 : vector<1x64x64xbf16> to vector<64x64xbf16>
    %494 = arith.truncf %477 : vector<64x128xf32> to vector<64x128xbf16>
    %cst_267 = arith.constant dense<0.000000e+00> : vector<64x128xf32>
    %495 = tpu.matmul %493, %494, %cst_267 {dimension_numbers = #tpu.dot_dimension_numbers<[1], [0], [0], [1], [0, 0, 1, 1], [], []>} : vector<64x64xbf16>, vector<64x128xbf16>, vector<64x128xf32> -> vector<64x128xf32>
    %496 = arith.addf %491, %495 : vector<64x128xf32>
    %c51 = arith.constant 51 : index
    %c0_268 = arith.constant 0 : index
    %c0_269 = arith.constant 0 : index
    %497 = vector.load %arg2[%c51, %c0_268, %c0_269] : memref<52x64x64xbf16, #tpu.memory_space<vmem>>, vector<1x64x64xbf16>
    %498 = vector.shape_cast %497 : vector<1x64x64xbf16> to vector<64x64xbf16>
    %499 = arith.truncf %487 : vector<64x128xf32> to vector<64x128xbf16>
    %cst_270 = arith.constant dense<0.000000e+00> : vector<64x128xf32>
    %500 = tpu.matmul %498, %499, %cst_270 {dimension_numbers = #tpu.dot_dimension_numbers<[1], [0], [0], [1], [0, 0, 1, 1], [], []>} : vector<64x64xbf16>, vector<64x128xbf16>, vector<64x128xf32> -> vector<64x128xf32>
    %501 = arith.addf %496, %500 : vector<64x128xf32>
    %c0_271 = arith.constant 0 : index
    %c19_272 = arith.constant 19 : index
    %502 = vector.load %arg3[%c0_271, %c19_272] : memref<64x20xf32, #tpu.memory_space<vmem>>, vector<64x1xf32>
    %503 = vector.broadcast %502 : vector<64x1xf32> to vector<64x128xf32>
    %504 = arith.addf %501, %503 : vector<64x128xf32>
    %505 = arith.addf %448, %504 : vector<64x128xf32>
    %c0_273 = arith.constant 0 : index
    %c0_274 = arith.constant 0 : index
    %506 = vector.load %arg4[%c0_273, %c0_274] : memref<129x4xf32, #tpu.memory_space<vmem>>, vector<129x4xf32>
    %507 = vector.extract_strided_slice %506 {offsets = [0, 0], sizes = [64, 4], strides = [1, 1]} : vector<129x4xf32> to vector<64x4xf32>
    %508 = vector.extract_strided_slice %506 {offsets = [64, 0], sizes = [64, 4], strides = [1, 1]} : vector<129x4xf32> to vector<64x4xf32>
    %509 = vector.extract_strided_slice %506 {offsets = [128, 0], sizes = [1, 4], strides = [1, 1]} : vector<129x4xf32> to vector<1x4xf32>
    %cst_275 = arith.constant dense<0xFF800000> : vector<64xf32>
    %510 = vector.multi_reduction <maximumf>, %505, %cst_275 [1] : vector<64x128xf32> to vector<64xf32>
    %511 = vector.shape_cast %510 : vector<64xf32> to vector<64x1xf32>
    %cst_276 = arith.constant dense<0.000000e+00> : vector<64xf32>
    %512 = vector.multi_reduction <add>, %505, %cst_276 [1] : vector<64x128xf32> to vector<64xf32>
    %513 = vector.shape_cast %512 : vector<64xf32> to vector<64x1xf32>
    %cst_277 = arith.constant 7.812500e-03 : f32
    %514 = vector.broadcast %cst_277 : f32 to vector<64x1xf32>
    %515 = arith.mulf %513, %514 : vector<64x1xf32>
    %516 = vector.broadcast %511 : vector<64x1xf32> to vector<64x4xf32>
    %517 = arith.mulf %516, %507 : vector<64x4xf32>
    %518 = vector.broadcast %515 : vector<64x1xf32> to vector<64x4xf32>
    %519 = arith.mulf %518, %508 : vector<64x4xf32>
    %520 = arith.addf %517, %519 : vector<64x4xf32>
    %cst_278 = arith.constant dense<0.000000e+00> : vector<4xf32>
    %521 = vector.multi_reduction <add>, %520, %cst_278 [0] : vector<64x4xf32> to vector<4xf32>
    %522 = vector.shape_cast %521 : vector<4xf32> to vector<1x4xf32>
    %523 = arith.addf %522, %509 : vector<1x4xf32>
    %c0_279 = arith.constant 0 : index
    %c0_280 = arith.constant 0 : index
    %c0_281 = arith.constant 0 : index
    %524 = vector.load %arg5[%c0_279, %c0_280, %c0_281] : memref<1x1x4xf32, #tpu.memory_space<vmem>>, vector<1x1x4xf32>
    %525 = vector.shape_cast %524 : vector<1x1x4xf32> to vector<1x4xf32>
    %526 = vector.shape_cast %523 : vector<1x4xf32> to vector<1x1x4xf32>
    tpu.vector_store %arg5[%c0_279, %c0_280, %c0_281], %526 {strides = array<i32>} : memref<1x1x4xf32, #tpu.memory_space<vmem>>, vector<1x1x4xf32>,
    return
  }
  func.func @transform_0(%arg0: i32) -> (i32, i32) {
    %c0_i32 = arith.constant 0 : i32
    %c0_i32_0 = arith.constant 0 : i32
    return %c0_i32, %arg0 : i32, i32
  }
  func.func @transform_1(%arg0: i32) -> (i32, i32, i32) {
    %c0_i32 = arith.constant 0 : i32
    %c0_i32_0 = arith.constant 0 : i32
    %c0_i32_1 = arith.constant 0 : i32
    %c0_i32_2 = arith.constant 0 : i32
    return %c0_i32, %c0_i32_0, %c0_i32_1 : i32, i32, i32
  }
  func.func @transform_2(%arg0: i32) -> (i32, i32) {
    %c0_i32 = arith.constant 0 : i32
    %c0_i32_0 = arith.constant 0 : i32
    %c0_i32_1 = arith.constant 0 : i32
    return %c0_i32, %c0_i32_0 : i32, i32
  }
  func.func @transform_3(%arg0: i32) -> (i32, i32) {
    %c0_i32 = arith.constant 0 : i32
    %c0_i32_0 = arith.constant 0 : i32
    %c0_i32_1 = arith.constant 0 : i32
    return %c0_i32, %c0_i32_0 : i32, i32
  }
  func.func @transform_4(%arg0: i32) -> (i32, i32, i32) {
    %c0_i32 = arith.constant 0 : i32
    %c0_i32_0 = arith.constant 0 : i32
    %c0_i32_1 = arith.constant 0 : i32
    return %arg0, %c0_i32, %c0_i32_0 : i32, i32, i32
  }
}

</mosaic_0001>

<bundles_post_ra>
// kernel: _lambda_.1
= control target key start
LH: loop header
LB: loop body
LE: loop exit
PB: predicated region body
PF: predicated region fallthrough
CT: control target
= control target key end

     0   :  { %9 = vsyncpa [#allocation4], 0  ;;  %s10275_s0 = inlined_call_operand.vmem [shape: f32[64,256], index: 0, kind: input, shape index: {}]   ;;  %s10276_s1 = inlined_call_operand.hbm [shape: bf16[52,64,64], index: 1, kind: input, shape index: {}]   ;;  %s10277_s2 = inlined_call_operand.vmem [shape: f32[64,20], index: 2, kind: input, shape index: {}]   ;;  %s10278_s3 = inlined_call_operand.hbm [shape: f32[129,4], index: 3, kind: input, shape index: {}]   ;;  %s10279_s4 = inlined_call_operand.hbm [shape: f32[2,1,4], index: 4, kind: output, shape index: {}]  }
   0x1   :  { %10 = vsyncpa [#allocation7], 0 }
   0x2   :  { %11 = vsyncpa [#allocation5], 0 }
   0x3   :  { %13 = vsyncpa [#allocation5 + $0x1], 0  ;;  %s8833_s15 = smov 0   ;;  %s8835_s16 = smov 0  }
   0x4   :  { %s8837_s17 = smov 0   ;;  %s8839_s18 = smov 0  }
   0x5 LB: > { %s8854_s19 = sadd.s32 4294967295, %s8778_s18   ;;  %s6163_s20 = sadd.s32 4294967294, %s8778_s18   ;;  %s8778_s18 = sphi %s8839_s18, %s10291_s18   ;;  %s8774_s17 = sphi %s8837_s17, %s10290_s17   ;;  %s8770_s16 = sphi %s8835_s16, %s10289_s16   ;;  %s8766_s15 = sphi %s8833_s15, %s10288_s15  }
   0x6   : > { %s8858_s21 = sadd.s32 1, %s8778_s18   ;;  %s26_s22 = sadd.s32 1, %s8774_s17 }
   0x7   : > { %s23_s23 = ssub.s32 %s8778_s18, %s8858_s21  ;;  %p33_p0 = scmp.ne.s32.totalorder %s8774_s17, %s8770_s16 }
   0x8   : > { %p24_p1 = scmp.eq.s32.totalorder %s23_s23, 0  ;;  %p34_p2 = scmp.eq.s32.totalorder %s8778_s18, 0 }
   0x9   : > { %p126_p3 = scmp.eq.s32.totalorder %s8854_s19, 1  ;;  %p131_p4 = scmp.ne.s32.totalorder %s8770_s16, %s8766_s15 }
   0xa   : > { %s8870_s24 = scalar_select %p24_p1, %s8774_s17, %s26_s22  }
   0xb   : > { %p8872_p5 = por %p34_p2, %p33_p0  ;;  %p8876_p6 = por %p126_p3, %p33_p0 }
   0xc   : > { %p132_p7 = scmp.eq.s32.totalorder %s6163_s20, 1  ;;  %p6164_p8 = scmp.ge.s32.totalorder %s8778_s18, 1 }
   0xd   : > { %p139_p9 = scmp.lt.s32.totalorder %s8778_s18, 3  ;;  %p7829_p11 = scmp.eq.s32.totalorder %s8854_s19, 0 }
   0xe   : > { %p8882_p10 = por %p132_p7, %p131_p4  ;;  %s150_s5 = sshll.u32 %s10276_s1, 4  ;;  %s151_s5 = int_to_ptr.hbm [resolvable:$true] %s150_s5 }
   0xf   : > { %p8887_p12 = pnand %p6164_p8, %p139_p9  ;;  %s8780_s6 = smov [#allocation3]  }
  0x10   : > { %s152_s7 = sshll.u32 %s8780_s6, 4  ;;  %s167_s10 = sshll.u32 %s10278_s3, 4  ;;  %s153_s7 = int_to_ptr.vmem [resolvable:$true] %s152_s7  ;;  %s168_s10 = int_to_ptr.hbm [resolvable:$true] %s167_s10 }
  0x11   : > { %p7818_p13 = pneg %p8887_p12  ;;  %s8781_s11 = smov 64  }
  0x12   : > { %s8782_s12 = smov 4   ;;  %s8783_s13 = smov [#allocation6]  }
  0x13   : > { %p7819_p0 = pnand %p7829_p11, %p7818_p13  ;;  %s169_s14 = sshll.u32 %s8783_s13, 4  ;;  %s170_s14 = int_to_ptr.vmem [resolvable:$true] %s169_s14 }
  0x14   : > { %s8784_s20 = smov 128   ;;  %s8785_s22 = smov 8  }
  0x15   : > { %7821 = dma.hbm_to_vmem [thread:$0]  (!%p7819_p0), %s151_s5, 26624, %s153_s7, [#allocation4], %s8781_s11, %s8781_s11, %s8782_s12  }
  0x16   : > { %7824 = dma.hbm_to_vmem [thread:$0]  (!%p7819_p0), %s168_s10, 2176, %s170_s14, [#allocation7], %s8784_s20, %s8784_s20, %s8785_s22  }
  0x17   : > { %p6167_p1 = scmp.ge.s32.totalorder %s8778_s18, 2 }
  0x19   : > { %179 = sbr.rel (%p6167_p1) target bundleno = 42 (0x2a), region = 28 }
  0x1e   : > { %182 = sbr.rel (!%p8872_p5) target bundleno = 42 (0x2a), region = 32  ;;  %s184_s23 = sand.u32 (%p8872_p5), 1, %s8774_s17  }
  0x1f   : > { %s6169_s29 = sshll.u32 (%p8872_p5), %s8778_s18, 3  ;;  %s6168_s30 = sshll.u32 (%p8872_p5), %s184_s23, 6 }
  0x20   : > { %s188_s7 = scalar_lea.vmem (%p8872_p5), %s10275_s0, %s6169_s29  ;;  %s186_s8 = scalar_lea.vmem (%p8872_p5), [#allocation2], %s6168_s30 }
  0x21   : > { %v231_v0 = vld [vmem:[%s188_s7] sm:$0xff] (%p8872_p5)  ;;  %v233_v1 = vld [vmem:[%s188_s7 + $0x10] sm:$0xff] (%p8872_p5) }
  0x22   : > { %v235_v2 = vld [vmem:[%s188_s7 + $0x20] sm:$0xff] (%p8872_p5)  ;;  %232 = vst [vmem:[%s186_s8] sm:$0xff] (%p8872_p5), %v231_v0  ;;  %v237_v3 = vld [vmem:[%s188_s7 + $0x30] sm:$0xff] (%p8872_p5) }
  0x23   : > { %234 = vst [vmem:[%s186_s8 + $0x8] sm:$0xff] %v233_v1  ;;  %v239_v4 = vld [vmem:[%s188_s7 + $0x40] sm:$0xff]  ;;  %v241_v5 = vld [vmem:[%s188_s7 + $0x50] sm:$0xff] }
  0x24   : > { %236 = vst [vmem:[%s186_s8 + $0x10] sm:$0xff] %v235_v2  ;;  %v243_v6 = vld [vmem:[%s188_s7 + $0x60] sm:$0xff]  ;;  %v245_v7 = vld [vmem:[%s188_s7 + $0x70] sm:$0xff] }
  0x25   : > { %238 = vst [vmem:[%s186_s8 + $0x18] sm:$0xff] %v237_v3 }
  0x26   : > { %240 = vst [vmem:[%s186_s8 + $0x20] sm:$0xff] %v239_v4 }
  0x27   : > { %242 = vst [vmem:[%s186_s8 + $0x28] sm:$0xff] %v241_v5 }
  0x28   : > { %244 = vst [vmem:[%s186_s8 + $0x30] sm:$0xff] %v243_v6 }
  0x29   : > { %246 = vst [vmem:[%s186_s8 + $0x38] sm:$0xff] %v245_v7 }
  0x2a PF: > { %255 = sbr.rel (%p8887_p12) target bundleno = 5493 (0x1575), region = 70  ;;  %s8914_s25 = sand.u32 (!%p8887_p12), 1, %s8770_s16  }
  0x2b   : > { %s6171_s9 = sshll.u32 (!%p8887_p12), %s8914_s25, 6 }
  0x2c   : > { %s260_s10 = scalar_lea.vmem (!%p8887_p12), [#allocation2], %s6171_s9 }
  0x2f   : > { %8753 = dma.done.wait (%p7829_p11), [#allocation4], 26624  }
  0x30   : > { %8755 = vsyncadd (%p7829_p11), [#allocation4], 4294940672 }
  0x31   : > { %8757 = dma.done.wait (%p7829_p11), [#allocation7], 2176  }
  0x32   : > { %8759 = vsyncadd (%p7829_p11), [#allocation7], 4294965120  ;;  %v315_v8 = vld [vmem:[%s260_s10 + $0x30] sm:$0xff]  ;;  %v316_v9 = vld [vmem:[%s260_s10 + $0x38] sm:$0xff]  ;;  %s8786_s28 = smov 127   ;;  %s8787_s11 = smov 1   ;;  %v293_v25 = vlaneseq }
  0x33   : > { %v313_v10 = vld [vmem:[%s260_s10 + $0x20] sm:$0xff]  ;;  %v7894_v11 = vpack.i.bf16 %v316_v9, %v315_v8  ;;  %v314_v12 = vld [vmem:[%s260_s10 + $0x28] sm:$0xff]  ;;  %v311_v14 = vld [vmem:[%s260_s10 + $0x10] sm:$0xff]  ;;  %v8933_v20 = vpack.c.bf16 %v316_v9, %v315_v8  ;;  %vm414_vm0 = vcmask 523264   ;;  %v8788_v29 = vmov 0   ;;  %s6076_s14 = scalar_lea.hbm %s10279_s4, %s8854_s19  ;;  %s291_s20 = scalar_lea.vmem [#allocation8], %s8914_s25 }
  0x34   : > { %v7904_v13 = vpack.i.bf16 %v314_v12, %v313_v10  ;;  %v312_v15 = vld [vmem:[%s260_s10 + $0x18] sm:$0xff]  ;;  %v309_v17 = vld [vmem:[%s260_s10] sm:$0xff]  ;;  %v310_v18 = vld [vmem:[%s260_s10 + $0x8] sm:$0xff]  ;;  %v8936_v21 = vpack.c.bf16 %v314_v12, %v313_v10  ;;  %v294_v26 = vand.u32 127, %v293_v25  ;;  %7936 = vset.pattern.permute.xlu1 %v8788_v29  ;;  %7935 = vset.pattern.permute.xlu0 %v8788_v29  ;;  %vm6042_vm5 = vcmask 31744   ;;  %s6078_s22 = sshll.u32 %s291_s20, 4  ;;  %s6079_s22 = int_to_ptr.vmem [resolvable:$true] %s6078_s22 }
  0x35   : > { %7895 = vrot.lane.b32.xlu0 %v7894_v11, %s8786_s28  ;;  %v7914_v16 = vpack.i.bf16 %v312_v15, %v311_v14  ;;  %v7924_v19 = vpack.i.bf16 %v310_v18, %v309_v17  ;;  %431 = vmatpush.bf16.msra.mxu0 %v8933_v20  ;;  %v8939_v22 = vpack.c.bf16 %v312_v15, %v311_v14  ;;  %v7604_v24 = vld [vmem:[#allocation3 + $0x20] sm:$0xff]  ;;  %v8954_v28 = vld [vmem:[%s10277_s2 + $0x38] sm:$0xff]  ;;  %v7605_v32 = vld [vmem:[#allocation3 + $0x28] sm:$0xff]  ;;  %s6080_s23 = sshll.u32 %s6076_s14, 4  ;;  %vm6065_vm6 = vcmask 24576   ;;  %s6068_s29 = scalar_lea.sflag [#allocation5], %s8914_s25  ;;  %s6081_s23 = int_to_ptr.hbm [resolvable:$true] %s6080_s23 }
  0x36   : > { %7905 = vrot.lane.b32.xlu1 %v7904_v13, %s8786_s28  ;;  %v8942_v23 = vpack.c.bf16 %v310_v18, %v309_v17  ;;  %v8949_v27 = vld [vmem:[%s10277_s2 + $0x20] sm:$0xff]  ;;  %vm308_vm1 = vcmp.ne.s32.totalorder %v294_v26, 127  ;;  %7934 = vset.pattern.permute.xlu2 %v8788_v29  ;;  %vm307_vm3 = vcmp.ne.s32.totalorder %v294_v26, 0  ;;  %v8968_v44 = vld [vmem:[%s10277_s2 + $0x10] sm:$0xff]  ;;  %v8990_v58 = vld [vmem:[%s10277_s2 + $0x8] sm:$0xff]  ;;  %s8722_s30 = sshra.s32 %s6081_s23, 4  ;;  %s8723_s30 = int_to_ptr.hbm [resolvable:$true] %s8722_s30 }
  0x37   : > { %7915 = vrot.lane.b32.xlu2 %v7914_v16, %s8786_s28  ;;  %vm8958_vm2 = vmpackc.low %vm308_vm1, %vm308_vm1  ;;  %v8973_v45 = vld [vmem:[%s10277_s2] sm:$0xff]  ;;  %v7606_v60 = vld [vmem:[#allocation3 + $0x30] sm:$0xff]  ;;  %s8724_s5 = scalar_lea.hbm %s8723_s30, 1  ;;  %p8729_p5 = scmp.lt.s32.totalorder %s8723_s30, %s10279_s4 }
  0x38   : > { %vm8978_vm4 = vmpackc.low %vm307_vm3, %vm307_vm3  ;;  %v7608_v4 = vld [vmem:[#allocation3 + $0x40] sm:$0xff]  ;;  %v7607_v7 = vld [vmem:[#allocation3 + $0x38] sm:$0xff]  ;;  %p8725_p2 = scmp.ne.s32.totalorder %s8723_s30, %s8724_s5 }
  0x39   : > { %432 = vmatpush.bf16.msra.mxu0 %v8936_v21  ;;  %v7600_v6 = vld [vmem:[#allocation3] sm:$0xff]  ;;  %v7609_v8 = vld [vmem:[#allocation3 + $0x48] sm:$0xff]  ;;  %v9013_v10 = vld [vmem:[%s10277_s2 + $0x30] sm:$0xff] }
  0x3a   : > { %v7601_v9 = vld [vmem:[#allocation3 + $0x8] sm:$0xff]  ;;  %v7610_v12 = vld [vmem:[#allocation3 + $0x50] sm:$0xff]  ;;  %v7611_v15 = vld [vmem:[#allocation3 + $0x58] sm:$0xff]  ;;  %p8726_p3 = pnand %p8725_p2, %p8876_p6 }
  0x3b   : > { %v7602_v14 = vld [vmem:[#allocation3 + $0x10] sm:$0xff] }
  0x3c   : > { %v7798_v38 = vld [vmem:[#allocation3 + $0x630] sm:$0xff]  ;;  %p8727_p4 = pneg %p8726_p3 }
  0x3d   : > { %7900 = vrot.lane.b32.xlu0 %v7894_v11, %s8787_s11  ;;  %433 = vmatpush.bf16.msra.mxu0 %v8939_v22  ;;  %v9020_v11 = vld [vmem:[%s10277_s2 + $0x28] sm:$0xff]  ;;  %v7806_v52 = vld [vmem:[#allocation3 + $0x670] sm:$0xff] }
  0x3e   : > { %7910 = vrot.lane.b32.xlu1 %v7904_v13, %s8787_s11  ;;  %v9026_v13 = vld [vmem:[%s10277_s2 + $0x18] sm:$0xff] }
  0x3f   : > { %7920 = vrot.lane.b32.xlu2 %v7914_v16, %s8787_s11  ;;  %v7603_v16 = vld [vmem:[#allocation3 + $0x18] sm:$0xff] }
  0x41   : > { %434 = vmatpush.bf16.msra.mxu0 %v8942_v23 }
  0x44   : > { %6190 = vmatmul.msk.bf16.vlgmr.msra.gmra.mxu0 %vm414_vm0, %v7604_v24 }
  0x45   : > { %7925 = vrot.lane.b32.xlu0 %v7924_v19, %s8786_s28 }
  0x46   : > { %7930 = vrot.lane.b32.xlu1 %v7924_v19, %s8787_s11 }
  0x47   : > { %639 = vperm.xlu2 %7934, %v9013_v10  }
  0x4d   : > { %644 = vperm.xlu0 %7935, %v8954_v28  }
  0x4e   : > { %629 = vperm.xlu1 %7936, %v8949_v27  }
  0x4f   : > { %634 = vperm.xlu2 %7934, %v9020_v11  }
  0x54   : > { %6191 = vmatmul.msk.bf16.gmra.mxu0 %vm414_vm0, %v7605_v32 }
  0x55   : > { %609 = vperm.xlu0 %7935, %v8973_v45  }
  0x56   : > { %619 = vperm.xlu1 %7936, %v8968_v44  }
  0x57   : > { %624 = vperm.xlu2 %7934, %v9026_v13  }
  0x5e   : > { %614 = vperm.xlu1 %7936, %v8990_v58  }
  0x64   : > { %6192 = vmatmul.msk.bf16.gmra.mxu0 %vm414_vm0, %v7606_v60 }
  0x74   : > { %6193 = vmatmul.msk.bf16.gmra.mxu0 %vm414_vm0, %v7607_v7 }
  0x91   : > { %v7916_v31 = vpop.permute.xlu2 %7915 }
  0x92   : > { %v7918_v40 = vunpack.i.h.bf16 %v7916_v31  ;;  %v7917_v41 = vunpack.i.l.bf16 %v7916_v31 }
  0x94   : > { %v6249_v49 = vpack.c.bf16 %v7918_v40, %v7917_v41 }
  0x99   : > { %v7921_v53 = vpop.permute.xlu2 %7920 }
  0x9a   : > { %v7923_v55 = vunpack.i.h.bf16 %v7921_v53  ;;  %v7922_v56 = vunpack.i.l.bf16 %v7921_v53 }
  0x9c   : > { %v6217_v0 = vpack.c.bf16 %v7923_v55, %v7922_v56 }
  0xa1   : > { %v640_v32 = vpop.permute.xlu2 %639 }
  0xa7   : > { %v7896_v30 = vpop.permute.xlu0 %7895 }
  0xa8   : > { %v7906_v33 = vpop.permute.xlu1 %7905  ;;  %v7898_v34 = vunpack.i.h.bf16 %v7896_v30  ;;  %v7897_v35 = vunpack.i.l.bf16 %v7896_v30 }
  0xa9   : > { %v7908_v36 = vunpack.i.h.bf16 %v7906_v33  ;;  %v7907_v37 = vunpack.i.l.bf16 %v7906_v33 }
  0xaa   : > { %v6243_v39 = vpack.c.bf16 %v7898_v34, %v7897_v35 }
  0xab   : > { %v6246_v42 = vpack.c.bf16 %v7908_v36, %v7907_v37 }
  0xac   : > { %6244 = vmatpush.bf16.msk.msra.mxu2 %vm8958_vm2, %v6243_v39  ;;  %v635_v39 = vpop.permute.xlu2 %634 }
  0xaf   : > { %v7901_v43 = vpop.permute.xlu0 %7900 }
  0xb0   : > { %6247 = vmatpush.bf16.msk.msra.mxu2 %vm8958_vm2, %v6246_v42  ;;  %v7911_v46 = vpop.permute.xlu1 %7910  ;;  %v7903_v47 = vunpack.i.h.bf16 %v7901_v43  ;;  %v7902_v48 = vunpack.i.l.bf16 %v7901_v43 }
  0xb1   : > { %v7913_v50 = vunpack.i.h.bf16 %v7911_v46  ;;  %v7912_v51 = vunpack.i.l.bf16 %v7911_v46 }
  0xb2   : > { %v6211_v54 = vpack.c.bf16 %v7903_v47, %v7902_v48 }
  0xb3   : > { %v6214_v57 = vpack.c.bf16 %v7913_v50, %v7912_v51 }
  0xb4   : > { %6212 = vmatpush.bf16.msk.msra.mxu1 %vm8978_vm4, %v6211_v54  ;;  %6250 = vmatpush.bf16.msk.msra.mxu2 %vm8958_vm2, %v6249_v49  ;;  %v625_v55 = vpop.permute.xlu2 %624 }
  0xb7   : > { %v7926_v59 = vpop.permute.xlu0 %7925 }
  0xb8   : > { %v7928_v61 = vunpack.i.h.bf16 %v7926_v59  ;;  %v7927_v62 = vunpack.i.l.bf16 %v7926_v59  ;;  %6215 = vmatpush.bf16.msk.msra.mxu1 %vm8978_vm4, %v6214_v57  ;;  %v7931_v63 = vpop.permute.xlu1 %7930 }
  0xb9   : > { %v7933_v1 = vunpack.i.h.bf16 %v7931_v63  ;;  %v7932_v2 = vunpack.i.l.bf16 %v7931_v63 }
  0xba   : > { %v6252_v3 = vpack.c.bf16 %v7928_v61, %v7927_v62 }
  0xbb   : > { %v6220_v5 = vpack.c.bf16 %v7933_v1, %v7932_v2 }
  0xbc   : > { %6218 = vmatpush.bf16.msk.msra.mxu1 %vm8978_vm4, %v6217_v0  ;;  %6253 = vmatpush.bf16.msk.msra.mxu2 %vm8958_vm2, %v6252_v3 }
  0xbf   : > { %6254 = vmatmul.msk.bf16.vlgmr.msra.gmra.mxu2 %vm414_vm0, %v7608_v4 }
  0xc0   : > { %1058 = vmatpush.bf16.msrb.mxu2 %v8933_v20  ;;  %6221 = vmatpush.bf16.msk.msra.mxu1 %vm8978_vm4, %v6220_v5  ;;  %v630_v42 = vpop.permute.xlu1 %629 }
  0xc1   : > { %v436_v17 = vpop.f32.mrf.mxu0 }
  0xc3   : > { %6222 = vmatmul.msk.bf16.vlgmr.msra.gmra.mxu1 %vm414_vm0, %v7600_v6 }
  0xc4   : > { %1059 = vmatpush.bf16.msrb.mxu2 %v8936_v21 }
  0xc8   : > { %1060 = vmatpush.bf16.msrb.mxu2 %v8939_v22  ;;  %v620_v0 = vpop.permute.xlu1 %619 }
  0xc9   : > { %v438_v18 = vpop.f32.mrf.mxu0 }
  0xcc   : > { %1061 = vmatpush.bf16.msrb.mxu2 %v8942_v23 }
  0xcf   : > { %6255 = vmatmul.msk.bf16.gmra.mxu2 %vm414_vm0, %v7609_v8 }
  0xd1   : > { %v441_v23 = vpop.f32.mrf.mxu0 }
  0xd3   : > { %6223 = vmatmul.msk.bf16.gmra.mxu1 %vm414_vm0, %v7601_v9 }
  0xd9   : > { %v443_v26 = vpop.f32.mrf.mxu0 }
  0xdf   : > { %6256 = vmatmul.msk.bf16.gmra.mxu2 %vm414_vm0, %v7610_v12 }
  0xe1   : > { %v446_v33 = vpop.f32.mrf.mxu0 }
  0xe3   : > { %6224 = vmatmul.msk.bf16.gmra.mxu1 %vm414_vm0, %v7602_v14 }
  0xe9   : > { %v448_v40 = vpop.f32.mrf.mxu0 }
  0xef   : > { %6257 = vmatmul.msk.bf16.gmra.mxu2 %vm414_vm0, %v7611_v15  ;;  %v645_v15 = vpop.permute.xlu0 %644 }
  0xf1   : > { %v451_v56 = vpop.f32.mrf.mxu0 }
  0xf3   : > { %6225 = vmatmul.msk.bf16.gmra.mxu1 %vm414_vm0, %v7603_v16 }
  0xf9   : > { %v453_v7 = vpop.f32.mrf.mxu0 }
 0x140   : > { %v497_v19 = vpop.f32.mrf.mxu1 }
 0x141   : > { %v498_v20 = vadd.f32 %v497_v19, %v436_v17 }
 0x142   : > { %v571_v21 = vpop.f32.mrf.mxu2 }
 0x143   : > { %v9033_v22 = vadd.f32 %v571_v21, %v498_v20 }
 0x148   : > { %v499_v24 = vpop.f32.mrf.mxu1 }
 0x149   : > { %v500_v20 = vadd.f32 %v499_v24, %v438_v18 }
 0x14a   : > { %v573_v25 = vpop.f32.mrf.mxu2 }
 0x150   : > { %v502_v29 = vpop.f32.mrf.mxu1 }
 0x151   : > { %v503_v49 = vadd.f32 %v502_v29, %v441_v23 }
 0x152   : > { %v576_v30 = vpop.f32.mrf.mxu2 }
 0x153   : > { %v593_v57 = vadd.f32 %v576_v30, %v503_v49  ;;  %v592_v30 = vadd.f32 %v573_v25, %v500_v20  ;;  %v7612_v20 = vld [vmem:[#allocation3 + $0x60] sm:$0xff] }
 0x155   : > { %v649_v2 = vadd.f32 %v620_v0, %v593_v57 }
 0x157   : > { %v657_v5 = vmax.f32 %v649_v2, 0.0 }
 0x158   : > { %v504_v31 = vpop.f32.mrf.mxu1 }
 0x159   : > { %v505_v46 = vadd.f32 %v504_v31, %v443_v26  ;;  %v615_v31 = vpop.permute.xlu1 %614 }
 0x15a   : > { %v578_v34 = vpop.f32.mrf.mxu2 }
 0x15b   : > { %v594_v53 = vadd.f32 %v578_v34, %v505_v46  ;;  %v648_v34 = vadd.f32 %v615_v31, %v592_v30  ;;  %v7619_v30 = vld [vmem:[#allocation3 + $0x98] sm:$0xff]  ;;  %v7613_v31 = vld [vmem:[#allocation3 + $0x68] sm:$0xff] }
 0x15d   : > { %v650_v62 = vadd.f32 %v625_v55, %v594_v53 }
 0x15f   : > { %v658_v4 = vmax.f32 %v650_v62, 0.0 }
 0x160   : > { %v507_v35 = vpop.f32.mrf.mxu1 }
 0x161   : > { %v508_v37 = vadd.f32 %v507_v35, %v446_v33  ;;  %v7962_v12 = vpack.i.bf16 %v658_v4, %v657_v5  ;;  %v610_v33 = vpop.permute.xlu0 %609 }
 0x162   : > { %v581_v36 = vpop.f32.mrf.mxu2 }
 0x163   : > { %v595_v41 = vadd.f32 %v581_v36, %v508_v37  ;;  %v656_v36 = vmax.f32 %v648_v34, 0.0  ;;  %v734_v37 = vpack.c.bf16 %v658_v4, %v657_v5  ;;  %v7614_v34 = vld [vmem:[#allocation3 + $0x70] sm:$0xff] }
 0x165   : > { %v651_v50 = vadd.f32 %v630_v42, %v595_v41  ;;  %v7616_v41 = vld [vmem:[#allocation3 + $0x80] sm:$0xff] }
 0x167   : > { %v659_v59 = vmax.f32 %v651_v50, 0.0 }
 0x168   : > { %v509_v43 = vpop.f32.mrf.mxu1 }
 0x169   : > { %v510_v47 = vadd.f32 %v509_v43, %v448_v40  ;;  %v8790_v40 = vmov 2  }
 0x16a   : > { %v583_v48 = vpop.f32.mrf.mxu2  ;;  %7979 = vset.pattern.permute.xlu0 %v8790_v40 }
 0x16b   : > { %v596_v51 = vadd.f32 %v583_v48, %v510_v47 }
 0x16d   : > { %v652_v54 = vadd.f32 %v635_v39, %v596_v51  ;;  %v8789_v39 = vmov 1   ;;  %v7625_v51 = vld [vmem:[#allocation3 + $0xc8] sm:$0xff] }
 0x16e   : > { %7977 = vset.pattern.permute.xlu1 %v8789_v39  ;;  %7978 = vset.pattern.permute.xlu2 %v8789_v39 }
 0x16f   : > { %v660_v60 = vmax.f32 %v652_v54, 0.0  ;;  %v7617_v54 = vld [vmem:[#allocation3 + $0x88] sm:$0xff] }
 0x170   : > { %v512_v61 = vpop.f32.mrf.mxu1 }
 0x171   : > { %v7937_v63 = vpack.i.bf16 %v660_v60, %v659_v59  ;;  %v513_v3 = vadd.f32 %v512_v61, %v451_v56  ;;  %v735_v35 = vpack.c.bf16 %v660_v60, %v659_v59  ;;  %v7626_v56 = vld [vmem:[#allocation3 + $0xd0] sm:$0xff] }
 0x172   : > { %v586_v1 = vpop.f32.mrf.mxu2 }
 0x173   : > { %7938 = vrot.lane.b32.xlu1 %v7937_v63, %s8787_s11  ;;  %v597_v6 = vadd.f32 %v586_v1, %v513_v3  ;;  %v7618_v1 = vld [vmem:[#allocation3 + $0x90] sm:$0xff] }
 0x175   : > { %v653_v16 = vadd.f32 %v640_v32, %v597_v6  ;;  %v647_v32 = vadd.f32 %v610_v33, %v9033_v22  ;;  %v7624_v22 = vld [vmem:[#allocation3 + $0xc0] sm:$0xff]  ;;  %v7621_v33 = vld [vmem:[#allocation3 + $0xa8] sm:$0xff] }
 0x176   : > { %6358 = vmatmul.msk.bf16.vlgmr.msrb.gmra.mxu2 %vm414_vm0, %v7624_v22 }
 0x177   : > { %v661_v21 = vmax.f32 %v653_v16, 0.0  ;;  %v655_v18 = vmax.f32 %v647_v32, 0.0  ;;  %v7615_v32 = vld [vmem:[#allocation3 + $0x78] sm:$0xff] }
 0x178   : > { %v514_v8 = vpop.f32.mrf.mxu1 }
 0x179   : > { %v515_v9 = vadd.f32 %v514_v8, %v453_v7  ;;  %v733_v24 = vpack.c.bf16 %v656_v36, %v655_v18  ;;  %v7972_v25 = vpack.i.bf16 %v656_v36, %v655_v18  ;;  %v7623_v36 = vld [vmem:[#allocation3 + $0xb8] sm:$0xff] }
 0x17a   : > { %v588_v14 = vpop.f32.mrf.mxu2 }
 0x17b   : > { %v598_v17 = vadd.f32 %v588_v14, %v515_v9  ;;  %7963 = vrot.lane.b32.xlu1 %v7962_v12, %s8786_s28 }
 0x17d   : > { %v654_v19 = vadd.f32 %v645_v15, %v598_v17  ;;  %v7627_v17 = vld [vmem:[#allocation3 + $0xd8] sm:$0xff] }
 0x17f   : > { %v662_v23 = vmax.f32 %v654_v19, 0.0 }
 0x181   : > { %v7952_v26 = vpack.i.bf16 %v662_v23, %v661_v21  ;;  %v736_v29 = vpack.c.bf16 %v662_v23, %v661_v21 }
 0x183   : > { %7953 = vrot.lane.b32.xlu0 %v7952_v26, %s8786_s28  ;;  %7943 = vrot.lane.b32.xlu2 %v7952_v26, %s8787_s11 }
 0x184   : > { %773 = vmatpush.bf16.msra.mxu3 %v736_v29  ;;  %966 = vperm.xlu1 %7977, %v9013_v10   ;;  %v7620_v29 = vld [vmem:[#allocation3 + $0xa0] sm:$0xff] }
 0x186   : > { %6359 = vmatmul.msk.bf16.gmra.mxu2 %vm414_vm0, %v7625_v51 }
 0x188   : > { %774 = vmatpush.bf16.msra.mxu3 %v735_v35  ;;  %v7622_v35 = vld [vmem:[#allocation3 + $0xb0] sm:$0xff] }
 0x18b   : > { %7958 = vrot.lane.b32.xlu0 %v7962_v12, %s8787_s11  ;;  %7948 = vrot.lane.b32.xlu2 %v7937_v63, %s8786_s28 }
 0x18c   : > { %775 = vmatpush.bf16.msra.mxu3 %v734_v37  ;;  %7980 = vset.pattern.permute.xlu1 %v8790_v40 }
 0x18d   : > { %1019 = vperm.xlu1 %7980, %v8954_v28  }
 0x190   : > { %776 = vmatpush.bf16.msra.mxu3 %v733_v24 }
 0x193   : > { %7973 = vrot.lane.b32.xlu0 %v7972_v25, %s8786_s28  ;;  %7968 = vrot.lane.b32.xlu2 %v7972_v25, %s8787_s11 }
 0x194   : > { %6274 = vmatmul.msk.bf16.vlgmr.msra.gmra.mxu3 %vm414_vm0, %v7616_v41 }
 0x195   : > { %7981 = vset.pattern.permute.xlu1 %v8789_v39 }
 0x196   : > { %962 = vperm.xlu1 %7981, %v9020_v11   ;;  %6360 = vmatmul.msk.bf16.gmra.mxu2 %vm414_vm0, %v7626_v56 }
 0x19b   : > { %970 = vperm.xlu2 %7978, %v8954_v28   ;;  %1015 = vperm.xlu0 %7979, %v9013_v10  }
 0x19e   : > { %950 = vperm.xlu1 %7981, %v8968_v44  }
 0x1a3   : > { %958 = vperm.xlu2 %7978, %v8949_v27   ;;  %1011 = vperm.xlu0 %7979, %v9020_v11  }
 0x1a4   : > { %6275 = vmatmul.msk.bf16.gmra.mxu3 %vm414_vm0, %v7617_v54 }
 0x1a6   : > { %7984 = vset.pattern.permute.xlu1 %v8790_v40  ;;  %6361 = vmatmul.msk.bf16.gmra.mxu2 %vm414_vm0, %v7627_v17 }
 0x1a7   : > { %1003 = vperm.xlu1 %7984, %v9026_v13  }
 0x1ab   : > { %7982 = vset.pattern.permute.xlu2 %v8790_v40  ;;  %999 = vperm.xlu0 %7979, %v8968_v44  }
 0x1ac   : > { %1007 = vperm.xlu2 %7982, %v8949_v27  }
 0x1af   : > { %991 = vperm.xlu1 %7984, %v8973_v45  }
 0x1b3   : > { %7985 = vset.pattern.permute.xlu0 %v8789_v39 }
 0x1b4   : > { %7983 = vset.pattern.permute.xlu2 %v8789_v39  ;;  %946 = vperm.xlu0 %7985, %v8990_v58  }
 0x1b5   : > { %954 = vperm.xlu2 %7983, %v9026_v13   ;;  %6276 = vmatmul.msk.bf16.gmra.mxu3 %vm414_vm0, %v7618_v1 }
 0x1bd   : > { %942 = vperm.xlu2 %7983, %v8973_v45  }
 0x1c5   : > { %7986 = vset.pattern.permute.xlu2 %v8790_v40  ;;  %6277 = vmatmul.msk.bf16.gmra.mxu3 %vm414_vm0, %v7619_v30 }
 0x1c6   : > { %995 = vperm.xlu2 %7986, %v8990_v58  }
 0x1dd   : > { %v7944_v42 = vpop.permute.xlu2 %7943 }
 0x1de   : > { %v7946_v43 = vunpack.i.h.bf16 %v7944_v42  ;;  %v7945_v46 = vunpack.i.l.bf16 %v7944_v42 }
 0x1e0   : > { %v6295_v47 = vpack.c.bf16 %v7946_v43, %v7945_v46 }
 0x1e2   : > { %6296 = vmatpush.bf16.msk.msrb.mxu0 %vm8978_vm4, %v6295_v47 }
 0x1e5   : > { %v7939_v48 = vpop.permute.xlu1 %7938  ;;  %v7949_v55 = vpop.permute.xlu2 %7948 }
 0x1e6   : > { %v7941_v49 = vunpack.i.h.bf16 %v7939_v48  ;;  %v7940_v50 = vunpack.i.l.bf16 %v7939_v48  ;;  %v7951_v61 = vunpack.i.h.bf16 %v7949_v55  ;;  %v7950_v62 = vunpack.i.l.bf16 %v7949_v55 }
 0x1e8   : > { %v6298_v53 = vpack.c.bf16 %v7941_v49, %v7940_v50  ;;  %v6330_v4 = vpack.c.bf16 %v7951_v61, %v7950_v62 }
 0x1ea   : > { %6299 = vmatpush.bf16.msk.msrb.mxu0 %vm8978_vm4, %v6298_v53 }
 0x1ed   : > { %v7964_v0 = vpop.permute.xlu1 %7963  ;;  %v7969_v5 = vpop.permute.xlu2 %7968 }
 0x1ee   : > { %v7966_v2 = vunpack.i.h.bf16 %v7964_v0  ;;  %v7965_v3 = vunpack.i.l.bf16 %v7964_v0  ;;  %v7971_v9 = vunpack.i.h.bf16 %v7969_v5  ;;  %v7970_v12 = vunpack.i.l.bf16 %v7969_v5 }
 0x1f0   : > { %v6333_v15 = vpack.c.bf16 %v7966_v2, %v7965_v3  ;;  %v6304_v16 = vpack.c.bf16 %v7971_v9, %v7970_v12 }
 0x1f5   : > { %v7954_v57 = vpop.permute.xlu0 %7953  ;;  %v9096_v24 = vpop.permute.xlu2 %970 }
 0x1f6   : > { %v7956_v59 = vunpack.i.h.bf16 %v7954_v57  ;;  %v7955_v60 = vunpack.i.l.bf16 %v7954_v57  ;;  %v9092_v37 = vpop.permute.xlu1 %966 }
 0x1f8   : > { %v6327_v63 = vpack.c.bf16 %v7956_v59, %v7955_v60 }
 0x1f9   : > { %v1063_v42 = vpop.f32.mrf.mxu2 }
 0x1fa   : > { %6328 = vmatpush.bf16.msk.msrb.mxu1 %vm8958_vm2, %v6327_v63 }
 0x1fd   : > { %v7959_v6 = vpop.permute.xlu0 %7958  ;;  %v959_v39 = vpop.permute.xlu2 %958 }
 0x1fe   : > { %v7961_v7 = vunpack.i.h.bf16 %v7959_v6  ;;  %v7960_v8 = vunpack.i.l.bf16 %v7959_v6  ;;  %6331 = vmatpush.bf16.msk.msrb.mxu1 %vm8958_vm2, %v6330_v4 }
 0x1ff   : > { %v9094_v18 = vpop.permute.xlu1 %1019 }
 0x200   : > { %v6301_v14 = vpack.c.bf16 %v7961_v7, %v7960_v8 }
 0x201   : > { %v9100_v48 = vpop.f32.mrf.mxu2 }
 0x202   : > { %6302 = vmatpush.bf16.msk.msrb.mxu0 %vm8978_vm4, %v6301_v14  ;;  %6334 = vmatpush.bf16.msk.msrb.mxu1 %vm8958_vm2, %v6333_v15 }
 0x205   : > { %v7974_v19 = vpop.permute.xlu0 %7973 }
 0x206   : > { %v7976_v21 = vunpack.i.h.bf16 %v7974_v19  ;;  %v7975_v23 = vunpack.i.l.bf16 %v7974_v19  ;;  %6305 = vmatpush.bf16.msk.msrb.mxu0 %vm8978_vm4, %v6304_v16  ;;  %v1008_v40 = vpop.permute.xlu2 %1007 }
 0x208   : > { %v6336_v26 = vpack.c.bf16 %v7976_v21, %v7975_v23  ;;  %v963_v25 = vpop.permute.xlu1 %962 }
 0x209   : > { %6306 = vmatmul.msk.bf16.vlgmr.msrb.gmra.mxu0 %vm414_vm0, %v7612_v20  ;;  %v1068_v62 = vpop.f32.mrf.mxu2 }
 0x20a   : > { %6337 = vmatpush.bf16.msk.msrb.mxu1 %vm8958_vm2, %v6336_v26 }
 0x20d   : > { %6338 = vmatmul.msk.bf16.vlgmr.msrb.gmra.mxu1 %vm414_vm0, %v7620_v29  ;;  %v1016_v8 = vpop.permute.xlu0 %1015 }
 0x20f   : > { %v955_v46 = vpop.permute.xlu2 %954 }
 0x210   : > { %v951_v22 = vpop.permute.xlu1 %950 }
 0x211   : > { %v1070_v2 = vpop.f32.mrf.mxu2 }
 0x215   : > { %v1012_v20 = vpop.permute.xlu0 %1011 }
 0x217   : > { %v778_v41 = vpop.f32.mrf.mxu3  ;;  %v943_v56 = vpop.permute.xlu2 %942 }
 0x219   : > { %6307 = vmatmul.msk.bf16.gmra.mxu0 %vm414_vm0, %v7613_v31  ;;  %v1004_v43 = vpop.permute.xlu1 %1003  ;;  %v1073_v7 = vpop.f32.mrf.mxu2 }
 0x21a   : > { %v1074_v23 = vadd.f32 %v1073_v7, %v1008_v40 }
 0x21d   : > { %6339 = vmatmul.msk.bf16.gmra.mxu1 %vm414_vm0, %v7621_v33 }
 0x21f   : > { %v9098_v47 = vpop.f32.mrf.mxu3 }
 0x221   : > { %v992_v51 = vpop.permute.xlu1 %991  ;;  %v1075_v16 = vpop.f32.mrf.mxu2 }
 0x222   : > { %v1064_v55 = vadd.f32 %v1063_v42, %v992_v51 }
 0x227   : > { %v783_v60 = vpop.f32.mrf.mxu3 }
 0x229   : > { %6308 = vmatmul.msk.bf16.gmra.mxu0 %vm414_vm0, %v7614_v34  ;;  %v1078_v51 = vpop.f32.mrf.mxu2 }
 0x22d   : > { %6340 = vmatmul.msk.bf16.gmra.mxu1 %vm414_vm0, %v7622_v35  ;;  %v1076_v35 = vadd.f32 %v1075_v16, %v1012_v20 }
 0x22f   : > { %v785_v1 = vpop.f32.mrf.mxu3 }
 0x238   : > { %v788_v5 = vpop.f32.mrf.mxu3 }
 0x239   : > { %6309 = vmatmul.msk.bf16.gmra.mxu0 %vm414_vm0, %v7615_v32 }
 0x23d   : > { %6341 = vmatmul.msk.bf16.gmra.mxu1 %vm414_vm0, %v7623_v36 }
 0x240   : > { %v790_v15 = vpop.f32.mrf.mxu3 }
 0x248   : > { %v793_v36 = vpop.f32.mrf.mxu3 }
 0x286   : > { %v839_v49 = vpop.f32.mrf.mxu0 }
 0x287   : > { %v840_v50 = vadd.f32 %v839_v49, %v778_v41 }
 0x28a   : > { %v913_v53 = vpop.f32.mrf.mxu1 }
 0x28b   : > { %v933_v54 = vadd.f32 %v913_v53, %v840_v50 }
 0x28d   : > { %v973_v57 = vadd.f32 %v943_v56, %v933_v54  ;;  %v1000_v54 = vpop.permute.xlu0 %999 }
 0x28e   : > { %v9102_v59 = vpop.f32.mrf.mxu0  ;;  %v1069_v56 = vadd.f32 %v1068_v62, %v1000_v54 }
 0x28f   : > { %v9104_v61 = vadd.f32 %v1064_v55, %v973_v57 }
 0x292   : > { %v9106_v63 = vpop.f32.mrf.mxu1 }
 0x296   : > { %v844_v0 = vpop.f32.mrf.mxu0 }
 0x297   : > { %v845_v29 = vadd.f32 %v844_v0, %v783_v60 }
 0x29a   : > { %v918_v3 = vpop.f32.mrf.mxu1 }
 0x29b   : > { %v935_v42 = vadd.f32 %v918_v3, %v845_v29  ;;  %v7632_v29 = vld [vmem:[#allocation3 + $0x100] sm:$0xff] }
 0x29d   : > { %v975_v57 = vadd.f32 %v951_v22, %v935_v42 }
 0x29e   : > { %v846_v4 = vpop.f32.mrf.mxu0 }
 0x29f   : > { %v847_v30 = vadd.f32 %v846_v4, %v785_v1  ;;  %v9117_v1 = vadd.f32 %v1069_v56, %v975_v57  ;;  %v795_v4 = vpop.f32.mrf.mxu3  ;;  %v7634_v56 = vld [vmem:[#allocation3 + $0x110] sm:$0xff] }
 0x2a2   : > { %v920_v6 = vpop.f32.mrf.mxu1 }
 0x2a3   : > { %v936_v34 = vadd.f32 %v920_v6, %v847_v30  ;;  %v1080_v6 = vpop.f32.mrf.mxu2 }
 0x2a4   : > { %v1081_v62 = vadd.f32 %v1080_v6, %v9094_v18  ;;  %v996_v18 = vpop.permute.xlu2 %995 }
 0x2a5   : > { %v976_v53 = vadd.f32 %v955_v46, %v936_v34 }
 0x2a6   : > { %v849_v9 = vpop.f32.mrf.mxu0 }
 0x2a7   : > { %v850_v14 = vadd.f32 %v849_v9, %v788_v5  ;;  %v1079_v9 = vadd.f32 %v1078_v51, %v1016_v8 }
 0x2aa   : > { %v923_v12 = vpop.f32.mrf.mxu1 }
 0x2ab   : > { %v937_v19 = vadd.f32 %v923_v12, %v850_v14 }
 0x2ad   : > { %v977_v31 = vadd.f32 %v959_v39, %v937_v19  ;;  %v1071_v39 = vadd.f32 %v1070_v2, %v1004_v43 }
 0x2ae   : > { %v851_v17 = vpop.f32.mrf.mxu0 }
 0x2af   : > { %v852_v21 = vadd.f32 %v851_v17, %v790_v15  ;;  %v9108_v49 = vadd.f32 %v1074_v23, %v977_v31  ;;  %v842_v15 = vadd.f32 %v9102_v59, %v9098_v47  ;;  %v947_v17 = vpop.permute.xlu0 %946  ;;  %v1066_v47 = vadd.f32 %v9100_v48, %v996_v18 }
 0x2b0   : > { %v8791_v31 = vmov 3  }
 0x2b1   : > { %v934_v8 = vadd.f32 %v9106_v63, %v842_v15  ;;  %8028 = vset.pattern.permute.xlu1 %v8791_v31  ;;  %8027 = vset.pattern.permute.xlu0 %v8791_v31  ;;  %v7637_v15 = vld [vmem:[#allocation3 + $0x128] sm:$0xff] }
 0x2b2   : > { %v925_v26 = vpop.f32.mrf.mxu1  ;;  %8029 = vset.pattern.permute.xlu2 %v8791_v31 }
 0x2b3   : > { %v938_v33 = vadd.f32 %v925_v26, %v852_v21 }
 0x2b5   : > { %v978_v32 = vadd.f32 %v963_v25, %v938_v33  ;;  %v9115_v25 = vadd.f32 %v1071_v39, %v976_v53  ;;  %v7633_v33 = vld [vmem:[#allocation3 + $0x108] sm:$0xff] }
 0x2b6   : > { %v854_v41 = vpop.f32.mrf.mxu0 }
 0x2b7   : > { %v9110_v50 = vadd.f32 %v1076_v35, %v978_v32  ;;  %v855_v60 = vadd.f32 %v854_v41, %v793_v36  ;;  %v8012_v46 = vpack.i.bf16 %v9115_v25, %v9117_v1  ;;  %v1162_v20 = vpack.c.bf16 %v9115_v25, %v9117_v1 }
 0x2b9   : > { %v7987_v40 = vpack.i.bf16 %v9110_v50, %v9108_v49  ;;  %v1163_v19 = vpack.c.bf16 %v9110_v50, %v9108_v49 }
 0x2ba   : > { %v928_v55 = vpop.f32.mrf.mxu1 }
 0x2bb   : > { %7988 = vrot.lane.b32.xlu0 %v7987_v40, %s8787_s11  ;;  %v939_v3 = vadd.f32 %v928_v55, %v855_v60 }
 0x2bd   : > { %v979_v43 = vadd.f32 %v9092_v37, %v939_v3 }
 0x2be   : > { %v856_v0 = vpop.f32.mrf.mxu0 }
 0x2bf   : > { %v857_v5 = vadd.f32 %v856_v0, %v795_v4  ;;  %v9125_v12 = vadd.f32 %v1079_v9, %v979_v43  ;;  %v7628_v43 = vld [vmem:[#allocation3 + $0xe0] sm:$0xff] }
 0x2c2   : > { %v930_v7 = vpop.f32.mrf.mxu1 }
 0x2c3   : > { %v940_v22 = vadd.f32 %v930_v7, %v857_v5  ;;  %8013 = vrot.lane.b32.xlu0 %v8012_v46, %s8786_s28 }
 0x2c5   : > { %v980_v2 = vadd.f32 %v9096_v24, %v940_v22  ;;  %v974_v24 = vadd.f32 %v947_v17, %v934_v8  ;;  %v7636_v22 = vld [vmem:[#allocation3 + $0x120] sm:$0xff]  ;;  %v7631_v8 = vld [vmem:[#allocation3 + $0xf8] sm:$0xff] }
 0x2c6   : > { %v7639_v17 = vld [vmem:[#allocation3 + $0x138] sm:$0xff] }
 0x2c7   : > { %v9127_v14 = vadd.f32 %v1081_v62, %v980_v2  ;;  %v9141_v59 = vadd.f32 %v1066_v47, %v974_v24  ;;  %v7635_v62 = vld [vmem:[#allocation3 + $0x118] sm:$0xff]  ;;  %v7629_v2 = vld [vmem:[#allocation3 + $0xe8] sm:$0xff] }
 0x2c9   : > { %v8002_v16 = vpack.i.bf16 %v9127_v14, %v9125_v12  ;;  %v1164_v37 = vpack.c.bf16 %v9127_v14, %v9125_v12  ;;  %v1161_v63 = vpack.c.bf16 %v9141_v59, %v9104_v61  ;;  %v8022_v21 = vpack.i.bf16 %v9141_v59, %v9104_v61 }
 0x2cb   : > { %8003 = vrot.lane.b32.xlu2 %v8002_v16, %s8786_s28  ;;  %7993 = vrot.lane.b32.xlu1 %v8002_v16, %s8787_s11  ;;  %v7630_v16 = vld [vmem:[#allocation3 + $0xf0] sm:$0xff] }
 0x2cc   : > { %1201 = vmatpush.bf16.msrb.mxu3 %v1164_v37  ;;  %1394 = vperm.xlu0 %8027, %v9013_v10   ;;  %v7638_v37 = vld [vmem:[#allocation3 + $0x130] sm:$0xff] }
 0x2d0   : > { %1202 = vmatpush.bf16.msrb.mxu3 %v1163_v19 }
 0x2d3   : > { %8008 = vrot.lane.b32.xlu2 %v8012_v46, %s8787_s11  ;;  %7998 = vrot.lane.b32.xlu1 %v7987_v40, %s8786_s28 }
 0x2d4   : > { %1203 = vmatpush.bf16.msrb.mxu3 %v1162_v20  ;;  %1382 = vperm.xlu0 %8027, %v9026_v13  }
 0x2d8   : > { %1204 = vmatpush.bf16.msrb.mxu3 %v1161_v63 }
 0x2db   : > { %8023 = vrot.lane.b32.xlu2 %v8022_v21, %s8786_s28  ;;  %8018 = vrot.lane.b32.xlu1 %v8022_v21, %s8787_s11 }
 0x2dc   : > { %6378 = vmatmul.msk.bf16.vlgmr.msrb.gmra.mxu3 %vm414_vm0, %v7632_v29 }
 0x2e3   : > { %1398 = vperm.xlu1 %8028, %v8954_v28   ;;  %1386 = vperm.xlu2 %8029, %v8949_v27  }
 0x2eb   : > { %1390 = vperm.xlu1 %8028, %v9020_v11   ;;  %1378 = vperm.xlu2 %8029, %v8968_v44  }
 0x2ec   : > { %6379 = vmatmul.msk.bf16.gmra.mxu3 %vm414_vm0, %v7633_v33 }
 0x2f3   : > { %1370 = vperm.xlu1 %8028, %v8973_v45   ;;  %1374 = vperm.xlu2 %8029, %v8990_v58  }
 0x2fc   : > { %6380 = vmatmul.msk.bf16.gmra.mxu3 %vm414_vm0, %v7634_v56 }
 0x30c   : > { %6381 = vmatmul.msk.bf16.gmra.mxu3 %vm414_vm0, %v7635_v62 }
 0x325   : > { %v8004_v48 = vpop.permute.xlu2 %8003 }
 0x326   : > { %v8006_v23 = vunpack.i.h.bf16 %v8004_v48  ;;  %v8005_v26 = vunpack.i.l.bf16 %v8004_v48 }
 0x328   : > { %v6431_v30 = vpack.c.bf16 %v8006_v23, %v8005_v26 }
 0x32a   : > { %6432 = vmatpush.bf16.msk.msra.mxu1 %vm8958_vm2, %v6431_v30 }
 0x32d   : > { %v7989_v34 = vpop.permute.xlu0 %7988  ;;  %v8009_v41 = vpop.permute.xlu2 %8008 }
 0x32e   : > { %v7991_v28 = vunpack.i.h.bf16 %v7989_v34  ;;  %v7990_v42 = vunpack.i.l.bf16 %v7989_v34  ;;  %v8011_v53 = vunpack.i.h.bf16 %v8009_v41  ;;  %v8010_v40 = vunpack.i.l.bf16 %v8009_v41 }
 0x330   : > { %v6402_v27 = vpack.c.bf16 %v7991_v28, %v7990_v42  ;;  %v6405_v39 = vpack.c.bf16 %v8011_v53, %v8010_v40 }
 0x335   : > { %v8014_v54 = vpop.permute.xlu0 %8013  ;;  %v8024_v3 = vpop.permute.xlu2 %8023 }
 0x336   : > { %v8016_v57 = vunpack.i.h.bf16 %v8014_v54  ;;  %v8015_v60 = vunpack.i.l.bf16 %v8014_v54  ;;  %v8026_v58 = vunpack.i.h.bf16 %v8024_v3  ;;  %v8025_v4 = vunpack.i.l.bf16 %v8024_v3 }
 0x338   : > { %v6437_v45 = vpack.c.bf16 %v8016_v57, %v8015_v60  ;;  %v6440_v7 = vpack.c.bf16 %v8026_v58, %v8025_v4 }
 0x33d   : > { %v7994_v35 = vpop.permute.xlu1 %7993  ;;  %v1387_v48 = vpop.permute.xlu2 %1386 }
 0x33e   : > { %v7996_v32 = vunpack.i.h.bf16 %v7994_v35  ;;  %v7995_v36 = vunpack.i.l.bf16 %v7994_v35  ;;  %v1395_v26 = vpop.permute.xlu0 %1394 }
 0x340   : > { %v6399_v51 = vpack.c.bf16 %v7996_v32, %v7995_v36 }
 0x342   : > { %6400 = vmatpush.bf16.msk.msra.mxu0 %vm8978_vm4, %v6399_v51 }
 0x345   : > { %v7999_v55 = vpop.permute.xlu1 %7998  ;;  %v1379_v32 = vpop.permute.xlu2 %1378 }
 0x346   : > { %v8001_v44 = vunpack.i.h.bf16 %v7999_v55  ;;  %v8000_v13 = vunpack.i.l.bf16 %v7999_v55  ;;  %6403 = vmatpush.bf16.msk.msra.mxu0 %vm8978_vm4, %v6402_v27  ;;  %v1383_v28 = vpop.permute.xlu0 %1382 }
 0x348   : > { %v6434_v0 = vpack.c.bf16 %v8001_v44, %v8000_v13 }
 0x34a   : > { %6406 = vmatpush.bf16.msk.msra.mxu0 %vm8978_vm4, %v6405_v39  ;;  %6435 = vmatpush.bf16.msk.msra.mxu1 %vm8958_vm2, %v6434_v0 }
 0x34d   : > { %v8019_v5 = vpop.permute.xlu1 %8018 }
 0x34e   : > { %v8021_v46 = vunpack.i.h.bf16 %v8019_v5  ;;  %v8020_v6 = vunpack.i.l.bf16 %v8019_v5  ;;  %6438 = vmatpush.bf16.msk.msra.mxu1 %vm8958_vm2, %v6437_v45 }
 0x350   : > { %v6408_v9 = vpack.c.bf16 %v8021_v46, %v8020_v6 }
 0x352   : > { %6409 = vmatpush.bf16.msk.msra.mxu0 %vm8978_vm4, %v6408_v9  ;;  %6441 = vmatpush.bf16.msk.msra.mxu1 %vm8958_vm2, %v6440_v7  ;;  %v1375_v9 = vpop.permute.xlu2 %1374 }
 0x355   : > { %6410 = vmatmul.msk.bf16.vlgmr.msra.gmra.mxu0 %vm414_vm0, %v7628_v43  ;;  %6442 = vmatmul.msk.bf16.vlgmr.msra.gmra.mxu1 %vm414_vm0, %v7636_v22  ;;  %v1399_v42 = vpop.permute.xlu1 %1398 }
 0x35d   : > { %v1391_v57 = vpop.permute.xlu1 %1390 }
 0x35f   : > { %v1206_v18 = vpop.f32.mrf.mxu3 }
 0x365   : > { %6411 = vmatmul.msk.bf16.gmra.mxu0 %vm414_vm0, %v7629_v2  ;;  %6443 = vmatmul.msk.bf16.gmra.mxu1 %vm414_vm0, %v7637_v15  ;;  %v1371_v62 = vpop.permute.xlu1 %1370 }
 0x367   : > { %v1208_v24 = vpop.f32.mrf.mxu3 }
 0x36f   : > { %v1211_v20 = vpop.f32.mrf.mxu3 }
 0x375   : > { %6412 = vmatmul.msk.bf16.gmra.mxu0 %vm414_vm0, %v7630_v16  ;;  %6444 = vmatmul.msk.bf16.gmra.mxu1 %vm414_vm0, %v7638_v37 }
 0x377   : > { %v1213_v23 = vpop.f32.mrf.mxu3 }
 0x37f   : > { %v1216_v41 = vpop.f32.mrf.mxu3 }
 0x385   : > { %6413 = vmatmul.msk.bf16.gmra.mxu0 %vm414_vm0, %v7631_v8  ;;  %6445 = vmatmul.msk.bf16.gmra.mxu1 %vm414_vm0, %v7639_v17 }
 0x387   : > { %v1218_v39 = vpop.f32.mrf.mxu3 }
 0x38f   : > { %v1221_v43 = vpop.f32.mrf.mxu3 }
 0x3d2   : > { %v1267_v19 = vpop.f32.mrf.mxu0  ;;  %v1341_v47 = vpop.f32.mrf.mxu1 }
 0x3d3   : > { %v1268_v4 = vadd.f32 %v1267_v19, %v1206_v18 }
 0x3d5   : > { %v1361_v22 = vadd.f32 %v1341_v47, %v1268_v4 }
 0x3da   : > { %v1269_v63 = vpop.f32.mrf.mxu0  ;;  %v1343_v21 = vpop.f32.mrf.mxu1 }
 0x3db   : > { %v1270_v45 = vadd.f32 %v1269_v63, %v1208_v24  ;;  %v1223_v63 = vpop.f32.mrf.mxu3 }
 0x3dd   : > { %v1362_v6 = vadd.f32 %v1343_v21, %v1270_v45 }
 0x3df   : > { %v1402_v8 = vadd.f32 %v1375_v9, %v1362_v6 }
 0x3e1   : > { %v1410_v18 = vmax.f32 %v1402_v8, 0.0  ;;  %v9237_v8 = vld [vmem:[%s10277_s2 + $0x8] sm:$0xff] }
 0x3e2   : > { %v1272_v29 = vpop.f32.mrf.mxu0  ;;  %v1346_v30 = vpop.f32.mrf.mxu1 }
 0x3e3   : > { %v1273_v31 = vadd.f32 %v1272_v29, %v1211_v20  ;;  %v1401_v20 = vadd.f32 %v1371_v62, %v1361_v22  ;;  %v7646_v22 = vld [vmem:[#allocation3 + $0x170] sm:$0xff] }
 0x3e5   : > { %v1363_v33 = vadd.f32 %v1346_v30, %v1273_v31  ;;  %v1409_v24 = vmax.f32 %v1401_v20, 0.0 }
 0x3e7   : > { %v1403_v51 = vadd.f32 %v1379_v32, %v1363_v33  ;;  %v8040_v47 = vpack.i.bf16 %v1410_v18, %v1409_v24 }
 0x3e9   : > { %v1411_v40 = vmax.f32 %v1403_v51, 0.0  ;;  %v7645_v51 = vld [vmem:[#allocation3 + $0x168] sm:$0xff] }
 0x3ea   : > { %v1274_v34 = vpop.f32.mrf.mxu0  ;;  %v1348_v35 = vpop.f32.mrf.mxu1 }
 0x3eb   : > { %v1275_v36 = vadd.f32 %v1274_v34, %v1213_v23 }
 0x3ed   : > { %v1364_v27 = vadd.f32 %v1348_v35, %v1275_v36 }
 0x3ef   : > { %v1404_v53 = vadd.f32 %v1383_v28, %v1364_v27 }
 0x3f1   : > { %v1412_v54 = vmax.f32 %v1404_v53, 0.0  ;;  %v8792_v53 = vmov 4  }
 0x3f2   : > { %v1277_v55 = vpop.f32.mrf.mxu0  ;;  %v1351_v56 = vpop.f32.mrf.mxu1  ;;  %8071 = vset.pattern.permute.xlu0 %v8792_v53  ;;  %8072 = vset.pattern.permute.xlu1 %v8792_v53 }
 0x3f3   : > { %v8030_v44 = vpack.i.bf16 %v1412_v54, %v1411_v40  ;;  %v1278_v13 = vadd.f32 %v1277_v55, %v1216_v41  ;;  %v1488_v28 = vpack.c.bf16 %v1412_v54, %v1411_v40  ;;  %v9202_v40 = vld [vmem:[%s10277_s2 + $0x38] sm:$0xff]  ;;  %v9208_v55 = vld [vmem:[%s10277_s2 + $0x20] sm:$0xff]  ;;  %8070 = vset.pattern.permute.xlu2 %v8792_v53 }
 0x3f5   : > { %8031 = vrot.lane.b32.xlu2 %v8030_v44, %s8787_s11  ;;  %v1365_v60 = vadd.f32 %v1351_v56, %v1278_v13 }
 0x3f7   : > { %v1405_v5 = vadd.f32 %v1387_v48, %v1365_v60 }
 0x3f9   : > { %v1413_v2 = vmax.f32 %v1405_v5, 0.0  ;;  %v9223_v5 = vld [vmem:[%s10277_s2 + $0x10] sm:$0xff] }
 0x3fa   : > { %v1279_v0 = vpop.f32.mrf.mxu0  ;;  %v1353_v3 = vpop.f32.mrf.mxu1 }
 0x3fb   : > { %v1280_v58 = vadd.f32 %v1279_v0, %v1218_v39 }
 0x3fd   : > { %v1366_v46 = vadd.f32 %v1353_v3, %v1280_v58  ;;  %v9217_v58 = vld [vmem:[%s10277_s2] sm:$0xff] }
 0x3ff   : > { %v1406_v7 = vadd.f32 %v1391_v57, %v1366_v46 }
 0x401   : > { %v1414_v15 = vmax.f32 %v1406_v7, 0.0 }
 0x402   : > { %v1282_v16 = vpop.f32.mrf.mxu0  ;;  %v1356_v37 = vpop.f32.mrf.mxu1 }
 0x403   : > { %v8045_v17 = vpack.i.bf16 %v1414_v15, %v1413_v2  ;;  %v1283_v23 = vadd.f32 %v1282_v16, %v1221_v43  ;;  %v1489_v41 = vpack.c.bf16 %v1414_v15, %v1413_v2 }
 0x405   : > { %8046 = vrot.lane.b32.xlu2 %v8045_v17, %s8786_s28  ;;  %8036 = vrot.lane.b32.xlu1 %v8045_v17, %s8787_s11  ;;  %v1367_v19 = vadd.f32 %v1356_v37, %v1283_v23  ;;  %v7640_v23 = vld [vmem:[#allocation3 + $0x140] sm:$0xff] }
 0x407   : > { %v1407_v30 = vadd.f32 %v1395_v26, %v1367_v19  ;;  %v1487_v26 = vpack.c.bf16 %v1410_v18, %v1409_v24  ;;  %v9243_v18 = vld [vmem:[%s10277_s2 + $0x18] sm:$0xff] }
 0x409   : > { %v1415_v34 = vmax.f32 %v1407_v30, 0.0  ;;  %v7647_v30 = vld [vmem:[#allocation3 + $0x178] sm:$0xff] }
 0x40a   : > { %v1284_v21 = vpop.f32.mrf.mxu0  ;;  %v1358_v29 = vpop.f32.mrf.mxu1 }
 0x40b   : > { %v1285_v48 = vadd.f32 %v1284_v21, %v1223_v63 }
 0x40d   : > { %v1368_v31 = vadd.f32 %v1358_v29, %v1285_v48  ;;  %8041 = vrot.lane.b32.xlu1 %v8040_v47, %s8787_s11  ;;  %1720 = vperm.xlu2 %8070, %v9013_v10   ;;  %v7648_v29 = vld [vmem:[#allocation3 + $0x180] sm:$0xff] }
 0x40f   : > { %v1408_v33 = vadd.f32 %v1399_v42, %v1368_v31  ;;  %v7644_v42 = vld [vmem:[#allocation3 + $0x160] sm:$0xff]  ;;  %v7641_v31 = vld [vmem:[#allocation3 + $0x148] sm:$0xff] }
 0x411   : > { %v1416_v35 = vmax.f32 %v1408_v33, 0.0  ;;  %v7649_v33 = vld [vmem:[#allocation3 + $0x188] sm:$0xff] }
 0x413   : > { %v8050_v32 = vpack.i.bf16 %v1416_v35, %v1415_v34  ;;  %v1490_v36 = vpack.c.bf16 %v1416_v35, %v1415_v34  ;;  %v7642_v34 = vld [vmem:[#allocation3 + $0x150] sm:$0xff] }
 0x414   : > { %v7650_v35 = vld [vmem:[#allocation3 + $0x190] sm:$0xff] }
 0x415   : > { %8066 = vrot.lane.b32.xlu1 %v8040_v47, %s8786_s28  ;;  %8051 = vrot.lane.b32.xlu0 %v8050_v32, %s8787_s11 }
 0x416   : > { %1527 = vmatpush.bf16.msra.mxu2 %v1490_v36  ;;  %1716 = vperm.xlu2 %8070, %v9020_v11   ;;  %v7651_v36 = vld [vmem:[#allocation3 + $0x198] sm:$0xff] }
 0x41a   : > { %1528 = vmatpush.bf16.msra.mxu2 %v1489_v41 }
 0x41d   : > { %8056 = vrot.lane.b32.xlu0 %v8050_v32, %s8786_s28  ;;  %1712 = vperm.xlu1 %8072, %v9208_v55   ;;  %v7643_v32 = vld [vmem:[#allocation3 + $0x158] sm:$0xff] }
 0x41e   : > { %1529 = vmatpush.bf16.msra.mxu2 %v1488_v28  ;;  %1708 = vperm.xlu2 %8070, %v9243_v18  }
 0x422   : > { %1530 = vmatpush.bf16.msra.mxu2 %v1487_v26 }
 0x425   : > { %8061 = vrot.lane.b32.xlu0 %v8030_v44, %s8786_s28  ;;  %6462 = vmatmul.msk.bf16.vlgmr.msra.gmra.mxu2 %vm414_vm0, %v7644_v42 }
 0x426   : > { %1704 = vperm.xlu1 %8072, %v9223_v5  }
 0x42d   : > { %1724 = vperm.xlu0 %8071, %v9202_v40  }
 0x42e   : > { %1700 = vperm.xlu1 %8072, %v9237_v8  }
 0x435   : > { %6463 = vmatmul.msk.bf16.gmra.mxu2 %vm414_vm0, %v7645_v51  ;;  %1696 = vperm.xlu0 %8071, %v9217_v58  }
 0x445   : > { %6464 = vmatmul.msk.bf16.gmra.mxu2 %vm414_vm0, %v7646_v22 }
 0x44f   : > { %v8032_v54 = vpop.permute.xlu2 %8031 }
 0x450   : > { %v8034_v0 = vunpack.i.h.bf16 %v8032_v54  ;;  %v8033_v3 = vunpack.i.l.bf16 %v8032_v54 }
 0x452   : > { %v6489_v9 = vpack.c.bf16 %v8034_v0, %v8033_v3 }
 0x455   : > { %6465 = vmatmul.msk.bf16.gmra.mxu2 %vm414_vm0, %v7647_v30 }
 0x45f   : > { %v8047_v4 = vpop.permute.xlu2 %8046 }
 0x460   : > { %v8049_v43 = vunpack.i.h.bf16 %v8047_v4  ;;  %v8048_v62 = vunpack.i.l.bf16 %v8047_v4 }
 0x462   : > { %v6518_v11 = vpack.c.bf16 %v8049_v43, %v8048_v62 }
 0x477   : > { %v8037_v27 = vpop.permute.xlu1 %8036 }
 0x478   : > { %v8039_v39 = vunpack.i.h.bf16 %v8037_v27  ;;  %v8038_v57 = vunpack.i.l.bf16 %v8037_v27 }
 0x47a   : > { %v6486_v10 = vpack.c.bf16 %v8039_v39, %v8038_v57 }
 0x47f   : > { %v8042_v45 = vpop.permute.xlu1 %8041 }
 0x480   : > { %v8044_v2 = vunpack.i.h.bf16 %v8042_v45  ;;  %v8043_v15 = vunpack.i.l.bf16 %v8042_v45 }
 0x482   : > { %v6492_v37 = vpack.c.bf16 %v8044_v2, %v8043_v15 }
 0x487   : > { %v8052_v56 = vpop.permute.xlu0 %8051  ;;  %v8067_v17 = vpop.permute.xlu1 %8066 }
 0x488   : > { %v8054_v44 = vunpack.i.h.bf16 %v8052_v56  ;;  %v8053_v13 = vunpack.i.l.bf16 %v8052_v56  ;;  %v8069_v63 = vunpack.i.h.bf16 %v8067_v17  ;;  %v8068_v21 = vunpack.i.l.bf16 %v8067_v17 }
 0x48a   : > { %v6483_v60 = vpack.c.bf16 %v8054_v44, %v8053_v13  ;;  %v6524_v47 = vpack.c.bf16 %v8069_v63, %v8068_v21 }
 0x48c   : > { %6484 = vmatpush.bf16.msk.msra.mxu3 %vm8978_vm4, %v6483_v60  ;;  %v1721_v60 = vpop.permute.xlu2 %1720 }
 0x48f   : > { %v8057_v46 = vpop.permute.xlu0 %8056 }
 0x490   : > { %v8059_v6 = vunpack.i.h.bf16 %v8057_v46  ;;  %v8058_v7 = vunpack.i.l.bf16 %v8057_v46  ;;  %6487 = vmatpush.bf16.msk.msra.mxu3 %vm8978_vm4, %v6486_v10 }
 0x492   : > { %v6515_v16 = vpack.c.bf16 %v8059_v6, %v8058_v7 }
 0x494   : > { %6490 = vmatpush.bf16.msk.msra.mxu3 %vm8978_vm4, %v6489_v9  ;;  %6516 = vmatpush.bf16.msk.msrb.mxu0 %vm8958_vm2, %v6515_v16  ;;  %v1717_v46 = vpop.permute.xlu2 %1716  ;;  %v1713_v9 = vpop.permute.xlu1 %1712 }
 0x497   : > { %v8062_v20 = vpop.permute.xlu0 %8061 }
 0x498   : > { %v8064_v24 = vunpack.i.h.bf16 %v8062_v20  ;;  %v8063_v19 = vunpack.i.l.bf16 %v8062_v20  ;;  %6493 = vmatpush.bf16.msk.msra.mxu3 %vm8978_vm4, %v6492_v37  ;;  %6519 = vmatpush.bf16.msk.msrb.mxu0 %vm8958_vm2, %v6518_v11 }
 0x49a   : > { %v6521_v48 = vpack.c.bf16 %v8064_v24, %v8063_v19 }
 0x49b   : > { %6494 = vmatmul.msk.bf16.vlgmr.msra.gmra.mxu3 %vm414_vm0, %v7640_v23 }
 0x49c   : > { %6522 = vmatpush.bf16.msk.msrb.mxu0 %vm8958_vm2, %v6521_v48  ;;  %v1709_v20 = vpop.permute.xlu2 %1708 }
 0x4a0   : > { %6525 = vmatpush.bf16.msk.msrb.mxu0 %vm8958_vm2, %v6524_v47 }
 0x4a3   : > { %6526 = vmatmul.msk.bf16.vlgmr.msrb.gmra.mxu0 %vm414_vm0, %v7648_v29  ;;  %v1705_v29 = vpop.permute.xlu1 %1704 }
 0x4a8   : > { %v1532_v41 = vpop.f32.mrf.mxu2 }
 0x4ab   : > { %6495 = vmatmul.msk.bf16.gmra.mxu3 %vm414_vm0, %v7641_v31 }
 0x4b0   : > { %v1534_v28 = vpop.f32.mrf.mxu2 }
 0x4b3   : > { %6527 = vmatmul.msk.bf16.gmra.mxu0 %vm414_vm0, %v7649_v33 }
 0x4b8   : > { %v1537_v53 = vpop.f32.mrf.mxu2 }
 0x4bb   : > { %6496 = vmatmul.msk.bf16.gmra.mxu3 %vm414_vm0, %v7642_v34 }
 0x4c0   : > { %v1539_v44 = vpop.f32.mrf.mxu2 }
 0x4c3   : > { %6528 = vmatmul.msk.bf16.gmra.mxu0 %vm414_vm0, %v7650_v35 }
 0x4c8   : > { %v1542_v0 = vpop.f32.mrf.mxu2 }
 0x4cb   : > { %6497 = vmatmul.msk.bf16.gmra.mxu3 %vm414_vm0, %v7643_v32 }
 0x4d0   : > { %v1544_v6 = vpop.f32.mrf.mxu2 }
 0x4d3   : > { %6529 = vmatmul.msk.bf16.gmra.mxu0 %vm414_vm0, %v7651_v36 }
 0x4d8   : > { %v1547_v23 = vpop.f32.mrf.mxu2 }
 0x4e0   : > { %v1549_v36 = vpop.f32.mrf.mxu2 }
 0x51e   : > { %v1593_v26 = vpop.f32.mrf.mxu3 }
 0x51f   : > { %v1594_v42 = vadd.f32 %v1593_v26, %v1532_v41 }
 0x520   : > { %v1667_v51 = vpop.f32.mrf.mxu0 }
 0x521   : > { %v9263_v27 = vadd.f32 %v1667_v51, %v1594_v42 }
 0x526   : > { %v1595_v54 = vpop.f32.mrf.mxu3 }
 0x528   : > { %v1669_v56 = vpop.f32.mrf.mxu0 }
 0x52e   : > { %v1598_v13 = vpop.f32.mrf.mxu3 }
 0x52f   : > { %v1599_v15 = vadd.f32 %v1598_v13, %v1537_v53  ;;  %v1596_v13 = vadd.f32 %v1595_v54, %v1534_v28 }
 0x530   : > { %v1672_v39 = vpop.f32.mrf.mxu0 }
 0x531   : > { %v1689_v24 = vadd.f32 %v1672_v39, %v1599_v15 }
 0x533   : > { %v1729_v31 = vadd.f32 %v1705_v29, %v1689_v24 }
 0x535   : > { %v1737_v35 = vadd.f32 %v1729_v31, %v9117_v1  ;;  %v1688_v1 = vadd.f32 %v1669_v56, %v1596_v13  ;;  %v7653_v13 = vld [vmem:[#allocation3 + $0x1a8] sm:$0xff] }
 0x536   : > { %v1600_v57 = vpop.f32.mrf.mxu3 }
 0x537   : > { %v1601_v22 = vadd.f32 %v1600_v57, %v1539_v44 }
 0x538   : > { %v1674_v3 = vpop.f32.mrf.mxu0 }
 0x539   : > { %v1690_v37 = vadd.f32 %v1674_v3, %v1601_v22  ;;  %v1701_v3 = vpop.permute.xlu1 %1700  ;;  %v7656_v22 = vld [vmem:[#allocation3 + $0x1c0] sm:$0xff] }
 0x53b   : > { %v1730_v48 = vadd.f32 %v1709_v20, %v1690_v37 }
 0x53d   : > { %v1738_v34 = vadd.f32 %v1730_v48, %v9115_v25 }
 0x53e   : > { %v1603_v45 = vpop.f32.mrf.mxu3 }
 0x53f   : > { %v1604_v10 = vadd.f32 %v1603_v45, %v1542_v0  ;;  %v1728_v45 = vadd.f32 %v1701_v3, %v1688_v1  ;;  %v7655_v1 = vld [vmem:[#allocation3 + $0x1b8] sm:$0xff] }
 0x540   : > { %v1677_v4 = vpop.f32.mrf.mxu0  ;;  %v7663_v3 = vld [vmem:[#allocation3 + $0x1f8] sm:$0xff] }
 0x541   : > { %v1691_v7 = vadd.f32 %v1677_v4, %v1604_v10 }
 0x543   : > { %v1731_v16 = vadd.f32 %v1713_v9, %v1691_v7 }
 0x545   : > { %v1739_v19 = vadd.f32 %v1731_v16, %v9108_v49  ;;  %v8098_v49 = vpack.i.bf16 %v1738_v34, %v1737_v35 }
 0x546   : > { %v1605_v43 = vpop.f32.mrf.mxu3 }
 0x547   : > { %v1606_v62 = vadd.f32 %v1605_v43, %v1544_v6 }
 0x548   : > { %v1679_v2 = vpop.f32.mrf.mxu0 }
 0x549   : > { %v1692_v11 = vadd.f32 %v1679_v2, %v1606_v62 }
 0x54b   : > { %v1732_v17 = vadd.f32 %v1717_v46, %v1692_v11  ;;  %v7657_v11 = vld [vmem:[#allocation3 + $0x1c8] sm:$0xff] }
 0x54d   : > { %v1740_v63 = vadd.f32 %v1732_v17, %v9110_v50  ;;  %v1725_v50 = vpop.permute.xlu0 %1724 }
 0x54e   : > { %v1608_v21 = vpop.f32.mrf.mxu3 }
 0x54f   : > { %v8073_v47 = vpack.i.bf16 %v1740_v63, %v1739_v19  ;;  %v1609_v33 = vadd.f32 %v1608_v21, %v1547_v23  ;;  %v9278_v4 = vpack.c.bf16 %v1740_v63, %v1739_v19 }
 0x550   : > { %v1682_v30 = vpop.f32.mrf.mxu0 }
 0x551   : > { %8074 = vrot.lane.b32.xlu1 %v8073_v47, %s8787_s11  ;;  %v1693_v32 = vadd.f32 %v1682_v30, %v1609_v33  ;;  %v8793_v30 = vmov 5  }
 0x552   : > { %8115 = vset.pattern.permute.xlu0 %v8793_v30  ;;  %8114 = vset.pattern.permute.xlu2 %v8793_v30 }
 0x553   : > { %v1733_v51 = vadd.f32 %v1721_v60, %v1693_v32  ;;  %8113 = vset.pattern.permute.xlu1 %v8793_v30  ;;  %v9309_v32 = vld [vmem:[%s10277_s2 + $0x30] sm:$0xff] }
 0x555   : > { %v1741_v39 = vadd.f32 %v1733_v51, %v9125_v12  ;;  %v1697_v60 = vpop.permute.xlu0 %1696  ;;  %v1736_v12 = vadd.f32 %v1728_v45, %v9141_v59 }
 0x556   : > { %v1610_v41 = vpop.f32.mrf.mxu3  ;;  %v1727_v28 = vadd.f32 %v1697_v60, %v9263_v27 }
 0x557   : > { %v1611_v26 = vadd.f32 %v1610_v41, %v1549_v36 }
 0x558   : > { %v1684_v42 = vpop.f32.mrf.mxu0  ;;  %v1735_v54 = vadd.f32 %v1727_v28, %v9104_v61 }
 0x559   : > { %v1694_v53 = vadd.f32 %v1684_v42, %v1611_v26  ;;  %8099 = vrot.lane.b32.xlu1 %v8098_v49, %s8786_s28  ;;  %v7652_v26 = vld [vmem:[#allocation3 + $0x1a0] sm:$0xff] }
 0x55a   : > { %v9289_v56 = vpack.c.bf16 %v1736_v12, %v1735_v54  ;;  %v8108_v10 = vpack.i.bf16 %v1736_v12, %v1735_v54 }
 0x55b   : > { %v1734_v44 = vadd.f32 %v1725_v50, %v1694_v53  ;;  %v7658_v50 = vld [vmem:[#allocation3 + $0x1d0] sm:$0xff]  ;;  %v7660_v53 = vld [vmem:[#allocation3 + $0x1e0] sm:$0xff] }
 0x55d   : > { %v1742_v57 = vadd.f32 %v1734_v44, %v9127_v14  ;;  %v9283_v14 = vpack.c.bf16 %v1738_v34, %v1737_v35  ;;  %v9324_v44 = vld [vmem:[%s10277_s2 + $0x28] sm:$0xff] }
 0x55f   : > { %v8088_v25 = vpack.i.bf16 %v1742_v57, %v1741_v39  ;;  %v9273_v0 = vpack.c.bf16 %v1742_v57, %v1741_v39  ;;  %v7659_v39 = vld [vmem:[#allocation3 + $0x1d8] sm:$0xff]  ;;  %v7661_v57 = vld [vmem:[#allocation3 + $0x1e8] sm:$0xff] }
 0x561   : > { %8089 = vrot.lane.b32.xlu0 %v8088_v25, %s8786_s28  ;;  %8079 = vrot.lane.b32.xlu2 %v8088_v25, %s8787_s11  ;;  %v7654_v25 = vld [vmem:[#allocation3 + $0x1b0] sm:$0xff] }
 0x562   : > { %1853 = vmatpush.bf16.msrb.mxu1 %v9273_v0  ;;  %2046 = vperm.xlu1 %8113, %v9309_v32  }
 0x566   : > { %1854 = vmatpush.bf16.msrb.mxu1 %v9278_v4 }
 0x569   : > { %8094 = vrot.lane.b32.xlu0 %v8098_v49, %s8787_s11  ;;  %8084 = vrot.lane.b32.xlu2 %v8073_v47, %s8786_s28 }
 0x56a   : > { %1855 = vmatpush.bf16.msrb.mxu1 %v9283_v14  ;;  %2042 = vperm.xlu1 %8113, %v9324_v44  }
 0x56e   : > { %1856 = vmatpush.bf16.msrb.mxu1 %v9289_v56 }
 0x571   : > { %8109 = vrot.lane.b32.xlu0 %v8108_v10, %s8786_s28  ;;  %8104 = vrot.lane.b32.xlu2 %v8108_v10, %s8787_s11 }
 0x572   : > { %6546 = vmatmul.msk.bf16.vlgmr.msrb.gmra.mxu1 %vm414_vm0, %v7656_v22  ;;  %2034 = vperm.xlu1 %8113, %v9243_v18  }
 0x579   : > { %2038 = vperm.xlu0 %8115, %v9208_v55   ;;  %2050 = vperm.xlu2 %8114, %v9202_v40  }
 0x581   : > { %2026 = vperm.xlu0 %8115, %v9237_v8   ;;  %2030 = vperm.xlu2 %8114, %v9223_v5  }
 0x582   : > { %6547 = vmatmul.msk.bf16.gmra.mxu1 %vm414_vm0, %v7657_v11 }
 0x589   : > { %2022 = vperm.xlu2 %8114, %v9217_v58  }
 0x592   : > { %6548 = vmatmul.msk.bf16.gmra.mxu1 %vm414_vm0, %v7658_v50 }
 0x5a2   : > { %6549 = vmatmul.msk.bf16.gmra.mxu1 %vm414_vm0, %v7659_v39 }
 0x5bb   : > { %v8080_v59 = vpop.permute.xlu2 %8079 }
 0x5bc   : > { %v8082_v27 = vunpack.i.h.bf16 %v8080_v59  ;;  %v8081_v46 = vunpack.i.l.bf16 %v8080_v59 }
 0x5be   : > { %v6567_v6 = vpack.c.bf16 %v8082_v27, %v8081_v46 }
 0x5c0   : > { %6568 = vmatpush.bf16.msk.msrb.mxu2 %vm8978_vm4, %v6567_v6 }
 0x5c3   : > { %v8075_v7 = vpop.permute.xlu1 %8074  ;;  %v8085_v62 = vpop.permute.xlu2 %8084 }
 0x5c4   : > { %v8077_v61 = vunpack.i.h.bf16 %v8075_v7  ;;  %v8076_v9 = vunpack.i.l.bf16 %v8075_v7  ;;  %v8087_v37 = vunpack.i.h.bf16 %v8085_v62  ;;  %v8086_v17 = vunpack.i.l.bf16 %v8085_v62 }
 0x5c6   : > { %v6570_v43 = vpack.c.bf16 %v8077_v61, %v8076_v9  ;;  %v6602_v24 = vpack.c.bf16 %v8087_v37, %v8086_v17 }
 0x5c8   : > { %6571 = vmatpush.bf16.msk.msrb.mxu2 %vm8978_vm4, %v6570_v43 }
 0x5cb   : > { %v8100_v23 = vpop.permute.xlu1 %8099  ;;  %v8105_v21 = vpop.permute.xlu2 %8104 }
 0x5cc   : > { %v8102_v19 = vunpack.i.h.bf16 %v8100_v23  ;;  %v8101_v63 = vunpack.i.l.bf16 %v8100_v23  ;;  %v8107_v33 = vunpack.i.h.bf16 %v8105_v21  ;;  %v8106_v34 = vunpack.i.l.bf16 %v8105_v21 }
 0x5ce   : > { %v6605_v31 = vpack.c.bf16 %v8102_v19, %v8101_v63  ;;  %v6576_v36 = vpack.c.bf16 %v8107_v33, %v8106_v34 }
 0x5d3   : > { %v8090_v2 = vpop.permute.xlu0 %8089  ;;  %v2051_v37 = vpop.permute.xlu2 %2050 }
 0x5d4   : > { %v8092_v15 = vunpack.i.h.bf16 %v8090_v2  ;;  %v8091_v16 = vunpack.i.l.bf16 %v8090_v2  ;;  %v2047_v7 = vpop.permute.xlu1 %2046 }
 0x5d6   : > { %v6599_v20 = vpack.c.bf16 %v8092_v15, %v8091_v16 }
 0x5d8   : > { %6600 = vmatpush.bf16.msk.msrb.mxu3 %vm8958_vm2, %v6599_v20 }
 0x5db   : > { %v8095_v48 = vpop.permute.xlu0 %8094 }
 0x5dc   : > { %v8097_v47 = vunpack.i.h.bf16 %v8095_v48  ;;  %v8096_v29 = vunpack.i.l.bf16 %v8095_v48  ;;  %6603 = vmatpush.bf16.msk.msrb.mxu3 %vm8958_vm2, %v6602_v24  ;;  %v2043_v62 = vpop.permute.xlu1 %2042 }
 0x5de   : > { %v6573_v35 = vpack.c.bf16 %v8097_v47, %v8096_v29 }
 0x5e0   : > { %6574 = vmatpush.bf16.msk.msrb.mxu2 %vm8978_vm4, %v6573_v35  ;;  %6606 = vmatpush.bf16.msk.msrb.mxu3 %vm8958_vm2, %v6605_v31 }
 0x5e3   : > { %v8110_v41 = vpop.permute.xlu0 %8109 }
 0x5e4   : > { %v8112_v49 = vunpack.i.h.bf16 %v8110_v41  ;;  %v8111_v42 = vunpack.i.l.bf16 %v8110_v41  ;;  %6577 = vmatpush.bf16.msk.msrb.mxu2 %vm8978_vm4, %v6576_v36  ;;  %v2035_v47 = vpop.permute.xlu1 %2034 }
 0x5e6   : > { %v6608_v51 = vpack.c.bf16 %v8112_v49, %v8111_v42 }
 0x5e7   : > { %6578 = vmatmul.msk.bf16.vlgmr.msrb.gmra.mxu2 %vm414_vm0, %v7652_v26  ;;  %v2031_v26 = vpop.permute.xlu2 %2030 }
 0x5e8   : > { %6609 = vmatpush.bf16.msk.msrb.mxu3 %vm8958_vm2, %v6608_v51 }
 0x5eb   : > { %6610 = vmatmul.msk.bf16.vlgmr.msrb.gmra.mxu3 %vm414_vm0, %v7660_v53  ;;  %v2039_v20 = vpop.permute.xlu0 %2038 }
 0x5ec   : > { %2464 = vmatpush.bf16.msra.mxu3 %v9273_v0  ;;  %v7662_v0 = vld [vmem:[#allocation3 + $0x1f0] sm:$0xff] }
 0x5ef   : > { %v1858_v60 = vpop.f32.mrf.mxu1 }
 0x5f0   : > { %2465 = vmatpush.bf16.msra.mxu3 %v9278_v4 }
 0x5f4   : > { %2466 = vmatpush.bf16.msra.mxu3 %v9283_v14 }
 0x5f7   : > { %6579 = vmatmul.msk.bf16.gmra.mxu2 %vm414_vm0, %v7653_v13  ;;  %v1860_v45 = vpop.f32.mrf.mxu1 }
 0x5f8   : > { %2467 = vmatpush.bf16.msra.mxu3 %v9289_v56 }
 0x5fb   : > { %6611 = vmatmul.msk.bf16.gmra.mxu3 %vm414_vm0, %v7661_v57 }
 0x5ff   : > { %v1863_v56 = vpop.f32.mrf.mxu1 }
 0x607   : > { %6580 = vmatmul.msk.bf16.gmra.mxu2 %vm414_vm0, %v7654_v25  ;;  %v1865_v27 = vpop.f32.mrf.mxu1 }
 0x60b   : > { %6612 = vmatmul.msk.bf16.gmra.mxu3 %vm414_vm0, %v7662_v0 }
 0x60f   : > { %v1868_v61 = vpop.f32.mrf.mxu1 }
 0x617   : > { %6581 = vmatmul.msk.bf16.gmra.mxu2 %vm414_vm0, %v7655_v1  ;;  %v1870_v15 = vpop.f32.mrf.mxu1 }
 0x61b   : > { %6613 = vmatmul.msk.bf16.gmra.mxu3 %vm414_vm0, %v7663_v3 }
 0x61f   : > { %v1873_v30 = vpop.f32.mrf.mxu1 }
 0x627   : > { %v1875_v57 = vpop.f32.mrf.mxu1 }
 0x66a   : > { %v1919_v4 = vpop.f32.mrf.mxu2 }
 0x66b   : > { %v1920_v28 = vadd.f32 %v1919_v4, %v1858_v60 }
 0x66e   : > { %v1993_v12 = vpop.f32.mrf.mxu3 }
 0x66f   : > { %v9344_v14 = vadd.f32 %v1993_v12, %v1920_v28 }
 0x672   : > { %v1921_v54 = vpop.f32.mrf.mxu2 }
 0x676   : > { %v1995_v10 = vpop.f32.mrf.mxu3 }
 0x67a   : > { %v1924_v59 = vpop.f32.mrf.mxu2 }
 0x67b   : > { %v1925_v24 = vadd.f32 %v1924_v59, %v1863_v56  ;;  %v1922_v56 = vadd.f32 %v1921_v54, %v1860_v45 }
 0x67e   : > { %v1998_v46 = vpop.f32.mrf.mxu3 }
 0x67f   : > { %v2015_v33 = vadd.f32 %v1998_v46, %v1925_v24  ;;  %v2014_v46 = vadd.f32 %v1995_v10, %v1922_v56  ;;  %v7673_v56 = vld [vmem:[#allocation3 + $0x248] sm:$0xff] }
 0x681   : > { %v2055_v42 = vadd.f32 %v2031_v26, %v2015_v33 }
 0x682   : > { %v1926_v6 = vpop.f32.mrf.mxu2 }
 0x683   : > { %v1927_v19 = vadd.f32 %v1926_v6, %v1865_v27  ;;  %v2063_v13 = vmax.f32 %v2055_v42, 0.0  ;;  %v2027_v6 = vpop.permute.xlu0 %2026 }
 0x686   : > { %v2000_v9 = vpop.f32.mrf.mxu3 }
 0x687   : > { %v2016_v48 = vadd.f32 %v2000_v9, %v1927_v19  ;;  %v2054_v9 = vadd.f32 %v2027_v6, %v2014_v46  ;;  %v7675_v46 = vld [vmem:[#allocation3 + $0x258] sm:$0xff] }
 0x689   : > { %v2056_v36 = vadd.f32 %v2035_v47, %v2016_v48 }
 0x68a   : > { %v1929_v43 = vpop.f32.mrf.mxu2 }
 0x68b   : > { %v1930_v2 = vadd.f32 %v1929_v43, %v1868_v61  ;;  %v2064_v51 = vmax.f32 %v2056_v36, 0.0  ;;  %v2023_v61 = vpop.permute.xlu2 %2022 }
 0x68d   : > { %v8141_v0 = vpack.i.bf16 %v2064_v51, %v2063_v13 }
 0x68e   : > { %v2003_v22 = vpop.f32.mrf.mxu3 }
 0x68f   : > { %v2017_v11 = vadd.f32 %v2003_v22, %v1930_v2  ;;  %v2062_v22 = vmax.f32 %v2054_v9, 0.0  ;;  %v8794_v2 = vmov 6  }
 0x690   : > { %8157 = vset.pattern.permute.xlu1 %v8794_v2  ;;  %8156 = vset.pattern.permute.xlu0 %v8794_v2 }
 0x691   : > { %v2057_v63 = vadd.f32 %v2039_v20, %v2017_v11  ;;  %v7668_v20 = vld [vmem:[#allocation3 + $0x220] sm:$0xff] }
 0x692   : > { %v1931_v16 = vpop.f32.mrf.mxu2 }
 0x693   : > { %v1932_v17 = vadd.f32 %v1931_v16, %v1870_v15  ;;  %v2065_v34 = vmax.f32 %v2057_v63, 0.0  ;;  %v8795_v15 = vmov 7   ;;  %v7669_v63 = vld [vmem:[#allocation3 + $0x228] sm:$0xff] }
 0x694   : > { %8158 = vset.pattern.permute.xlu2 %v8795_v15 }
 0x696   : > { %v2005_v23 = vpop.f32.mrf.mxu3 }
 0x697   : > { %v2018_v21 = vadd.f32 %v2005_v23, %v1932_v17 }
 0x699   : > { %v2058_v29 = vadd.f32 %v2043_v62, %v2018_v21  ;;  %v2140_v62 = vpack.c.bf16 %v2064_v51, %v2063_v13 }
 0x69a   : > { %v1934_v31 = vpop.f32.mrf.mxu2 }
 0x69b   : > { %v2066_v35 = vmax.f32 %v2058_v29, 0.0  ;;  %v1935_v50 = vadd.f32 %v1934_v31, %v1873_v30  ;;  %v7678_v30 = vld [vmem:[#allocation3 + $0x270] sm:$0xff] }
 0x69d   : > { %v8116_v41 = vpack.i.bf16 %v2066_v35, %v2065_v34  ;;  %v2141_v43 = vpack.c.bf16 %v2066_v35, %v2065_v34 }
 0x69e   : > { %v2008_v49 = vpop.f32.mrf.mxu3 }
 0x69f   : > { %8117 = vrot.lane.b32.xlu0 %v8116_v41, %s8786_s28  ;;  %v2019_v39 = vadd.f32 %v2008_v49, %v1935_v50 }
 0x6a1   : > { %v2059_v3 = vadd.f32 %v2047_v7, %v2019_v39  ;;  %v2053_v7 = vadd.f32 %v2023_v61, %v9344_v14  ;;  %v7676_v14 = vld [vmem:[#allocation3 + $0x260] sm:$0xff] }
 0x6a2   : > { %v1936_v53 = vpop.f32.mrf.mxu2  ;;  %6714 = vmatmul.msk.bf16.vlgmr.msra.gmra.mxu3 %vm414_vm0, %v7676_v14 }
 0x6a3   : > { %v1937_v25 = vadd.f32 %v1936_v53, %v1875_v57  ;;  %v2067_v28 = vmax.f32 %v2059_v3, 0.0  ;;  %v2061_v45 = vmax.f32 %v2053_v7, 0.0  ;;  %v7679_v3 = vld [vmem:[#allocation3 + $0x278] sm:$0xff] }
 0x6a5   : > { %v2139_v54 = vpack.c.bf16 %v2062_v22, %v2061_v45  ;;  %v8151_v10 = vpack.i.bf16 %v2062_v22, %v2061_v45 }
 0x6a6   : > { %v2010_v1 = vpop.f32.mrf.mxu3 }
 0x6a7   : > { %v2020_v60 = vadd.f32 %v2010_v1, %v1937_v25  ;;  %8142 = vrot.lane.b32.xlu0 %v8141_v0, %s8787_s11  ;;  %v7670_v25 = vld [vmem:[#allocation3 + $0x230] sm:$0xff] }
 0x6a9   : > { %v2060_v4 = vadd.f32 %v2051_v37, %v2020_v60  ;;  %v7664_v60 = vld [vmem:[#allocation3 + $0x200] sm:$0xff] }
 0x6ab   : > { %v2068_v12 = vmax.f32 %v2060_v4, 0.0  ;;  %v7672_v4 = vld [vmem:[#allocation3 + $0x240] sm:$0xff] }
 0x6ad   : > { %v8131_v59 = vpack.i.bf16 %v2068_v12, %v2067_v28  ;;  %v2142_v27 = vpack.c.bf16 %v2068_v12, %v2067_v28  ;;  %v7671_v28 = vld [vmem:[#allocation3 + $0x238] sm:$0xff]  ;;  %v7665_v12 = vld [vmem:[#allocation3 + $0x208] sm:$0xff] }
 0x6af   : > { %8132 = vrot.lane.b32.xlu2 %v8131_v59, %s8787_s11  ;;  %8122 = vrot.lane.b32.xlu1 %v8131_v59, %s8786_s28  ;;  %v7674_v59 = vld [vmem:[#allocation3 + $0x250] sm:$0xff] }
 0x6b0   : > { %2179 = vmatpush.bf16.msra.mxu0 %v2142_v27  ;;  %2372 = vperm.xlu0 %8156, %v9309_v32   ;;  %v7667_v27 = vld [vmem:[#allocation3 + $0x218] sm:$0xff] }
 0x6b4   : > { %2180 = vmatpush.bf16.msra.mxu0 %v2141_v43 }
 0x6b7   : > { %8137 = vrot.lane.b32.xlu2 %v8141_v0, %s8786_s28  ;;  %8127 = vrot.lane.b32.xlu1 %v8116_v41, %s8787_s11 }
 0x6b8   : > { %2181 = vmatpush.bf16.msra.mxu0 %v2140_v62  ;;  %2368 = vperm.xlu0 %8156, %v9324_v44  }
 0x6bc   : > { %2182 = vmatpush.bf16.msra.mxu0 %v2139_v54 }
 0x6bf   : > { %8152 = vrot.lane.b32.xlu2 %v8151_v10, %s8787_s11  ;;  %8147 = vrot.lane.b32.xlu1 %v8151_v10, %s8786_s28 }
 0x6c0   : > { %2356 = vperm.xlu0 %8156, %v9223_v5   ;;  %6630 = vmatmul.msk.bf16.vlgmr.msra.gmra.mxu0 %vm414_vm0, %v7668_v20 }
 0x6c7   : > { %2376 = vperm.xlu1 %8157, %v9202_v40   ;;  %2421 = vperm.xlu2 %8158, %v9309_v32  }
 0x6c8   : > { %8163 = vset.pattern.permute.xlu0 %v8795_v15 }
 0x6c9   : > { %2409 = vperm.xlu0 %8163, %v9243_v18  }
 0x6cf   : > { %8159 = vset.pattern.permute.xlu1 %v8795_v15  ;;  %8160 = vset.pattern.permute.xlu2 %v8794_v2 }
 0x6d0   : > { %2425 = vperm.xlu1 %8159, %v9202_v40   ;;  %2364 = vperm.xlu2 %8160, %v9208_v55   ;;  %v7677_v40 = vld [vmem:[#allocation3 + $0x268] sm:$0xff] }
 0x6d1   : > { %6715 = vmatmul.msk.bf16.gmra.mxu3 %vm414_vm0, %v7677_v40  ;;  %6631 = vmatmul.msk.bf16.gmra.mxu0 %vm414_vm0, %v7669_v63 }
 0x6d8   : > { %2413 = vperm.xlu1 %8159, %v9208_v55   ;;  %8161 = vset.pattern.permute.xlu2 %v8795_v15 }
 0x6d9   : > { %2417 = vperm.xlu2 %8161, %v9324_v44  }
 0x6e0   : > { %8162 = vset.pattern.permute.xlu1 %v8794_v2 }
 0x6e1   : > { %2360 = vperm.xlu1 %8162, %v9243_v18   ;;  %2405 = vperm.xlu2 %8161, %v9223_v5  }
 0x6e2   : > { %6716 = vmatmul.msk.bf16.gmra.mxu3 %vm414_vm0, %v7678_v30  ;;  %6632 = vmatmul.msk.bf16.gmra.mxu0 %vm414_vm0, %v7670_v25 }
 0x6e9   : > { %2348 = vperm.xlu1 %8162, %v9217_v58   ;;  %8164 = vset.pattern.permute.xlu2 %v8794_v2 }
 0x6ea   : > { %2352 = vperm.xlu2 %8164, %v9237_v8  }
 0x6f1   : > { %8165 = vset.pattern.permute.xlu1 %v8795_v15 }
 0x6f2   : > { %2397 = vperm.xlu1 %8165, %v9217_v58   ;;  %8166 = vset.pattern.permute.xlu2 %v8795_v15 }
 0x6f3   : > { %2401 = vperm.xlu2 %8166, %v9237_v8   ;;  %6717 = vmatmul.msk.bf16.gmra.mxu3 %vm414_vm0, %v7679_v3  ;;  %v7666_v8 = vld [vmem:[#allocation3 + $0x210] sm:$0xff] }
 0x6f4   : > { %6633 = vmatmul.msk.bf16.gmra.mxu0 %vm414_vm0, %v7671_v28 }
 0x709   : > { %v8133_v16 = vpop.permute.xlu2 %8132 }
 0x70a   : > { %v8135_v11 = vunpack.i.h.bf16 %v8133_v16  ;;  %v8134_v37 = vunpack.i.l.bf16 %v8133_v16 }
 0x70c   : > { %v6651_v17 = vpack.c.bf16 %v8135_v11, %v8134_v37 }
 0x70e   : > { %6652 = vmatpush.bf16.msk.msra.mxu1 %vm8978_vm4, %v6651_v17 }
 0x711   : > { %v8118_v23 = vpop.permute.xlu0 %8117  ;;  %v8138_v21 = vpop.permute.xlu2 %8137 }
 0x712   : > { %v8120_v48 = vunpack.i.h.bf16 %v8118_v23  ;;  %v8119_v47 = vunpack.i.l.bf16 %v8118_v23  ;;  %v8140_v31 = vunpack.i.h.bf16 %v8138_v21  ;;  %v8139_v33 = vunpack.i.l.bf16 %v8138_v21 }
 0x714   : > { %v6686_v18 = vpack.c.bf16 %v8120_v48, %v8119_v47  ;;  %v6689_v41 = vpack.c.bf16 %v8140_v31, %v8139_v33 }
 0x719   : > { %v8143_v34 = vpop.permute.xlu0 %8142  ;;  %v8153_v50 = vpop.permute.xlu2 %8152 }
 0x71a   : > { %v8145_v26 = vunpack.i.h.bf16 %v8143_v34  ;;  %v8144_v49 = vunpack.i.l.bf16 %v8143_v34  ;;  %v8155_v53 = vunpack.i.h.bf16 %v8153_v50  ;;  %v8154_v13 = vunpack.i.l.bf16 %v8153_v50 }
 0x71c   : > { %v6657_v51 = vpack.c.bf16 %v8145_v26, %v8144_v49  ;;  %v6660_v0 = vpack.c.bf16 %v8155_v53, %v8154_v13 }
 0x721   : > { %v8123_v24 = vpop.permute.xlu1 %8122  ;;  %v2422_v48 = vpop.permute.xlu2 %2421 }
 0x722   : > { %v8125_v55 = vunpack.i.h.bf16 %v8123_v24  ;;  %v8124_v19 = vunpack.i.l.bf16 %v8123_v24  ;;  %v2373_v63 = vpop.permute.xlu0 %2372 }
 0x724   : > { %v6683_v29 = vpack.c.bf16 %v8125_v55, %v8124_v19 }
 0x725   : > { %v2469_v22 = vpop.f32.mrf.mxu3 }
 0x726   : > { %6684 = vmatpush.bf16.msk.msra.mxu2 %vm8958_vm2, %v6683_v29 }
 0x729   : > { %v8128_v35 = vpop.permute.xlu1 %8127 }
 0x72a   : > { %v8130_v36 = vunpack.i.h.bf16 %v8128_v35  ;;  %v8129_v5 = vunpack.i.l.bf16 %v8128_v35  ;;  %6687 = vmatpush.bf16.msk.msra.mxu2 %vm8958_vm2, %v6686_v18  ;;  %v2369_v31 = vpop.permute.xlu0 %2368  ;;  %v2365_v34 = vpop.permute.xlu2 %2364 }
 0x72c   : > { %v6654_v42 = vpack.c.bf16 %v8130_v36, %v8129_v5 }
 0x72d   : > { %v9415_v2 = vpop.f32.mrf.mxu3 }
 0x72e   : > { %6655 = vmatpush.bf16.msk.msra.mxu1 %vm8978_vm4, %v6654_v42  ;;  %6690 = vmatpush.bf16.msk.msra.mxu2 %vm8958_vm2, %v6689_v41 }
 0x731   : > { %v8148_v39 = vpop.permute.xlu1 %8147 }
 0x732   : > { %v8150_v57 = vunpack.i.h.bf16 %v8148_v39  ;;  %v8149_v58 = vunpack.i.l.bf16 %v8148_v39  ;;  %6658 = vmatpush.bf16.msk.msra.mxu1 %vm8978_vm4, %v6657_v51  ;;  %v2357_v49 = vpop.permute.xlu0 %2356 }
 0x733   : > { %v2418_v42 = vpop.permute.xlu2 %2417 }
 0x734   : > { %v6692_v1 = vpack.c.bf16 %v8150_v57, %v8149_v58 }
 0x736   : > { %6661 = vmatpush.bf16.msk.msra.mxu1 %vm8978_vm4, %v6660_v0  ;;  %6693 = vmatpush.bf16.msk.msra.mxu2 %vm8958_vm2, %v6692_v1 }
 0x739   : > { %6662 = vmatmul.msk.bf16.vlgmr.msra.gmra.mxu1 %vm414_vm0, %v7664_v60  ;;  %6694 = vmatmul.msk.bf16.vlgmr.msra.gmra.mxu2 %vm414_vm0, %v7672_v4  ;;  %v9409_v6 = vpop.permute.xlu1 %2376 }
 0x73d   : > { %v2184_v7 = vpop.f32.mrf.mxu0 }
 0x742   : > { %v9411_v61 = vpop.permute.xlu1 %2425 }
 0x745   : > { %v9413_v54 = vpop.f32.mrf.mxu0 }
 0x749   : > { %6663 = vmatmul.msk.bf16.gmra.mxu1 %vm414_vm0, %v7665_v12  ;;  %6695 = vmatmul.msk.bf16.gmra.mxu2 %vm414_vm0, %v7673_v56 }
 0x74a   : > { %v2414_v9 = vpop.permute.xlu1 %2413 }
 0x74e   : > { %v2189_v20 = vpop.f32.mrf.mxu0 }
 0x753   : > { %v2361_v43 = vpop.permute.xlu1 %2360 }
 0x754   : > { %v2474_v23 = vpop.f32.mrf.mxu3 }
 0x756   : > { %v2191_v19 = vpop.f32.mrf.mxu0 }
 0x759   : > { %6664 = vmatmul.msk.bf16.gmra.mxu1 %vm414_vm0, %v7666_v8  ;;  %6696 = vmatmul.msk.bf16.gmra.mxu2 %vm414_vm0, %v7674_v59  ;;  %v2410_v59 = vpop.permute.xlu0 %2409 }
 0x75b   : > { %v2349_v62 = vpop.permute.xlu1 %2348 }
 0x75c   : > { %v2476_v47 = vpop.f32.mrf.mxu3 }
 0x75f   : > { %v2194_v30 = vpop.f32.mrf.mxu0 }
 0x764   : > { %v2398_v14 = vpop.permute.xlu1 %2397 }
 0x765   : > { %v2470_v11 = vadd.f32 %v2469_v22, %v2398_v14  ;;  %v2479_v35 = vpop.f32.mrf.mxu3 }
 0x766   : > { %v2480_v13 = vadd.f32 %v2479_v35, %v2414_v9 }
 0x767   : > { %v2196_v41 = vpop.f32.mrf.mxu0 }
 0x769   : > { %6665 = vmatmul.msk.bf16.gmra.mxu1 %vm414_vm0, %v7667_v27  ;;  %6697 = vmatmul.msk.bf16.gmra.mxu2 %vm414_vm0, %v7675_v46  ;;  %v2406_v27 = vpop.permute.xlu2 %2405 }
 0x76d   : > { %v2481_v51 = vpop.f32.mrf.mxu3 }
 0x76e   : > { %v2482_v3 = vadd.f32 %v2481_v51, %v2418_v42  ;;  %v9471_v42 = vld [vmem:[%s10277_s2 + $0x20] sm:$0xff] }
 0x771   : > { %v2199_v28 = vpop.f32.mrf.mxu0 }
 0x7b6   : > { %v2245_v45 = vpop.f32.mrf.mxu1 }
 0x7b7   : > { %v2246_v10 = vadd.f32 %v2245_v45, %v2184_v7  ;;  %v2484_v7 = vpop.f32.mrf.mxu3 }
 0x7bc   : > { %v2319_v15 = vpop.f32.mrf.mxu2 }
 0x7bd   : > { %v2339_v16 = vadd.f32 %v2319_v15, %v2246_v10  ;;  %v2477_v10 = vadd.f32 %v2476_v47, %v2410_v59  ;;  %v2485_v47 = vadd.f32 %v2484_v7, %v2422_v48 }
 0x7be   : > { %v9417_v37 = vpop.f32.mrf.mxu1 }
 0x7bf   : > { %v2379_v17 = vadd.f32 %v2349_v62, %v2339_v16  ;;  %v2475_v62 = vadd.f32 %v2474_v23, %v2406_v27  ;;  %v2248_v35 = vadd.f32 %v9417_v37, %v9413_v54 }
 0x7c1   : > { %v9419_v40 = vadd.f32 %v2470_v11, %v2379_v17 }
 0x7c4   : > { %v9421_v24 = vpop.f32.mrf.mxu2 }
 0x7c6   : > { %v2250_v55 = vpop.f32.mrf.mxu1 }
 0x7c7   : > { %v2251_v57 = vadd.f32 %v2250_v55, %v2189_v20  ;;  %v2201_v20 = vpop.f32.mrf.mxu0 }
 0x7cc   : > { %v2324_v21 = vpop.f32.mrf.mxu2 }
 0x7cd   : > { %v2341_v12 = vadd.f32 %v2324_v21, %v2251_v57 }
 0x7ce   : > { %v2252_v29 = vpop.f32.mrf.mxu1 }
 0x7cf   : > { %v2253_v58 = vadd.f32 %v2252_v29, %v2191_v19  ;;  %v2381_v45 = vadd.f32 %v2357_v49, %v2341_v12  ;;  %v2486_v19 = vpop.f32.mrf.mxu3  ;;  %v2353_v29 = vpop.permute.xlu2 %2352  ;;  %v8796_v49 = vmov 8  }
 0x7d0   : > { %8208 = vset.pattern.permute.xlu0 %v8796_v49  ;;  %8209 = vset.pattern.permute.xlu1 %v8796_v49 }
 0x7d1   : > { %v9432_v11 = vadd.f32 %v2475_v62, %v2381_v45  ;;  %8207 = vset.pattern.permute.xlu2 %v8796_v49 }
 0x7d4   : > { %v2326_v18 = vpop.f32.mrf.mxu2 }
 0x7d5   : > { %v2342_v60 = vadd.f32 %v2326_v18, %v2253_v58  ;;  %v2487_v18 = vadd.f32 %v2486_v19, %v9411_v61 }
 0x7d6   : > { %v2255_v33 = vpop.f32.mrf.mxu1 }
 0x7d7   : > { %v2256_v5 = vadd.f32 %v2255_v33, %v2194_v30  ;;  %v2382_v46 = vadd.f32 %v2361_v43, %v2342_v60 }
 0x7d9   : > { %v9430_v15 = vadd.f32 %v2477_v10, %v2382_v46 }
 0x7db   : > { %v8192_v43 = vpack.i.bf16 %v9430_v15, %v9432_v11 }
 0x7dc   : > { %v2329_v36 = vpop.f32.mrf.mxu2 }
 0x7dd   : > { %v2343_v50 = vadd.f32 %v2329_v36, %v2256_v5  ;;  %v2340_v5 = vadd.f32 %v9421_v24, %v2248_v35  ;;  %v7688_v35 = vld [vmem:[#allocation3 + $0x2c0] sm:$0xff] }
 0x7de   : > { %v2257_v26 = vpop.f32.mrf.mxu1 }
 0x7df   : > { %v2258_v53 = vadd.f32 %v2257_v26, %v2196_v41  ;;  %v2383_v25 = vadd.f32 %v2365_v34, %v2343_v50  ;;  %v2380_v61 = vadd.f32 %v2353_v29, %v2340_v5  ;;  %v2568_v41 = vpack.c.bf16 %v9430_v15, %v9432_v11  ;;  %v9477_v50 = vld [vmem:[%s10277_s2 + $0x38] sm:$0xff]  ;;  %v7689_v5 = vld [vmem:[#allocation3 + $0x2c8] sm:$0xff] }
 0x7e1   : > { %v9423_v56 = vadd.f32 %v2480_v13, %v2383_v25 }
 0x7e4   : > { %v2331_v39 = vpop.f32.mrf.mxu2 }
 0x7e5   : > { %v2344_v0 = vadd.f32 %v2331_v39, %v2258_v53 }
 0x7e6   : > { %v2260_v1 = vpop.f32.mrf.mxu1 }
 0x7e7   : > { %v2384_v4 = vadd.f32 %v2369_v31, %v2344_v0  ;;  %v2261_v14 = vadd.f32 %v2260_v1, %v2199_v28  ;;  %v7685_v0 = vld [vmem:[#allocation3 + $0x2a8] sm:$0xff]  ;;  %v9484_v1 = vld [vmem:[%s10277_s2 + $0x10] sm:$0xff] }
 0x7e9   : > { %v9425_v8 = vadd.f32 %v2482_v3, %v2384_v4  ;;  %v9490_v3 = vld [vmem:[%s10277_s2] sm:$0xff] }
 0x7eb   : > { %v8167_v9 = vpack.i.bf16 %v9425_v8, %v9423_v56  ;;  %v2569_v48 = vpack.c.bf16 %v9425_v8, %v9423_v56 }
 0x7ec   : > { %v2334_v22 = vpop.f32.mrf.mxu2 }
 0x7ed   : > { %8168 = vrot.lane.b32.xlu2 %v8167_v9, %s8786_s28  ;;  %v2345_v17 = vadd.f32 %v2334_v22, %v2261_v14 }
 0x7ee   : > { %v2262_v16 = vpop.f32.mrf.mxu1 }
 0x7ef   : > { %v2263_v55 = vadd.f32 %v2262_v16, %v2201_v20  ;;  %v2385_v23 = vadd.f32 %v2373_v63, %v2345_v17  ;;  %v9510_v17 = vld [vmem:[%s10277_s2 + $0x18] sm:$0xff] }
 0x7f1   : > { %v9439_v33 = vadd.f32 %v2485_v47, %v2385_v23 }
 0x7f4   : > { %v2336_v21 = vpop.f32.mrf.mxu2 }
 0x7f5   : > { %v2346_v30 = vadd.f32 %v2336_v21, %v2263_v55  ;;  %8193 = vrot.lane.b32.xlu2 %v8192_v43, %s8787_s11 }
 0x7f7   : > { %v2386_v31 = vadd.f32 %v9409_v6, %v2346_v30  ;;  %v2402_v6 = vpop.permute.xlu2 %2401  ;;  %v7686_v30 = vld [vmem:[#allocation3 + $0x2b0] sm:$0xff] }
 0x7f8   : > { %v2472_v54 = vadd.f32 %v9415_v2, %v2402_v6  ;;  %v7684_v2 = vld [vmem:[#allocation3 + $0x2a0] sm:$0xff]  ;;  %v7682_v6 = vld [vmem:[#allocation3 + $0x290] sm:$0xff] }
 0x7f9   : > { %v9441_v34 = vadd.f32 %v2487_v18, %v2386_v31  ;;  %v7680_v31 = vld [vmem:[#allocation3 + $0x280] sm:$0xff] }
 0x7fa   : > { %v9455_v37 = vadd.f32 %v2472_v54, %v2380_v61  ;;  %v7690_v61 = vld [vmem:[#allocation3 + $0x2d0] sm:$0xff]  ;;  %v7691_v54 = vld [vmem:[#allocation3 + $0x2d8] sm:$0xff] }
 0x7fb   : > { %v8182_v36 = vpack.i.bf16 %v9441_v34, %v9439_v33  ;;  %v2570_v63 = vpack.c.bf16 %v9441_v34, %v9439_v33 }
 0x7fc   : > { %v2567_v24 = vpack.c.bf16 %v9455_v37, %v9419_v40  ;;  %v8202_v26 = vpack.i.bf16 %v9455_v37, %v9419_v40 }
 0x7fd   : > { %8183 = vrot.lane.b32.xlu1 %v8182_v36, %s8787_s11  ;;  %8173 = vrot.lane.b32.xlu0 %v8182_v36, %s8786_s28  ;;  %v7687_v36 = vld [vmem:[#allocation3 + $0x2b8] sm:$0xff] }
 0x7fe   : > { %2607 = vmatpush.bf16.msrb.mxu0 %v2570_v63  ;;  %2800 = vperm.xlu2 %8207, %v9309_v32   ;;  %v7681_v63 = vld [vmem:[#allocation3 + $0x288] sm:$0xff] }
 0x802   : > { %2608 = vmatpush.bf16.msrb.mxu0 %v2569_v48  ;;  %v7683_v48 = vld [vmem:[#allocation3 + $0x298] sm:$0xff] }
 0x805   : > { %8188 = vrot.lane.b32.xlu1 %v8192_v43, %s8786_s28  ;;  %8178 = vrot.lane.b32.xlu0 %v8167_v9, %s8787_s11 }
 0x806   : > { %2609 = vmatpush.bf16.msrb.mxu0 %v2568_v41  ;;  %2796 = vperm.xlu2 %8207, %v9324_v44   ;;  %v9504_v44 = vld [vmem:[%s10277_s2 + $0x8] sm:$0xff] }
 0x80a   : > { %2610 = vmatpush.bf16.msrb.mxu0 %v2567_v24 }
 0x80d   : > { %8203 = vrot.lane.b32.xlu1 %v8202_v26, %s8787_s11  ;;  %8198 = vrot.lane.b32.xlu0 %v8202_v26, %s8786_s28 }
 0x80e   : > { %6734 = vmatmul.msk.bf16.vlgmr.msrb.gmra.mxu0 %vm414_vm0, %v7684_v2  ;;  %2788 = vperm.xlu2 %8207, %v9510_v17  }
 0x815   : > { %2792 = vperm.xlu1 %8209, %v9471_v42   ;;  %2804 = vperm.xlu0 %8208, %v9477_v50  }
 0x81d   : > { %2784 = vperm.xlu1 %8209, %v9484_v1   ;;  %2776 = vperm.xlu0 %8208, %v9490_v3  }
 0x81e   : > { %6735 = vmatmul.msk.bf16.gmra.mxu0 %vm414_vm0, %v7685_v0 }
 0x825   : > { %2780 = vperm.xlu1 %8209, %v9504_v44  }
 0x82e   : > { %6736 = vmatmul.msk.bf16.gmra.mxu0 %vm414_vm0, %v7686_v30 }
 0x83e   : > { %6737 = vmatmul.msk.bf16.gmra.mxu0 %vm414_vm0, %v7687_v36 }
 0x847   : > { %v8169_v51 = vpop.permute.xlu2 %8168 }
 0x848   : > { %v8171_v32 = vunpack.i.h.bf16 %v8169_v51  ;;  %v8170_v60 = vunpack.i.l.bf16 %v8169_v51 }
 0x84a   : > { %v6790_v12 = vpack.c.bf16 %v8171_v32, %v8170_v60 }
 0x84f   : > { %v8194_v59 = vpop.permute.xlu2 %8193 }
 0x850   : > { %v8196_v45 = vunpack.i.h.bf16 %v8194_v59  ;;  %v8195_v10 = vunpack.i.l.bf16 %v8194_v59 }
 0x852   : > { %v6761_v20 = vpack.c.bf16 %v8196_v45, %v8195_v10 }
 0x858   : > { %v2801_v32 = vpop.permute.xlu2 %2800 }
 0x860   : > { %v2797_v59 = vpop.permute.xlu2 %2796 }
 0x86f   : > { %v8184_v53 = vpop.permute.xlu1 %8183  ;;  %v8174_v13 = vpop.permute.xlu0 %8173 }
 0x870   : > { %v8186_v39 = vunpack.i.h.bf16 %v8184_v53  ;;  %v8185_v57 = vunpack.i.l.bf16 %v8184_v53  ;;  %v8176_v58 = vunpack.i.h.bf16 %v8174_v13  ;;  %v8175_v25 = vunpack.i.l.bf16 %v8174_v13 }
 0x872   : > { %v6755_v4 = vpack.c.bf16 %v8186_v39, %v8185_v57  ;;  %v6787_v28 = vpack.c.bf16 %v8176_v58, %v8175_v25 }
 0x874   : > { %6756 = vmatpush.bf16.msk.msrb.mxu1 %vm8978_vm4, %v6755_v4  ;;  %6788 = vmatpush.bf16.msk.msrb.mxu2 %vm8958_vm2, %v6787_v28 }
 0x877   : > { %v8189_v27 = vpop.permute.xlu1 %8188  ;;  %v8179_v46 = vpop.permute.xlu0 %8178 }
 0x878   : > { %v8191_v9 = vunpack.i.h.bf16 %v8189_v27  ;;  %v8190_v7 = vunpack.i.l.bf16 %v8189_v27  ;;  %v8181_v22 = vunpack.i.h.bf16 %v8179_v46  ;;  %v8180_v62 = vunpack.i.l.bf16 %v8179_v46  ;;  %6791 = vmatpush.bf16.msk.msrb.mxu2 %vm8958_vm2, %v6790_v12 }
 0x87a   : > { %v6793_v14 = vpack.c.bf16 %v8191_v9, %v8190_v7  ;;  %v6758_v16 = vpack.c.bf16 %v8181_v22, %v8180_v62 }
 0x87c   : > { %6759 = vmatpush.bf16.msk.msrb.mxu1 %vm8978_vm4, %v6758_v16  ;;  %6794 = vmatpush.bf16.msk.msrb.mxu2 %vm8958_vm2, %v6793_v14 }
 0x87f   : > { %v8204_v55 = vpop.permute.xlu1 %8203  ;;  %v8199_v43 = vpop.permute.xlu0 %8198 }
 0x880   : > { %v8206_v19 = vunpack.i.h.bf16 %v8204_v55  ;;  %v8205_v21 = vunpack.i.l.bf16 %v8204_v55  ;;  %v8201_v29 = vunpack.i.h.bf16 %v8199_v43  ;;  %v8200_v23 = vunpack.i.l.bf16 %v8199_v43  ;;  %6762 = vmatpush.bf16.msk.msrb.mxu1 %vm8978_vm4, %v6761_v20 }
 0x882   : > { %v6764_v47 = vpack.c.bf16 %v8206_v19, %v8205_v21  ;;  %v6796_v18 = vpack.c.bf16 %v8201_v29, %v8200_v23  ;;  %v2789_v21 = vpop.permute.xlu2 %2788 }
 0x884   : > { %6765 = vmatpush.bf16.msk.msrb.mxu1 %vm8978_vm4, %v6764_v47  ;;  %6797 = vmatpush.bf16.msk.msrb.mxu2 %vm8958_vm2, %v6796_v18 }
 0x887   : > { %6766 = vmatmul.msk.bf16.vlgmr.msrb.gmra.mxu1 %vm414_vm0, %v7680_v31  ;;  %6798 = vmatmul.msk.bf16.vlgmr.msrb.gmra.mxu2 %vm414_vm0, %v7688_v35  ;;  %v2793_v22 = vpop.permute.xlu1 %2792 }
 0x88b   : > { %v2612_v41 = vpop.f32.mrf.mxu0 }
 0x88f   : > { %v2785_v35 = vpop.permute.xlu1 %2784 }
 0x893   : > { %v2614_v26 = vpop.f32.mrf.mxu0 }
 0x897   : > { %6767 = vmatmul.msk.bf16.gmra.mxu1 %vm414_vm0, %v7681_v63  ;;  %6799 = vmatmul.msk.bf16.gmra.mxu2 %vm414_vm0, %v7689_v5 }
 0x89b   : > { %v2617_v13 = vpop.f32.mrf.mxu0 }
 0x8a3   : > { %v2619_v58 = vpop.f32.mrf.mxu0 }
 0x8a7   : > { %6768 = vmatmul.msk.bf16.gmra.mxu1 %vm414_vm0, %v7682_v6  ;;  %6800 = vmatmul.msk.bf16.gmra.mxu2 %vm414_vm0, %v7690_v61 }
 0x8ab   : > { %v2622_v60 = vpop.f32.mrf.mxu0 }
 0x8b3   : > { %v2624_v46 = vpop.f32.mrf.mxu0 }
 0x8b7   : > { %6769 = vmatmul.msk.bf16.gmra.mxu1 %vm414_vm0, %v7683_v48  ;;  %6801 = vmatmul.msk.bf16.gmra.mxu2 %vm414_vm0, %v7691_v54 }
 0x8bb   : > { %v2627_v29 = vpop.f32.mrf.mxu0 }
 0x904   : > { %v2673_v24 = vpop.f32.mrf.mxu1 }
 0x905   : > { %v2674_v2 = vadd.f32 %v2673_v24, %v2612_v41  ;;  %v2629_v41 = vpop.f32.mrf.mxu0 }
 0x90a   : > { %v2747_v49 = vpop.f32.mrf.mxu2 }
 0x90b   : > { %v9533_v51 = vadd.f32 %v2747_v49, %v2674_v2 }
 0x90c   : > { %v2675_v53 = vpop.f32.mrf.mxu1 }
 0x912   : > { %v2749_v39 = vpop.f32.mrf.mxu2 }
 0x914   : > { %v2678_v57 = vpop.f32.mrf.mxu1 }
 0x915   : > { %v2679_v10 = vadd.f32 %v2678_v57, %v2617_v13  ;;  %v2805_v13 = vpop.permute.xlu0 %2804 }
 0x91a   : > { %v2752_v25 = vpop.f32.mrf.mxu2 }
 0x91b   : > { %v2769_v23 = vadd.f32 %v2752_v25, %v2679_v10 }
 0x91c   : > { %v2680_v0 = vpop.f32.mrf.mxu1 }
 0x91d   : > { %v2681_v14 = vadd.f32 %v2680_v0, %v2619_v58  ;;  %v2809_v63 = vadd.f32 %v2785_v35, %v2769_v23  ;;  %v9555_v23 = vld [vmem:[%s10277_s2 + $0x30] sm:$0xff] }
 0x91f   : > { %v2817_v48 = vmax.f32 %v2809_v63, 0.0 }
 0x922   : > { %v2754_v4 = vpop.f32.mrf.mxu2 }
 0x923   : > { %v2770_v43 = vadd.f32 %v2754_v4, %v2681_v14  ;;  %v2676_v4 = vadd.f32 %v2675_v53, %v2614_v26 }
 0x924   : > { %v2683_v28 = vpop.f32.mrf.mxu1 }
 0x925   : > { %v2684_v27 = vadd.f32 %v2683_v28, %v2622_v60  ;;  %v2810_v18 = vadd.f32 %v2789_v21, %v2770_v43  ;;  %v7697_v21 = vld [vmem:[#allocation3 + $0x308] sm:$0xff] }
 0x927   : > { %v2818_v6 = vmax.f32 %v2810_v18, 0.0 }
 0x929   : > { %v8235_v2 = vpack.i.bf16 %v2818_v6, %v2817_v48 }
 0x92a   : > { %v2757_v12 = vpop.f32.mrf.mxu2 }
 0x92b   : > { %v2771_v7 = vadd.f32 %v2757_v12, %v2684_v27  ;;  %v2781_v27 = vpop.permute.xlu1 %2780 }
 0x92c   : > { %v2685_v9 = vpop.f32.mrf.mxu1 }
 0x92d   : > { %v2686_v62 = vadd.f32 %v2685_v9, %v2624_v46  ;;  %v2811_v16 = vadd.f32 %v2793_v22, %v2771_v7  ;;  %v2777_v46 = vpop.permute.xlu0 %2776 }
 0x92f   : > { %v2819_v30 = vmax.f32 %v2811_v16, 0.0 }
 0x932   : > { %v2759_v45 = vpop.f32.mrf.mxu2 }
 0x933   : > { %v2772_v20 = vadd.f32 %v2759_v45, %v2686_v62  ;;  %v2894_v62 = vpack.c.bf16 %v2818_v6, %v2817_v48  ;;  %v7696_v45 = vld [vmem:[#allocation3 + $0x300] sm:$0xff]  ;;  %v9563_v6 = vld [vmem:[%s10277_s2 + $0x28] sm:$0xff] }
 0x934   : > { %v2688_v55 = vpop.f32.mrf.mxu1 }
 0x935   : > { %v2812_v19 = vadd.f32 %v2797_v59, %v2772_v20  ;;  %v2689_v5 = vadd.f32 %v2688_v55, %v2627_v29  ;;  %v2768_v59 = vadd.f32 %v2749_v39, %v2676_v4  ;;  %v8797_v29 = vmov 9  }
 0x936   : > { %8252 = vset.pattern.permute.xlu0 %v8797_v29  ;;  %8251 = vset.pattern.permute.xlu2 %v8797_v29 }
 0x937   : > { %v2820_v47 = vmax.f32 %v2812_v19, 0.0  ;;  %v2808_v9 = vadd.f32 %v2781_v27, %v2768_v59  ;;  %8250 = vset.pattern.permute.xlu1 %v8797_v29 }
 0x939   : > { %v8210_v31 = vpack.i.bf16 %v2820_v47, %v2819_v30  ;;  %v2895_v7 = vpack.c.bf16 %v2820_v47, %v2819_v30  ;;  %v2816_v22 = vmax.f32 %v2808_v9, 0.0  ;;  %v7699_v9 = vld [vmem:[#allocation3 + $0x318] sm:$0xff] }
 0x93a   : > { %v2762_v36 = vpop.f32.mrf.mxu2 }
 0x93b   : > { %8211 = vrot.lane.b32.xlu1 %v8210_v31, %s8787_s11  ;;  %v2773_v54 = vadd.f32 %v2762_v36, %v2689_v5 }
 0x93c   : > { %v2690_v61 = vpop.f32.mrf.mxu1 }
 0x93d   : > { %v2691_v24 = vadd.f32 %v2690_v61, %v2629_v41  ;;  %v2813_v57 = vadd.f32 %v2801_v32, %v2773_v54  ;;  %v2807_v32 = vadd.f32 %v2777_v46, %v9533_v51  ;;  %v7698_v61 = vld [vmem:[#allocation3 + $0x310] sm:$0xff]  ;;  %v7700_v46 = vld [vmem:[#allocation3 + $0x320] sm:$0xff] }
 0x93f   : > { %v2821_v0 = vmax.f32 %v2813_v57, 0.0  ;;  %v2815_v26 = vmax.f32 %v2807_v32, 0.0  ;;  %v7701_v32 = vld [vmem:[#allocation3 + $0x328] sm:$0xff] }
 0x941   : > { %v2893_v53 = vpack.c.bf16 %v2816_v22, %v2815_v26  ;;  %v8245_v39 = vpack.i.bf16 %v2816_v22, %v2815_v26  ;;  %v7694_v22 = vld [vmem:[#allocation3 + $0x2f0] sm:$0xff]  ;;  %v7695_v26 = vld [vmem:[#allocation3 + $0x2f8] sm:$0xff] }
 0x942   : > { %v2764_v49 = vpop.f32.mrf.mxu2 }
 0x943   : > { %v2774_v58 = vadd.f32 %v2764_v49, %v2691_v24  ;;  %8236 = vrot.lane.b32.xlu1 %v8235_v2, %s8786_s28 }
 0x945   : > { %v2814_v25 = vadd.f32 %v2805_v13, %v2774_v58 }
 0x947   : > { %v2822_v60 = vmax.f32 %v2814_v25, 0.0 }
 0x949   : > { %v8225_v28 = vpack.i.bf16 %v2822_v60, %v2821_v0  ;;  %v2896_v12 = vpack.c.bf16 %v2822_v60, %v2821_v0 }
 0x94b   : > { %8226 = vrot.lane.b32.xlu0 %v8225_v28, %s8786_s28  ;;  %8216 = vrot.lane.b32.xlu2 %v8225_v28, %s8787_s11  ;;  %v7692_v28 = vld [vmem:[#allocation3 + $0x2e0] sm:$0xff] }
 0x94c   : > { %2933 = vmatpush.bf16.msrb.mxu3 %v2896_v12  ;;  %3126 = vperm.xlu1 %8250, %v9555_v23  }
 0x950   : > { %2934 = vmatpush.bf16.msrb.mxu3 %v2895_v7  ;;  %v7693_v7 = vld [vmem:[#allocation3 + $0x2e8] sm:$0xff] }
 0x953   : > { %8231 = vrot.lane.b32.xlu0 %v8235_v2, %s8787_s11  ;;  %8221 = vrot.lane.b32.xlu2 %v8210_v31, %s8786_s28 }
 0x954   : > { %2935 = vmatpush.bf16.msrb.mxu3 %v2894_v62  ;;  %3122 = vperm.xlu1 %8250, %v9563_v6   ;;  %v7702_v62 = vld [vmem:[#allocation3 + $0x330] sm:$0xff] }
 0x958   : > { %2936 = vmatpush.bf16.msrb.mxu3 %v2893_v53  ;;  %v7703_v53 = vld [vmem:[#allocation3 + $0x338] sm:$0xff] }
 0x95b   : > { %8246 = vrot.lane.b32.xlu0 %v8245_v39, %s8786_s28  ;;  %8241 = vrot.lane.b32.xlu2 %v8245_v39, %s8787_s11 }
 0x95c   : > { %6818 = vmatmul.msk.bf16.vlgmr.msrb.gmra.mxu3 %vm414_vm0, %v7696_v45  ;;  %3114 = vperm.xlu1 %8250, %v9510_v17  }
 0x963   : > { %3118 = vperm.xlu0 %8252, %v9471_v42   ;;  %3130 = vperm.xlu2 %8251, %v9477_v50  }
 0x96b   : > { %3106 = vperm.xlu0 %8252, %v9504_v44   ;;  %3110 = vperm.xlu2 %8251, %v9484_v1  }
 0x96c   : > { %6819 = vmatmul.msk.bf16.gmra.mxu3 %vm414_vm0, %v7697_v21 }
 0x973   : > { %3102 = vperm.xlu2 %8251, %v9490_v3  }
 0x97c   : > { %6820 = vmatmul.msk.bf16.gmra.mxu3 %vm414_vm0, %v7698_v61 }
 0x98c   : > { %6821 = vmatmul.msk.bf16.gmra.mxu3 %vm414_vm0, %v7699_v9 }
 0x9a5   : > { %v8217_v10 = vpop.permute.xlu2 %8216 }
 0x9a6   : > { %v8219_v14 = vunpack.i.h.bf16 %v8217_v10  ;;  %v8218_v51 = vunpack.i.l.bf16 %v8217_v10 }
 0x9a8   : > { %v6839_v16 = vpack.c.bf16 %v8219_v14, %v8218_v51 }
 0x9aa   : > { %6840 = vmatpush.bf16.msk.msra.mxu0 %vm8978_vm4, %v6839_v16 }
 0x9ad   : > { %v8212_v20 = vpop.permute.xlu1 %8211  ;;  %v8222_v30 = vpop.permute.xlu2 %8221 }
 0x9ae   : > { %v8214_v55 = vunpack.i.h.bf16 %v8212_v20  ;;  %v8213_v43 = vunpack.i.l.bf16 %v8212_v20  ;;  %v8224_v35 = vunpack.i.h.bf16 %v8222_v30  ;;  %v8223_v36 = vunpack.i.l.bf16 %v8222_v30 }
 0x9b0   : > { %v6842_v19 = vpack.c.bf16 %v8214_v55, %v8213_v43  ;;  %v6874_v48 = vpack.c.bf16 %v8224_v35, %v8223_v36 }
 0x9b2   : > { %6843 = vmatpush.bf16.msk.msra.mxu0 %vm8978_vm4, %v6842_v19 }
 0x9b5   : > { %v8237_v5 = vpop.permute.xlu1 %8236  ;;  %v8242_v24 = vpop.permute.xlu2 %8241 }
 0x9b6   : > { %v8239_v54 = vunpack.i.h.bf16 %v8237_v5  ;;  %v8238_v41 = vunpack.i.l.bf16 %v8237_v5  ;;  %v8244_v58 = vunpack.i.h.bf16 %v8242_v24  ;;  %v8243_v25 = vunpack.i.l.bf16 %v8242_v24 }
 0x9b8   : > { %v6877_v57 = vpack.c.bf16 %v8239_v54, %v8238_v41  ;;  %v6848_v60 = vpack.c.bf16 %v8244_v58, %v8243_v25 }
 0x9bd   : > { %v8227_v47 = vpop.permute.xlu0 %8226  ;;  %v3131_v19 = vpop.permute.xlu2 %3130 }
 0x9be   : > { %v8229_v18 = vunpack.i.h.bf16 %v8227_v47  ;;  %v8228_v31 = vunpack.i.l.bf16 %v8227_v47  ;;  %v3127_v20 = vpop.permute.xlu1 %3126 }
 0x9c0   : > { %v6871_v63 = vpack.c.bf16 %v8229_v18, %v8228_v31 }
 0x9c2   : > { %6872 = vmatpush.bf16.msk.msra.mxu1 %vm8958_vm2, %v6871_v63 }
 0x9c5   : > { %v8232_v2 = vpop.permute.xlu0 %8231  ;;  %v3111_v35 = vpop.permute.xlu2 %3110 }
 0x9c6   : > { %v8234_v49 = vunpack.i.h.bf16 %v8232_v2  ;;  %v8233_v13 = vunpack.i.l.bf16 %v8232_v2  ;;  %6875 = vmatpush.bf16.msk.msra.mxu1 %vm8958_vm2, %v6874_v48  ;;  %v3123_v29 = vpop.permute.xlu1 %3122 }
 0x9c8   : > { %v6845_v0 = vpack.c.bf16 %v8234_v49, %v8233_v13 }
 0x9ca   : > { %6846 = vmatpush.bf16.msk.msra.mxu0 %vm8978_vm4, %v6845_v0  ;;  %6878 = vmatpush.bf16.msk.msra.mxu1 %vm8958_vm2, %v6877_v57 }
 0x9cd   : > { %v8247_v4 = vpop.permute.xlu0 %8246 }
 0x9ce   : > { %v8249_v12 = vunpack.i.h.bf16 %v8247_v4  ;;  %v8248_v59 = vunpack.i.l.bf16 %v8247_v4  ;;  %6849 = vmatpush.bf16.msk.msra.mxu0 %vm8978_vm4, %v6848_v60  ;;  %v3115_v61 = vpop.permute.xlu1 %3114 }
 0x9d0   : > { %v6880_v27 = vpack.c.bf16 %v8249_v12, %v8248_v59 }
 0x9d1   : > { %6850 = vmatmul.msk.bf16.vlgmr.msra.gmra.mxu0 %vm414_vm0, %v7692_v28 }
 0x9d2   : > { %6881 = vmatpush.bf16.msk.msra.mxu1 %vm8958_vm2, %v6880_v27 }
 0x9d5   : > { %6882 = vmatmul.msk.bf16.vlgmr.msra.gmra.mxu1 %vm414_vm0, %v7700_v46  ;;  %v3119_v58 = vpop.permute.xlu0 %3118 }
 0x9df   : > { %v2938_v39 = vpop.f32.mrf.mxu3 }
 0x9e1   : > { %6851 = vmatmul.msk.bf16.gmra.mxu0 %vm414_vm0, %v7693_v7 }
 0x9e5   : > { %6883 = vmatmul.msk.bf16.gmra.mxu1 %vm414_vm0, %v7701_v32  ;;  %v3107_v32 = vpop.permute.xlu0 %3106 }
 0x9e7   : > { %v2940_v45 = vpop.f32.mrf.mxu3 }
 0x9ef   : > { %v2943_v51 = vpop.f32.mrf.mxu3 }
 0x9f1   : > { %6852 = vmatmul.msk.bf16.gmra.mxu0 %vm414_vm0, %v7694_v22 }
 0x9f5   : > { %6884 = vmatmul.msk.bf16.gmra.mxu1 %vm414_vm0, %v7702_v62 }
 0x9f7   : > { %v2945_v21 = vpop.f32.mrf.mxu3 }
 0x9ff   : > { %v2948_v63 = vpop.f32.mrf.mxu3 }
 0xa01   : > { %6853 = vmatmul.msk.bf16.gmra.mxu0 %vm414_vm0, %v7695_v26 }
 0xa05   : > { %6885 = vmatmul.msk.bf16.gmra.mxu1 %vm414_vm0, %v7703_v53 }
 0xa07   : > { %v2950_v0 = vpop.f32.mrf.mxu3 }
 0xa0f   : > { %v2953_v22 = vpop.f32.mrf.mxu3 }
 0xa4e   : > { %v2999_v10 = vpop.f32.mrf.mxu0 }
 0xa4f   : > { %v3000_v59 = vadd.f32 %v2999_v10, %v2938_v39 }
 0xa52   : > { %v3073_v14 = vpop.f32.mrf.mxu1 }
 0xa53   : > { %v3093_v62 = vadd.f32 %v3073_v14, %v3000_v59 }
 0xa56   : > { %v3001_v16 = vpop.f32.mrf.mxu0 }
 0xa57   : > { %v3002_v27 = vadd.f32 %v3001_v16, %v2940_v45  ;;  %v2955_v16 = vpop.f32.mrf.mxu3 }
 0xa5a   : > { %v3075_v55 = vpop.f32.mrf.mxu1 }
 0xa5b   : > { %v3094_v7 = vadd.f32 %v3075_v55, %v3002_v27 }
 0xa5e   : > { %v3004_v43 = vpop.f32.mrf.mxu0 }
 0xa5f   : > { %v3005_v47 = vadd.f32 %v3004_v43, %v2943_v51  ;;  %v3103_v51 = vpop.permute.xlu2 %3102  ;;  %v3134_v43 = vadd.f32 %v3107_v32, %v3094_v7 }
 0xa61   : > { %v3142_v39 = vadd.f32 %v3134_v43, %v9455_v37 }
 0xa62   : > { %v3078_v30 = vpop.f32.mrf.mxu1 }
 0xa63   : > { %v3095_v31 = vadd.f32 %v3078_v30, %v3005_v47  ;;  %v3133_v47 = vadd.f32 %v3103_v51, %v3093_v62  ;;  %v7704_v62 = vld [vmem:[#allocation3 + $0x340] sm:$0xff] }
 0xa65   : > { %v3135_v48 = vadd.f32 %v3111_v35, %v3095_v31  ;;  %v3141_v10 = vadd.f32 %v3133_v47, %v9419_v40  ;;  %v7712_v47 = vld [vmem:[#allocation3 + $0x380] sm:$0xff] }
 0xa66   : > { %v3006_v18 = vpop.f32.mrf.mxu0 }
 0xa67   : > { %v3007_v36 = vadd.f32 %v3006_v18, %v2945_v21  ;;  %v3143_v2 = vadd.f32 %v3135_v48, %v9432_v11 }
 0xa6a   : > { %v3080_v5 = vpop.f32.mrf.mxu1 }
 0xa6b   : > { %v3096_v54 = vadd.f32 %v3080_v5, %v3007_v36 }
 0xa6d   : > { %v3136_v41 = vadd.f32 %v3115_v61, %v3096_v54 }
 0xa6e   : > { %v3009_v24 = vpop.f32.mrf.mxu0 }
 0xa6f   : > { %v3144_v49 = vadd.f32 %v3136_v41, %v9430_v15  ;;  %v3010_v25 = vadd.f32 %v3009_v24, %v2948_v63 }
 0xa71   : > { %v8253_v13 = vpack.i.bf16 %v3144_v49, %v3143_v2  ;;  %v9610_v37 = vpack.c.bf16 %v3144_v49, %v3143_v2 }
 0xa72   : > { %v3083_v57 = vpop.f32.mrf.mxu1 }
 0xa73   : > { %8254 = vrot.lane.b32.xlu0 %v8253_v13, %s8787_s11  ;;  %v3097_v4 = vadd.f32 %v3083_v57, %v3010_v25 }
 0xa75   : > { %v3137_v46 = vadd.f32 %v3119_v58, %v3097_v4 }
 0xa76   : > { %v3011_v60 = vpop.f32.mrf.mxu0 }
 0xa77   : > { %v3012_v28 = vadd.f32 %v3011_v60, %v2950_v0  ;;  %v3145_v26 = vadd.f32 %v3137_v46, %v9423_v56  ;;  %v8263_v56 = vpack.i.bf16 %v3142_v39, %v3141_v10  ;;  %v7710_v46 = vld [vmem:[#allocation3 + $0x370] sm:$0xff] }
 0xa7a   : > { %v3085_v12 = vpop.f32.mrf.mxu1 }
 0xa7b   : > { %v3098_v9 = vadd.f32 %v3085_v12, %v3012_v28 }
 0xa7d   : > { %v3138_v11 = vadd.f32 %v3123_v29, %v3098_v9 }
 0xa7e   : > { %v3014_v15 = vpop.f32.mrf.mxu0 }
 0xa7f   : > { %v3146_v53 = vadd.f32 %v3138_v11, %v9425_v8  ;;  %v3015_v18 = vadd.f32 %v3014_v15, %v2953_v22 }
 0xa81   : > { %v8268_v21 = vpack.i.bf16 %v3146_v53, %v3145_v26  ;;  %v9607_v40 = vpack.c.bf16 %v3146_v53, %v3145_v26 }
 0xa82   : > { %v3088_v30 = vpop.f32.mrf.mxu1 }
 0xa83   : > { %8269 = vrot.lane.b32.xlu0 %v8268_v21, %s8786_s28  ;;  %8259 = vrot.lane.b32.xlu2 %v8268_v21, %s8787_s11  ;;  %v3099_v14 = vadd.f32 %v3088_v30, %v3015_v18  ;;  %v7711_v18 = vld [vmem:[#allocation3 + $0x378] sm:$0xff] }
 0xa85   : > { %v3139_v29 = vadd.f32 %v3127_v20, %v3099_v14  ;;  %v8798_v20 = vmov 10   ;;  %v7714_v14 = vld [vmem:[#allocation3 + $0x390] sm:$0xff] }
 0xa86   : > { %v3016_v45 = vpop.f32.mrf.mxu0  ;;  %8294 = vset.pattern.permute.xlu1 %v8798_v20  ;;  %8293 = vset.pattern.permute.xlu0 %v8798_v20 }
 0xa87   : > { %v3017_v55 = vadd.f32 %v3016_v45, %v2955_v16  ;;  %v3147_v36 = vadd.f32 %v3139_v29, %v9439_v33  ;;  %v9614_v33 = vpack.c.bf16 %v3142_v39, %v3141_v10  ;;  %8295 = vset.pattern.permute.xlu2 %v8798_v20  ;;  %v7705_v39 = vld [vmem:[#allocation3 + $0x348] sm:$0xff]  ;;  %v7706_v10 = vld [vmem:[#allocation3 + $0x350] sm:$0xff]  ;;  %v7707_v16 = vld [vmem:[#allocation3 + $0x358] sm:$0xff] }
 0xa88   : > { %v7713_v45 = vld [vmem:[#allocation3 + $0x388] sm:$0xff] }
 0xa8a   : > { %v3090_v8 = vpop.f32.mrf.mxu1 }
 0xa8b   : > { %v3100_v31 = vadd.f32 %v3090_v8, %v3017_v55  ;;  %8264 = vrot.lane.b32.xlu2 %v8263_v56, %s8787_s11  ;;  %3452 = vperm.xlu0 %8293, %v9555_v23  }
 0xa8d   : > { %v3140_v35 = vadd.f32 %v3131_v19, %v3100_v31  ;;  %v7709_v19 = vld [vmem:[#allocation3 + $0x368] sm:$0xff] }
 0xa8f   : > { %v3148_v63 = vadd.f32 %v3140_v35, %v9441_v34  ;;  %v7708_v34 = vld [vmem:[#allocation3 + $0x360] sm:$0xff] }
 0xa91   : > { %v8273_v5 = vpack.i.bf16 %v3148_v63, %v3147_v36  ;;  %v9602_v61 = vpack.c.bf16 %v3148_v63, %v3147_v36 }
 0xa93   : > { %8289 = vrot.lane.b32.xlu2 %v8263_v56, %s8786_s28  ;;  %8274 = vrot.lane.b32.xlu1 %v8273_v5, %s8787_s11  ;;  %v7715_v56 = vld [vmem:[#allocation3 + $0x398] sm:$0xff] }
 0xa94   : > { %3259 = vmatpush.bf16.msra.mxu2 %v9602_v61  ;;  %3440 = vperm.xlu0 %8293, %v9510_v17  }
 0xa98   : > { %3260 = vmatpush.bf16.msra.mxu2 %v9607_v40 }
 0xa9b   : > { %8279 = vrot.lane.b32.xlu1 %v8273_v5, %s8786_s28  ;;  %3444 = vperm.xlu2 %8295, %v9471_v42  }
 0xa9c   : > { %3261 = vmatpush.bf16.msra.mxu2 %v9610_v37 }
 0xaa0   : > { %3262 = vmatpush.bf16.msra.mxu2 %v9614_v33 }
 0xaa3   : > { %8284 = vrot.lane.b32.xlu1 %v8253_v13, %s8786_s28  ;;  %6902 = vmatmul.msk.bf16.vlgmr.msra.gmra.mxu2 %vm414_vm0, %v7708_v34 }
 0xaa4   : > { %3436 = vperm.xlu2 %8295, %v9484_v1  }
 0xaab   : > { %3456 = vperm.xlu1 %8294, %v9477_v50  }
 0xaac   : > { %3432 = vperm.xlu2 %8295, %v9504_v44  }
 0xab3   : > { %6903 = vmatmul.msk.bf16.gmra.mxu2 %vm414_vm0, %v7709_v19  ;;  %3448 = vperm.xlu1 %8294, %v9563_v6  }
 0xabb   : > { %3428 = vperm.xlu1 %8294, %v9490_v3  }
 0xac3   : > { %6904 = vmatmul.msk.bf16.gmra.mxu2 %vm414_vm0, %v7710_v46 }
 0xad3   : > { %6905 = vmatmul.msk.bf16.gmra.mxu2 %vm414_vm0, %v7711_v18 }
 0xadd   : > { %v8260_v48 = vpop.permute.xlu2 %8259 }
 0xade   : > { %v8262_v49 = vunpack.i.h.bf16 %v8260_v48  ;;  %v8261_v13 = vunpack.i.l.bf16 %v8260_v48 }
 0xae0   : > { %v6926_v25 = vpack.c.bf16 %v8262_v49, %v8261_v13 }
 0xae5   : > { %v8255_v54 = vpop.permute.xlu0 %8254  ;;  %v8265_v58 = vpop.permute.xlu2 %8264 }
 0xae6   : > { %v8257_v0 = vunpack.i.h.bf16 %v8255_v54  ;;  %v8256_v60 = vunpack.i.l.bf16 %v8255_v54  ;;  %v8267_v59 = vunpack.i.h.bf16 %v8265_v58  ;;  %v8266_v27 = vunpack.i.l.bf16 %v8265_v58 }
 0xae8   : > { %v6929_v9 = vpack.c.bf16 %v8257_v0, %v8256_v60  ;;  %v6932_v3 = vpack.c.bf16 %v8267_v59, %v8266_v27 }
 0xaed   : > { %v8290_v22 = vpop.permute.xlu2 %8289 }
 0xaee   : > { %v8292_v51 = vunpack.i.h.bf16 %v8290_v22  ;;  %v8291_v43 = vunpack.i.l.bf16 %v8290_v22 }
 0xaf0   : > { %v6964_v30 = vpack.c.bf16 %v8292_v51, %v8291_v43 }
 0xaf5   : > { %v8270_v4 = vpop.permute.xlu0 %8269 }
 0xaf6   : > { %v8272_v7 = vunpack.i.h.bf16 %v8270_v4  ;;  %v8271_v32 = vunpack.i.l.bf16 %v8270_v4 }
 0xaf8   : > { %v6958_v44 = vpack.c.bf16 %v8272_v7, %v8271_v32 }
 0xb05   : > { %v8275_v41 = vpop.permute.xlu1 %8274 }
 0xb06   : > { %v8277_v24 = vunpack.i.h.bf16 %v8275_v41  ;;  %v8276_v2 = vunpack.i.l.bf16 %v8275_v41 }
 0xb08   : > { %v6923_v57 = vpack.c.bf16 %v8277_v24, %v8276_v2  ;;  %v3453_v2 = vpop.permute.xlu0 %3452 }
 0xb0a   : > { %6924 = vmatpush.bf16.msk.msra.mxu3 %vm8978_vm4, %v6923_v57  ;;  %v3445_v57 = vpop.permute.xlu2 %3444 }
 0xb0d   : > { %v8280_v28 = vpop.permute.xlu1 %8279 }
 0xb0e   : > { %v8282_v12 = vunpack.i.h.bf16 %v8280_v28  ;;  %v8281_v1 = vunpack.i.l.bf16 %v8280_v28  ;;  %6927 = vmatpush.bf16.msk.msra.mxu3 %vm8978_vm4, %v6926_v25 }
 0xb10   : > { %v6955_v11 = vpack.c.bf16 %v8282_v12, %v8281_v1  ;;  %v3441_v46 = vpop.permute.xlu0 %3440 }
 0xb12   : > { %6930 = vmatpush.bf16.msk.msra.mxu3 %vm8978_vm4, %v6929_v9  ;;  %6956 = vmatpush.bf16.msk.msrb.mxu0 %vm8958_vm2, %v6955_v11 }
 0xb15   : > { %v8285_v15 = vpop.permute.xlu1 %8284 }
 0xb16   : > { %v8287_v26 = vunpack.i.h.bf16 %v8285_v15  ;;  %v8286_v53 = vunpack.i.l.bf16 %v8285_v15  ;;  %6933 = vmatpush.bf16.msk.msra.mxu3 %vm8978_vm4, %v6932_v3  ;;  %6959 = vmatpush.bf16.msk.msrb.mxu0 %vm8958_vm2, %v6958_v44  ;;  %v3437_v15 = vpop.permute.xlu2 %3436 }
 0xb18   : > { %v6961_v21 = vpack.c.bf16 %v8287_v26, %v8286_v53 }
 0xb19   : > { %6934 = vmatmul.msk.bf16.vlgmr.msra.gmra.mxu3 %vm414_vm0, %v7704_v62 }
 0xb1a   : > { %6962 = vmatpush.bf16.msk.msrb.mxu0 %vm8958_vm2, %v6961_v21 }
 0xb1d   : > { %v3457_v54 = vpop.permute.xlu1 %3456 }
 0xb1e   : > { %6965 = vmatpush.bf16.msk.msrb.mxu0 %vm8958_vm2, %v6964_v30 }
 0xb21   : > { %6966 = vmatmul.msk.bf16.vlgmr.msrb.gmra.mxu0 %vm414_vm0, %v7712_v47 }
 0xb22   : > { %3870 = vmatpush.bf16.msra.mxu0 %v9602_v61 }
 0xb25   : > { %v3449_v1 = vpop.permute.xlu1 %3448 }
 0xb26   : > { %3871 = vmatpush.bf16.msra.mxu0 %v9607_v40  ;;  %v3264_v55 = vpop.f32.mrf.mxu2 }
 0xb29   : > { %6935 = vmatmul.msk.bf16.gmra.mxu3 %vm414_vm0, %v7705_v39 }
 0xb2a   : > { %3872 = vmatpush.bf16.msra.mxu0 %v9610_v37 }
 0xb2e   : > { %3873 = vmatpush.bf16.msra.mxu0 %v9614_v33  ;;  %v3266_v8 = vpop.f32.mrf.mxu2 }
 0xb31   : > { %6967 = vmatmul.msk.bf16.gmra.mxu0 %vm414_vm0, %v7713_v45 }
 0xb36   : > { %v3269_v63 = vpop.f32.mrf.mxu2 }
 0xb39   : > { %6936 = vmatmul.msk.bf16.gmra.mxu3 %vm414_vm0, %v7706_v10 }
 0xb3e   : > { %v3271_v40 = vpop.f32.mrf.mxu2 }
 0xb41   : > { %6968 = vmatmul.msk.bf16.gmra.mxu0 %vm414_vm0, %v7714_v14 }
 0xb46   : > { %v3274_v20 = vpop.f32.mrf.mxu2 }
 0xb49   : > { %6937 = vmatmul.msk.bf16.gmra.mxu3 %vm414_vm0, %v7707_v16 }
 0xb4e   : > { %v3276_v49 = vpop.f32.mrf.mxu2 }
 0xb51   : > { %6969 = vmatmul.msk.bf16.gmra.mxu0 %vm414_vm0, %v7715_v56 }
 0xb56   : > { %v3279_v9 = vpop.f32.mrf.mxu2 }
 0xb5e   : > { %v3281_v30 = vpop.f32.mrf.mxu2 }
 0xb9c   : > { %v3325_v29 = vpop.f32.mrf.mxu3 }
 0xb9d   : > { %v3326_v31 = vadd.f32 %v3325_v29, %v3264_v55 }
 0xb9e   : > { %v3399_v35 = vpop.f32.mrf.mxu0 }
 0xb9f   : > { %v9658_v36 = vadd.f32 %v3399_v35, %v3326_v31 }
 0xba4   : > { %v3327_v5 = vpop.f32.mrf.mxu3 }
 0xba5   : > { %v3328_v56 = vadd.f32 %v3327_v5, %v3266_v8 }
 0xba6   : > { %v3401_v61 = vpop.f32.mrf.mxu0 }
 0xbac   : > { %v3330_v37 = vpop.f32.mrf.mxu3 }
 0xbad   : > { %v3331_v4 = vadd.f32 %v3330_v37, %v3269_v63  ;;  %v3420_v63 = vadd.f32 %v3401_v61, %v3328_v56  ;;  %v3429_v37 = vpop.permute.xlu1 %3428  ;;  %v7723_v56 = vld [vmem:[#allocation3 + $0x3d8] sm:$0xff] }
 0xbae   : > { %v3404_v33 = vpop.f32.mrf.mxu0 }
 0xbaf   : > { %v3421_v7 = vadd.f32 %v3404_v33, %v3331_v4 }
 0xbb1   : > { %v3461_v26 = vadd.f32 %v3437_v15, %v3421_v7  ;;  %v7730_v15 = vld [vmem:[#allocation3 + $0x410] sm:$0xff] }
 0xbb3   : > { %v3469_v43 = vmax.f32 %v3461_v26, 0.0  ;;  %v9719_v26 = vld [vmem:[%s10277_s2 + $0x8] sm:$0xff] }
 0xbb4   : > { %v3332_v34 = vpop.f32.mrf.mxu3 }
 0xbb5   : > { %v3333_v25 = vadd.f32 %v3332_v34, %v3271_v40  ;;  %v3433_v40 = vpop.permute.xlu2 %3432 }
 0xbb6   : > { %v3406_v19 = vpop.f32.mrf.mxu0  ;;  %v3460_v33 = vadd.f32 %v3433_v40, %v3420_v63  ;;  %v7719_v63 = vld [vmem:[#allocation3 + $0x3b8] sm:$0xff] }
 0xbb7   : > { %v3422_v59 = vadd.f32 %v3406_v19, %v3333_v25  ;;  %v7727_v40 = vld [vmem:[#allocation3 + $0x3f8] sm:$0xff] }
 0xbb8   : > { %v3468_v19 = vmax.f32 %v3460_v33, 0.0 }
 0xbb9   : > { %v3462_v44 = vadd.f32 %v3441_v46, %v3422_v59 }
 0xbbb   : > { %v3470_v51 = vmax.f32 %v3462_v44, 0.0 }
 0xbbc   : > { %v3335_v48 = vpop.f32.mrf.mxu3 }
 0xbbd   : > { %v3336_v24 = vadd.f32 %v3335_v48, %v3274_v20  ;;  %v8321_v18 = vpack.i.bf16 %v3470_v51, %v3469_v43  ;;  %v3459_v20 = vadd.f32 %v3429_v37, %v9658_v36  ;;  %v3546_v48 = vpack.c.bf16 %v3470_v51, %v3469_v43 }
 0xbbe   : > { %v3409_v41 = vpop.f32.mrf.mxu0  ;;  %v8800_v36 = vmov 11  }
 0xbbf   : > { %v3423_v13 = vadd.f32 %v3409_v41, %v3336_v24  ;;  %v3467_v8 = vmax.f32 %v3459_v20, 0.0  ;;  %8337 = vset.pattern.permute.xlu0 %v8800_v36  ;;  %8336 = vset.pattern.permute.xlu2 %v8800_v36  ;;  %v7728_v41 = vld [vmem:[#allocation3 + $0x400] sm:$0xff] }
 0xbc0   : > { %7070 = vmatmul.msk.bf16.vlgmr.msra.gmra.mxu0 %vm414_vm0, %v7728_v41  ;;  %v7720_v24 = vld [vmem:[#allocation3 + $0x3c0] sm:$0xff] }
 0xbc1   : > { %v3463_v28 = vadd.f32 %v3445_v57, %v3423_v13  ;;  %v3545_v5 = vpack.c.bf16 %v3468_v19, %v3467_v8  ;;  %v8331_v61 = vpack.i.bf16 %v3468_v19, %v3467_v8 }
 0xbc3   : > { %v3471_v32 = vmax.f32 %v3463_v28, 0.0  ;;  %v7721_v28 = vld [vmem:[#allocation3 + $0x3c8] sm:$0xff] }
 0xbc4   : > { %v3337_v58 = vpop.f32.mrf.mxu3 }
 0xbc5   : > { %v3338_v0 = vadd.f32 %v3337_v58, %v3276_v49 }
 0xbc6   : > { %v3411_v60 = vpop.f32.mrf.mxu0 }
 0xbc7   : > { %v3424_v12 = vadd.f32 %v3411_v60, %v3338_v0 }
 0xbc9   : > { %v3464_v27 = vadd.f32 %v3449_v1, %v3424_v12  ;;  %v9706_v1 = vld [vmem:[%s10277_s2 + $0x10] sm:$0xff] }
 0xbcb   : > { %v3472_v11 = vmax.f32 %v3464_v27, 0.0 }
 0xbcc   : > { %v3340_v3 = vpop.f32.mrf.mxu3 }
 0xbcd   : > { %v8296_v22 = vpack.i.bf16 %v3472_v11, %v3471_v32  ;;  %v3341_v53 = vadd.f32 %v3340_v3, %v3279_v9  ;;  %v3547_v34 = vpack.c.bf16 %v3472_v11, %v3471_v32 }
 0xbce   : > { %v3414_v62 = vpop.f32.mrf.mxu0 }
 0xbcf   : > { %8297 = vrot.lane.b32.xlu2 %v8296_v22, %s8787_s11  ;;  %v3425_v21 = vadd.f32 %v3414_v62, %v3341_v53 }
 0xbd1   : > { %v3465_v10 = vadd.f32 %v3453_v2, %v3425_v21  ;;  %v7729_v2 = vld [vmem:[#allocation3 + $0x408] sm:$0xff] }
 0xbd2   : > { %7071 = vmatmul.msk.bf16.gmra.mxu0 %vm414_vm0, %v7729_v2 }
 0xbd3   : > { %v3473_v55 = vmax.f32 %v3465_v10, 0.0  ;;  %v7716_v10 = vld [vmem:[#allocation3 + $0x3a0] sm:$0xff] }
 0xbd4   : > { %v3342_v47 = vpop.f32.mrf.mxu3 }
 0xbd5   : > { %v3343_v39 = vadd.f32 %v3342_v47, %v3281_v30 }
 0xbd6   : > { %v3416_v45 = vpop.f32.mrf.mxu0 }
 0xbd7   : > { %v3426_v14 = vadd.f32 %v3416_v45, %v3343_v39  ;;  %8322 = vrot.lane.b32.xlu2 %v8321_v18, %s8786_s28  ;;  %v7722_v45 = vld [vmem:[#allocation3 + $0x3d0] sm:$0xff] }
 0xbd9   : > { %v3466_v16 = vadd.f32 %v3457_v54, %v3426_v14  ;;  %v8799_v54 = vmov 12   ;;  %v7724_v14 = vld [vmem:[#allocation3 + $0x3e0] sm:$0xff] }
 0xbda   : > { %8338 = vset.pattern.permute.xlu1 %v8799_v54 }
 0xbdb   : > { %v3474_v29 = vmax.f32 %v3466_v16, 0.0  ;;  %v7731_v16 = vld [vmem:[#allocation3 + $0x418] sm:$0xff] }
 0xbdd   : > { %v8311_v31 = vpack.i.bf16 %v3474_v29, %v3473_v55  ;;  %v3548_v35 = vpack.c.bf16 %v3474_v29, %v3473_v55  ;;  %v7717_v55 = vld [vmem:[#allocation3 + $0x3a8] sm:$0xff] }
 0xbde   : > { %v7725_v29 = vld [vmem:[#allocation3 + $0x3e8] sm:$0xff] }
 0xbdf   : > { %8312 = vrot.lane.b32.xlu1 %v8311_v31, %s8786_s28  ;;  %8302 = vrot.lane.b32.xlu0 %v8311_v31, %s8787_s11  ;;  %v7718_v31 = vld [vmem:[#allocation3 + $0x3b0] sm:$0xff] }
 0xbe0   : > { %3585 = vmatpush.bf16.msrb.mxu1 %v3548_v35  ;;  %3778 = vperm.xlu2 %8336, %v9555_v23   ;;  %v7726_v35 = vld [vmem:[#allocation3 + $0x3f0] sm:$0xff] }
 0xbe2   : > { %7072 = vmatmul.msk.bf16.gmra.mxu0 %vm414_vm0, %v7730_v15 }
 0xbe4   : > { %3586 = vmatpush.bf16.msrb.mxu1 %v3547_v34 }
 0xbe7   : > { %8317 = vrot.lane.b32.xlu1 %v8321_v18, %s8787_s11  ;;  %8307 = vrot.lane.b32.xlu0 %v8296_v22, %s8786_s28 }
 0xbe8   : > { %3587 = vmatpush.bf16.msrb.mxu1 %v3546_v48  ;;  %8339 = vset.pattern.permute.xlu2 %v8799_v54 }
 0xbe9   : > { %3831 = vperm.xlu2 %8339, %v9477_v50  }
 0xbec   : > { %3588 = vmatpush.bf16.msrb.mxu1 %v3545_v5 }
 0xbef   : > { %8332 = vrot.lane.b32.xlu1 %v8331_v61, %s8786_s28  ;;  %8327 = vrot.lane.b32.xlu0 %v8331_v61, %s8787_s11 }
 0xbf0   : > { %6986 = vmatmul.msk.bf16.vlgmr.msrb.gmra.mxu1 %vm414_vm0, %v7720_v24 }
 0xbf1   : > { %8341 = vset.pattern.permute.xlu2 %v8800_v36 }
 0xbf2   : > { %3774 = vperm.xlu2 %8341, %v9563_v6   ;;  %7073 = vmatmul.msk.bf16.gmra.mxu0 %vm414_vm0, %v7731_v16 }
 0xbf7   : > { %3827 = vperm.xlu1 %8338, %v9555_v23   ;;  %3782 = vperm.xlu0 %8337, %v9477_v50  }
 0xbfa   : > { %3762 = vperm.xlu2 %8341, %v9706_v1  }
 0xbff   : > { %8340 = vset.pattern.permute.xlu1 %v8800_v36  ;;  %8342 = vset.pattern.permute.xlu0 %v8799_v54 }
 0xc00   : > { %3770 = vperm.xlu1 %8340, %v9471_v42   ;;  %3819 = vperm.xlu0 %8342, %v9471_v42  }
 0xc01   : > { %6987 = vmatmul.msk.bf16.gmra.mxu1 %vm414_vm0, %v7721_v28 }
 0xc02   : > { %8345 = vset.pattern.permute.xlu2 %v8799_v54 }
 0xc03   : > { %3811 = vperm.xlu2 %8345, %v9706_v1  }
 0xc08   : > { %8343 = vset.pattern.permute.xlu1 %v8799_v54  ;;  %3815 = vperm.xlu0 %8342, %v9510_v17  }
 0xc09   : > { %3823 = vperm.xlu1 %8343, %v9563_v6  }
 0xc0b   : > { %8346 = vset.pattern.permute.xlu2 %v8800_v36 }
 0xc0c   : > { %3758 = vperm.xlu2 %8346, %v9719_v26  }
 0xc11   : > { %8344 = vset.pattern.permute.xlu1 %v8800_v36  ;;  %6988 = vmatmul.msk.bf16.gmra.mxu1 %vm414_vm0, %v7722_v45 }
 0xc12   : > { %3766 = vperm.xlu1 %8344, %v9510_v17   ;;  %v9694_v17 = vld [vmem:[%s10277_s2] sm:$0xff] }
 0xc13   : > { %3803 = vperm.xlu0 %8342, %v9694_v17  }
 0xc1a   : > { %3754 = vperm.xlu1 %8344, %v9694_v17  }
 0xc21   : > { %6989 = vmatmul.msk.bf16.gmra.mxu1 %vm414_vm0, %v7723_v56 }
 0xc22   : > { %8347 = vset.pattern.permute.xlu1 %v8799_v54 }
 0xc23   : > { %3807 = vperm.xlu1 %8347, %v9719_v26  }
 0xc29   : > { %v8298_v23 = vpop.permute.xlu2 %8297 }
 0xc2a   : > { %v8300_v25 = vunpack.i.h.bf16 %v8298_v23  ;;  %v8299_v0 = vunpack.i.l.bf16 %v8298_v23 }
 0xc2c   : > { %v7010_v6 = vpack.c.bf16 %v8300_v25, %v8299_v0 }
 0xc31   : > { %v8323_v12 = vpop.permute.xlu2 %8322 }
 0xc32   : > { %v8325_v11 = vunpack.i.h.bf16 %v8323_v12  ;;  %v8324_v3 = vunpack.i.l.bf16 %v8323_v12 }
 0xc34   : > { %v7045_v62 = vpack.c.bf16 %v8325_v11, %v8324_v3 }
 0xc3d   : > { %v3875_v8 = vpop.f32.mrf.mxu0 }
 0xc45   : > { %v9750_v36 = vpop.f32.mrf.mxu0 }
 0xc51   : > { %v8313_v42 = vpop.permute.xlu1 %8312  ;;  %v8303_v49 = vpop.permute.xlu0 %8302 }
 0xc52   : > { %v8315_v13 = vunpack.i.h.bf16 %v8313_v42  ;;  %v8314_v50 = vunpack.i.l.bf16 %v8313_v42  ;;  %v8305_v57 = vunpack.i.h.bf16 %v8303_v49  ;;  %v8304_v58 = vunpack.i.l.bf16 %v8303_v49 }
 0xc54   : > { %v7039_v60 = vpack.c.bf16 %v8315_v13, %v8314_v50  ;;  %v7007_v4 = vpack.c.bf16 %v8305_v57, %v8304_v58  ;;  %v3880_v58 = vpop.f32.mrf.mxu0 }
 0xc56   : > { %7008 = vmatpush.bf16.msk.msrb.mxu2 %vm8978_vm4, %v7007_v4  ;;  %7040 = vmatpush.bf16.msk.msrb.mxu3 %vm8958_vm2, %v7039_v60  ;;  %v3779_v4 = vpop.permute.xlu2 %3778 }
 0xc59   : > { %v8318_v59 = vpop.permute.xlu1 %8317  ;;  %v8308_v27 = vpop.permute.xlu0 %8307 }
 0xc5a   : > { %v8320_v46 = vunpack.i.h.bf16 %v8318_v59  ;;  %v8319_v9 = vunpack.i.l.bf16 %v8318_v59  ;;  %v8310_v7 = vunpack.i.h.bf16 %v8308_v27  ;;  %v8309_v32 = vunpack.i.l.bf16 %v8308_v27  ;;  %7011 = vmatpush.bf16.msk.msrb.mxu2 %vm8978_vm4, %v7010_v6 }
 0xc5c   : > { %v7013_v44 = vpack.c.bf16 %v8320_v46, %v8319_v9  ;;  %v7042_v22 = vpack.c.bf16 %v8310_v7, %v8309_v32  ;;  %v3882_v59 = vpop.f32.mrf.mxu0 }
 0xc5e   : > { %7014 = vmatpush.bf16.msk.msrb.mxu2 %vm8978_vm4, %v7013_v44  ;;  %7043 = vmatpush.bf16.msk.msrb.mxu3 %vm8958_vm2, %v7042_v22  ;;  %v3832_v27 = vpop.permute.xlu2 %3831 }
 0xc61   : > { %v8333_v53 = vpop.permute.xlu1 %8332  ;;  %v8328_v51 = vpop.permute.xlu0 %8327 }
 0xc62   : > { %v8335_v43 = vunpack.i.h.bf16 %v8333_v53  ;;  %v8334_v21 = vunpack.i.l.bf16 %v8333_v53  ;;  %v8330_v30 = vunpack.i.h.bf16 %v8328_v51  ;;  %v8329_v47 = vunpack.i.l.bf16 %v8328_v51  ;;  %7046 = vmatpush.bf16.msk.msrb.mxu3 %vm8958_vm2, %v7045_v62 }
 0xc64   : > { %v7048_v18 = vpack.c.bf16 %v8335_v43, %v8334_v21  ;;  %v7016_v39 = vpack.c.bf16 %v8330_v30, %v8329_v47  ;;  %v3885_v32 = vpop.f32.mrf.mxu0 }
 0xc66   : > { %7017 = vmatpush.bf16.msk.msrb.mxu2 %vm8978_vm4, %v7016_v39  ;;  %7049 = vmatpush.bf16.msk.msrb.mxu3 %vm8958_vm2, %v7048_v18  ;;  %v3775_v11 = vpop.permute.xlu2 %3774 }
 0xc69   : > { %7018 = vmatmul.msk.bf16.vlgmr.msrb.gmra.mxu2 %vm414_vm0, %v7716_v10  ;;  %7050 = vmatmul.msk.bf16.vlgmr.msrb.gmra.mxu3 %vm414_vm0, %v7724_v14  ;;  %v9744_v37 = vpop.permute.xlu1 %3827  ;;  %v9746_v33 = vpop.permute.xlu0 %3782 }
 0xc6c   : > { %v3887_v62 = vpop.f32.mrf.mxu0 }
 0xc6d   : > { %v3590_v48 = vpop.f32.mrf.mxu1 }
 0xc6e   : > { %v3763_v53 = vpop.permute.xlu2 %3762 }
 0xc72   : > { %v3771_v34 = vpop.permute.xlu1 %3770  ;;  %v3820_v20 = vpop.permute.xlu0 %3819 }
 0xc73   : > { %v3886_v39 = vadd.f32 %v3885_v32, %v3820_v20 }
 0xc75   : > { %v9748_v54 = vpop.f32.mrf.mxu1 }
 0xc79   : > { %7019 = vmatmul.msk.bf16.gmra.mxu2 %vm414_vm0, %v7717_v55  ;;  %7051 = vmatmul.msk.bf16.gmra.mxu3 %vm414_vm0, %v7725_v29 }
 0xc7a   : > { %v3816_v5 = vpop.permute.xlu0 %3815 }
 0xc7b   : > { %v3824_v19 = vpop.permute.xlu1 %3823 }
 0xc7c   : > { %v3888_v16 = vadd.f32 %v3887_v62, %v3824_v19 }
 0xc7e   : > { %v3595_v57 = vpop.f32.mrf.mxu1 }
 0xc84   : > { %v3767_v61 = vpop.permute.xlu1 %3766 }
 0xc85   : > { %v3804_v41 = vpop.permute.xlu0 %3803 }
 0xc86   : > { %v3876_v49 = vadd.f32 %v3875_v8, %v3804_v41  ;;  %v3597_v28 = vpop.f32.mrf.mxu1 }
 0xc89   : > { %7020 = vmatmul.msk.bf16.gmra.mxu2 %vm414_vm0, %v7718_v31  ;;  %7052 = vmatmul.msk.bf16.gmra.mxu3 %vm414_vm0, %v7726_v35  ;;  %v3890_v35 = vpop.f32.mrf.mxu0 }
 0xc8c   : > { %v3755_v13 = vpop.permute.xlu1 %3754 }
 0xc8e   : > { %v3600_v7 = vpop.f32.mrf.mxu1 }
 0xc96   : > { %v3602_v15 = vpop.f32.mrf.mxu1 }
 0xc99   : > { %7021 = vmatmul.msk.bf16.gmra.mxu2 %vm414_vm0, %v7719_v63  ;;  %7053 = vmatmul.msk.bf16.gmra.mxu3 %vm414_vm0, %v7727_v40 }
 0xc9e   : > { %v3605_v55 = vpop.f32.mrf.mxu1 }
 0xcec   : > { %v3651_v24 = vpop.f32.mrf.mxu2  ;;  %v3725_v2 = vpop.f32.mrf.mxu3 }
 0xced   : > { %v3652_v23 = vadd.f32 %v3651_v24, %v3590_v48  ;;  %v3812_v24 = vpop.permute.xlu2 %3811 }
 0xcee   : > { %v3881_v20 = vadd.f32 %v3880_v58, %v3812_v24 }
 0xcef   : > { %v3745_v42 = vadd.f32 %v3725_v2, %v3652_v23 }
 0xcf1   : > { %v3785_v50 = vadd.f32 %v3755_v13, %v3745_v42  ;;  %v3607_v13 = vpop.f32.mrf.mxu1 }
 0xcf3   : > { %v9752_v25 = vadd.f32 %v3876_v49, %v3785_v50 }
 0xcf4   : > { %v3653_v0 = vpop.f32.mrf.mxu2  ;;  %v9754_v60 = vpop.f32.mrf.mxu3 }
 0xcfc   : > { %v3656_v6 = vpop.f32.mrf.mxu2  ;;  %v3730_v12 = vpop.f32.mrf.mxu3 }
 0xcfd   : > { %v3657_v18 = vadd.f32 %v3656_v6, %v3595_v57 }
 0xcff   : > { %v3747_v29 = vadd.f32 %v3730_v12, %v3657_v18  ;;  %v7736_v18 = vld [vmem:[#allocation3 + $0x440] sm:$0xff] }
 0xd01   : > { %v3787_v2 = vadd.f32 %v3763_v53, %v3747_v29 }
 0xd03   : > { %v9765_v42 = vadd.f32 %v3881_v20, %v3787_v2  ;;  %v8801_v2 = vmov 13  }
 0xd04   : > { %v3658_v46 = vpop.f32.mrf.mxu2  ;;  %v3732_v9 = vpop.f32.mrf.mxu3  ;;  %8390 = vset.pattern.permute.xlu0 %v8801_v2  ;;  %8389 = vset.pattern.permute.xlu2 %v8801_v2 }
 0xd05   : > { %v3659_v30 = vadd.f32 %v3658_v46, %v3597_v28  ;;  %v3892_v28 = vpop.f32.mrf.mxu0  ;;  %8388 = vset.pattern.permute.xlu1 %v8801_v2 }
 0xd07   : > { %v3748_v14 = vadd.f32 %v3732_v9, %v3659_v30  ;;  %v3654_v9 = vadd.f32 %v3653_v0, %v9748_v54 }
 0xd09   : > { %v3788_v8 = vadd.f32 %v3767_v61, %v3748_v14 }
 0xd0c   : > { %v3661_v3 = vpop.f32.mrf.mxu2  ;;  %v3735_v44 = vpop.f32.mrf.mxu3 }
 0xd0d   : > { %v3662_v22 = vadd.f32 %v3661_v3, %v3600_v7  ;;  %v3746_v3 = vadd.f32 %v9754_v60, %v3654_v9 }
 0xd0f   : > { %v3749_v51 = vadd.f32 %v3735_v44, %v3662_v22  ;;  %v3759_v44 = vpop.permute.xlu2 %3758 }
 0xd11   : > { %v3789_v45 = vadd.f32 %v3771_v34, %v3749_v51  ;;  %v3883_v34 = vadd.f32 %v3882_v59, %v3816_v5  ;;  %v3891_v5 = vadd.f32 %v3890_v35, %v9744_v37  ;;  %v3893_v59 = vadd.f32 %v3892_v28, %v3832_v27  ;;  %v3808_v37 = vpop.permute.xlu1 %3807  ;;  %v9824_v28 = vld [vmem:[%s10277_s2 + $0x30] sm:$0xff] }
 0xd12   : > { %v3878_v0 = vadd.f32 %v9750_v36, %v3808_v37  ;;  %v7739_v37 = vld [vmem:[#allocation3 + $0x458] sm:$0xff] }
 0xd13   : > { %v9756_v31 = vadd.f32 %v3886_v39, %v3789_v45  ;;  %v9763_v19 = vadd.f32 %v3883_v34, %v3788_v8 }
 0xd14   : > { %v3663_v43 = vpop.f32.mrf.mxu2  ;;  %v3737_v21 = vpop.f32.mrf.mxu3 }
 0xd15   : > { %v3664_v47 = vadd.f32 %v3663_v43, %v3602_v15  ;;  %v8373_v61 = vpack.i.bf16 %v9763_v19, %v9765_v42  ;;  %v3974_v22 = vpack.c.bf16 %v9763_v19, %v9765_v42 }
 0xd17   : > { %v3750_v10 = vadd.f32 %v3737_v21, %v3664_v47 }
 0xd19   : > { %v3790_v56 = vadd.f32 %v3775_v11, %v3750_v10 }
 0xd1b   : > { %v9758_v63 = vadd.f32 %v3888_v16, %v3790_v56  ;;  %v7737_v16 = vld [vmem:[#allocation3 + $0x448] sm:$0xff] }
 0xd1c   : > { %v3666_v40 = vpop.f32.mrf.mxu2  ;;  %v3740_v48 = vpop.f32.mrf.mxu3 }
 0xd1d   : > { %v8348_v41 = vpack.i.bf16 %v9758_v63, %v9756_v31  ;;  %v3667_v23 = vadd.f32 %v3666_v40, %v3605_v55  ;;  %v3975_v54 = vpack.c.bf16 %v9758_v63, %v9756_v31 }
 0xd1f   : > { %8349 = vrot.lane.b32.xlu1 %v8348_v41, %s8787_s11  ;;  %v3751_v49 = vadd.f32 %v3740_v48, %v3667_v23  ;;  %v9812_v23 = vld [vmem:[%s10277_s2 + $0x20] sm:$0xff] }
 0xd21   : > { %v3791_v12 = vadd.f32 %v3779_v4, %v3751_v49 }
 0xd23   : > { %v9773_v7 = vadd.f32 %v3891_v5, %v3791_v12 }
 0xd24   : > { %v3668_v50 = vpop.f32.mrf.mxu2  ;;  %v3742_v6 = vpop.f32.mrf.mxu3 }
 0xd25   : > { %v3669_v57 = vadd.f32 %v3668_v50, %v3607_v13 }
 0xd27   : > { %v3752_v58 = vadd.f32 %v3742_v6, %v3669_v57  ;;  %8374 = vrot.lane.b32.xlu1 %v8373_v61, %s8786_s28 }
 0xd29   : > { %v3792_v46 = vadd.f32 %v9746_v33, %v3752_v58  ;;  %v3786_v33 = vadd.f32 %v3759_v44, %v3746_v3  ;;  %v7732_v58 = vld [vmem:[#allocation3 + $0x420] sm:$0xff]  ;;  %v9850_v3 = vld [vmem:[%s10277_s2 + $0x18] sm:$0xff]  ;;  %v7733_v44 = vld [vmem:[#allocation3 + $0x428] sm:$0xff] }
 0xd2b   : > { %v9775_v32 = vadd.f32 %v3893_v59, %v3792_v46  ;;  %v9787_v27 = vadd.f32 %v3878_v0, %v3786_v33  ;;  %v7738_v46 = vld [vmem:[#allocation3 + $0x450] sm:$0xff]  ;;  %v7741_v33 = vld [vmem:[#allocation3 + $0x468] sm:$0xff] }
 0xd2c   : > { %v7742_v0 = vld [vmem:[#allocation3 + $0x470] sm:$0xff] }
 0xd2d   : > { %v8363_v11 = vpack.i.bf16 %v9775_v32, %v9773_v7  ;;  %v3976_v4 = vpack.c.bf16 %v9775_v32, %v9773_v7  ;;  %v3973_v60 = vpack.c.bf16 %v9787_v27, %v9752_v25  ;;  %v8383_v15 = vpack.i.bf16 %v9787_v27, %v9752_v25 }
 0xd2f   : > { %8364 = vrot.lane.b32.xlu0 %v8363_v11, %s8786_s28  ;;  %8354 = vrot.lane.b32.xlu2 %v8363_v11, %s8787_s11  ;;  %v7740_v11 = vld [vmem:[#allocation3 + $0x460] sm:$0xff] }
 0xd30   : > { %4013 = vmatpush.bf16.msra.mxu1 %v3976_v4  ;;  %4206 = vperm.xlu1 %8388, %v9824_v28   ;;  %v9839_v4 = vld [vmem:[%s10277_s2 + $0x28] sm:$0xff] }
 0xd34   : > { %4014 = vmatpush.bf16.msra.mxu1 %v3975_v54  ;;  %v7734_v54 = vld [vmem:[#allocation3 + $0x430] sm:$0xff] }
 0xd37   : > { %8369 = vrot.lane.b32.xlu0 %v8373_v61, %s8787_s11  ;;  %8359 = vrot.lane.b32.xlu2 %v8348_v41, %s8786_s28  ;;  %v9818_v61 = vld [vmem:[%s10277_s2 + $0x38] sm:$0xff] }
 0xd38   : > { %4015 = vmatpush.bf16.msra.mxu1 %v3974_v22  ;;  %4202 = vperm.xlu1 %8388, %v9839_v4   ;;  %v7735_v22 = vld [vmem:[#allocation3 + $0x438] sm:$0xff] }
 0xd3c   : > { %4016 = vmatpush.bf16.msra.mxu1 %v3973_v60  ;;  %v7743_v60 = vld [vmem:[#allocation3 + $0x478] sm:$0xff] }
 0xd3f   : > { %8384 = vrot.lane.b32.xlu0 %v8383_v15, %s8786_s28  ;;  %8379 = vrot.lane.b32.xlu2 %v8383_v15, %s8787_s11 }
 0xd40   : > { %7090 = vmatmul.msk.bf16.vlgmr.msra.gmra.mxu1 %vm414_vm0, %v7736_v18  ;;  %4194 = vperm.xlu1 %8388, %v9850_v3  }
 0xd47   : > { %4198 = vperm.xlu0 %8390, %v9812_v23   ;;  %4210 = vperm.xlu2 %8389, %v9818_v61  }
 0xd4f   : > { %4186 = vperm.xlu0 %8390, %v9719_v26   ;;  %4190 = vperm.xlu2 %8389, %v9706_v1  }
 0xd50   : > { %7091 = vmatmul.msk.bf16.gmra.mxu1 %vm414_vm0, %v7737_v16 }
 0xd57   : > { %4182 = vperm.xlu2 %8389, %v9694_v17  }
 0xd60   : > { %7092 = vmatmul.msk.bf16.gmra.mxu1 %vm414_vm0, %v7738_v46 }
 0xd70   : > { %7093 = vmatmul.msk.bf16.gmra.mxu1 %vm414_vm0, %v7739_v37 }
 0xd89   : > { %v8355_v36 = vpop.permute.xlu2 %8354 }
 0xd8a   : > { %v8357_v62 = vunpack.i.h.bf16 %v8355_v36  ;;  %v8356_v53 = vunpack.i.l.bf16 %v8355_v36 }
 0xd8c   : > { %v7111_v51 = vpack.c.bf16 %v8357_v62, %v8356_v53 }
 0xd8e   : > { %7112 = vmatpush.bf16.msk.msra.mxu2 %vm8978_vm4, %v7111_v51 }
 0xd91   : > { %v8350_v43 = vpop.permute.xlu1 %8349  ;;  %v8360_v39 = vpop.permute.xlu2 %8359 }
 0xd92   : > { %v8352_v21 = vunpack.i.h.bf16 %v8350_v43  ;;  %v8351_v30 = vunpack.i.l.bf16 %v8350_v43  ;;  %v8362_v56 = vunpack.i.h.bf16 %v8360_v39  ;;  %v8361_v55 = vunpack.i.l.bf16 %v8360_v39 }
 0xd94   : > { %v7114_v47 = vpack.c.bf16 %v8352_v21, %v8351_v30  ;;  %v7146_v40 = vpack.c.bf16 %v8362_v56, %v8361_v55 }
 0xd96   : > { %7115 = vmatpush.bf16.msk.msra.mxu2 %vm8978_vm4, %v7114_v47 }
 0xd99   : > { %v8375_v35 = vpop.permute.xlu1 %8374  ;;  %v8380_v41 = vpop.permute.xlu2 %8379 }
 0xd9a   : > { %v8377_v48 = vunpack.i.h.bf16 %v8375_v35  ;;  %v8376_v8 = vunpack.i.l.bf16 %v8375_v35  ;;  %v8382_v13 = vunpack.i.h.bf16 %v8380_v41  ;;  %v8381_v50 = vunpack.i.l.bf16 %v8380_v41 }
 0xd9c   : > { %v7149_v49 = vpack.c.bf16 %v8377_v48, %v8376_v8  ;;  %v7120_v6 = vpack.c.bf16 %v8382_v13, %v8381_v50 }
 0xda1   : > { %v8365_v45 = vpop.permute.xlu0 %8364 }
 0xda2   : > { %v8367_v10 = vunpack.i.h.bf16 %v8365_v45  ;;  %v8366_v14 = vunpack.i.l.bf16 %v8365_v45 }
 0xda4   : > { %v7143_v29 = vpack.c.bf16 %v8367_v10, %v8366_v14  ;;  %v4207_v14 = vpop.permute.xlu1 %4206 }
 0xda6   : > { %7144 = vmatpush.bf16.msk.msra.mxu3 %vm8958_vm2, %v7143_v29 }
 0xda9   : > { %v8370_v24 = vpop.permute.xlu0 %8369 }
 0xdaa   : > { %v8372_v20 = vunpack.i.h.bf16 %v8370_v24  ;;  %v8371_v34 = vunpack.i.l.bf16 %v8370_v24  ;;  %7147 = vmatpush.bf16.msk.msra.mxu3 %vm8958_vm2, %v7146_v40  ;;  %v4211_v24 = vpop.permute.xlu2 %4210 }
 0xdac   : > { %v7117_v57 = vpack.c.bf16 %v8372_v20, %v8371_v34  ;;  %v4203_v35 = vpop.permute.xlu1 %4202 }
 0xdae   : > { %7118 = vmatpush.bf16.msk.msra.mxu2 %vm8978_vm4, %v7117_v57  ;;  %7150 = vmatpush.bf16.msk.msra.mxu3 %vm8958_vm2, %v7149_v49 }
 0xdb1   : > { %v8385_v12 = vpop.permute.xlu0 %8384 }
 0xdb2   : > { %v8387_v5 = vunpack.i.h.bf16 %v8385_v12  ;;  %v8386_v59 = vunpack.i.l.bf16 %v8385_v12  ;;  %7121 = vmatpush.bf16.msk.msra.mxu2 %vm8978_vm4, %v7120_v6 }
 0xdb4   : > { %v7152_v9 = vpack.c.bf16 %v8387_v5, %v8386_v59  ;;  %v4195_v12 = vpop.permute.xlu1 %4194 }
 0xdb5   : > { %7122 = vmatmul.msk.bf16.vlgmr.msra.gmra.mxu2 %vm414_vm0, %v7732_v58 }
 0xdb6   : > { %7153 = vmatpush.bf16.msk.msra.mxu3 %vm8958_vm2, %v7152_v9 }
 0xdb9   : > { %7154 = vmatmul.msk.bf16.vlgmr.msra.gmra.mxu3 %vm414_vm0, %v7740_v11  ;;  %v4199_v34 = vpop.permute.xlu0 %4198 }
 0xdbd   : > { %v4018_v15 = vpop.f32.mrf.mxu1 }
 0xdc5   : > { %7123 = vmatmul.msk.bf16.gmra.mxu2 %vm414_vm0, %v7733_v44  ;;  %v4020_v36 = vpop.f32.mrf.mxu1 }
 0xdc9   : > { %7155 = vmatmul.msk.bf16.gmra.mxu3 %vm414_vm0, %v7741_v33  ;;  %v4191_v33 = vpop.permute.xlu2 %4190 }
 0xdcd   : > { %v4023_v30 = vpop.f32.mrf.mxu1 }
 0xdd5   : > { %7124 = vmatmul.msk.bf16.gmra.mxu2 %vm414_vm0, %v7734_v54  ;;  %v4025_v39 = vpop.f32.mrf.mxu1 }
 0xdd9   : > { %7156 = vmatmul.msk.bf16.gmra.mxu3 %vm414_vm0, %v7742_v0 }
 0xddd   : > { %v4028_v16 = vpop.f32.mrf.mxu1 }
 0xde5   : > { %7125 = vmatmul.msk.bf16.gmra.mxu2 %vm414_vm0, %v7735_v22  ;;  %v4030_v48 = vpop.f32.mrf.mxu1 }
 0xde9   : > { %7157 = vmatmul.msk.bf16.gmra.mxu3 %vm414_vm0, %v7743_v60 }
 0xded   : > { %v4033_v5 = vpop.f32.mrf.mxu1 }
 0xe38   : > { %v4079_v62 = vpop.f32.mrf.mxu2 }
 0xe39   : > { %v4080_v53 = vadd.f32 %v4079_v62, %v4018_v15 }
 0xe3c   : > { %v4153_v51 = vpop.f32.mrf.mxu3 }
 0xe3d   : > { %v9860_v43 = vadd.f32 %v4153_v51, %v4080_v53  ;;  %v4035_v51 = vpop.f32.mrf.mxu1 }
 0xe40   : > { %v4081_v21 = vpop.f32.mrf.mxu2 }
 0xe44   : > { %v4155_v47 = vpop.f32.mrf.mxu3 }
 0xe48   : > { %v4084_v18 = vpop.f32.mrf.mxu2 }
 0xe49   : > { %v4085_v49 = vadd.f32 %v4084_v18, %v4023_v30 }
 0xe4c   : > { %v4158_v45 = vpop.f32.mrf.mxu3 }
 0xe4d   : > { %v4175_v46 = vadd.f32 %v4158_v45, %v4085_v49 }
 0xe4f   : > { %v4215_v0 = vadd.f32 %v4191_v33, %v4175_v46  ;;  %v7749_v46 = vld [vmem:[#allocation3 + $0x4a8] sm:$0xff] }
 0xe50   : > { %v4086_v10 = vpop.f32.mrf.mxu2 }
 0xe51   : > { %v4087_v13 = vadd.f32 %v4086_v10, %v4025_v39  ;;  %v4223_v62 = vmax.f32 %v4215_v0, 0.0 }
 0xe54   : > { %v4160_v56 = vpop.f32.mrf.mxu3 }
 0xe55   : > { %v4176_v6 = vadd.f32 %v4160_v56, %v4087_v13 }
 0xe57   : > { %v4216_v44 = vadd.f32 %v4195_v12, %v4176_v6  ;;  %v8802_v6 = vmov 14  }
 0xe58   : > { %v4089_v55 = vpop.f32.mrf.mxu2  ;;  %8432 = vset.pattern.permute.xlu1 %v8802_v6  ;;  %8431 = vset.pattern.permute.xlu0 %v8802_v6 }
 0xe59   : > { %v4090_v40 = vadd.f32 %v4089_v55, %v4028_v16  ;;  %v4224_v60 = vmax.f32 %v4216_v44, 0.0  ;;  %8433 = vset.pattern.permute.xlu2 %v8802_v6 }
 0xe5b   : > { %v8416_v30 = vpack.i.bf16 %v4224_v60, %v4223_v62 }
 0xe5c   : > { %v4163_v29 = vpop.f32.mrf.mxu3 }
 0xe5d   : > { %v4177_v41 = vadd.f32 %v4163_v29, %v4090_v40  ;;  %v4082_v29 = vadd.f32 %v4081_v21, %v4020_v36 }
 0xe5f   : > { %v4217_v50 = vadd.f32 %v4199_v34, %v4177_v41  ;;  %v4183_v41 = vpop.permute.xlu2 %4182 }
 0xe60   : > { %v4091_v8 = vpop.f32.mrf.mxu2 }
 0xe61   : > { %v4092_v20 = vadd.f32 %v4091_v8, %v4030_v48  ;;  %v4225_v9 = vmax.f32 %v4217_v50, 0.0  ;;  %v4174_v48 = vadd.f32 %v4155_v47, %v4082_v29  ;;  %v4187_v8 = vpop.permute.xlu0 %4186 }
 0xe64   : > { %v4165_v2 = vpop.f32.mrf.mxu3 }
 0xe65   : > { %v4178_v57 = vadd.f32 %v4165_v2, %v4092_v20  ;;  %v4214_v20 = vadd.f32 %v4187_v8, %v4174_v48  ;;  %v7751_v48 = vld [vmem:[#allocation3 + $0x4b8] sm:$0xff]  ;;  %v7745_v8 = vld [vmem:[#allocation3 + $0x488] sm:$0xff] }
 0xe67   : > { %v4218_v58 = vadd.f32 %v4203_v35, %v4178_v57  ;;  %v4222_v2 = vmax.f32 %v4214_v20, 0.0  ;;  %v7748_v57 = vld [vmem:[#allocation3 + $0x4a0] sm:$0xff]  ;;  %v7746_v20 = vld [vmem:[#allocation3 + $0x490] sm:$0xff] }
 0xe68   : > { %v4094_v59 = vpop.f32.mrf.mxu2 }
 0xe69   : > { %v4226_v11 = vmax.f32 %v4218_v58, 0.0  ;;  %v4095_v22 = vadd.f32 %v4094_v59, %v4033_v5 }
 0xe6b   : > { %v8391_v37 = vpack.i.bf16 %v4226_v11, %v4225_v9  ;;  %v4301_v34 = vpack.c.bf16 %v4226_v11, %v4225_v9 }
 0xe6c   : > { %v4168_v54 = vpop.f32.mrf.mxu3 }
 0xe6d   : > { %8392 = vrot.lane.b32.xlu0 %v8391_v37, %s8786_s28  ;;  %v4179_v53 = vadd.f32 %v4168_v54, %v4095_v22 }
 0xe6f   : > { %v4219_v10 = vadd.f32 %v4207_v14, %v4179_v53  ;;  %v4213_v14 = vadd.f32 %v4183_v41, %v9860_v43  ;;  %v7753_v41 = vld [vmem:[#allocation3 + $0x4c8] sm:$0xff] }
 0xe70   : > { %v4096_v15 = vpop.f32.mrf.mxu2 }
 0xe71   : > { %v4097_v18 = vadd.f32 %v4096_v15, %v4035_v51  ;;  %v4227_v56 = vmax.f32 %v4219_v10, 0.0  ;;  %v4221_v36 = vmax.f32 %v4213_v14, 0.0  ;;  %v7747_v14 = vld [vmem:[#allocation3 + $0x498] sm:$0xff] }
 0xe73   : > { %v4299_v21 = vpack.c.bf16 %v4222_v2, %v4221_v36  ;;  %v8426_v47 = vpack.i.bf16 %v4222_v2, %v4221_v36  ;;  %v7755_v2 = vld [vmem:[#allocation3 + $0x4d8] sm:$0xff] }
 0xe74   : > { %v4170_v39 = vpop.f32.mrf.mxu3 }
 0xe75   : > { %v4180_v45 = vadd.f32 %v4170_v39, %v4097_v18  ;;  %8417 = vrot.lane.b32.xlu0 %v8416_v30, %s8787_s11 }
 0xe77   : > { %v4220_v16 = vadd.f32 %v4211_v24, %v4180_v45  ;;  %v4300_v24 = vpack.c.bf16 %v4224_v60, %v4223_v62 }
 0xe79   : > { %v4228_v55 = vmax.f32 %v4220_v16, 0.0 }
 0xe7b   : > { %v8406_v35 = vpack.i.bf16 %v4228_v55, %v4227_v56  ;;  %v4302_v40 = vpack.c.bf16 %v4228_v55, %v4227_v56 }
 0xe7d   : > { %8407 = vrot.lane.b32.xlu2 %v8406_v35, %s8787_s11  ;;  %8397 = vrot.lane.b32.xlu1 %v8406_v35, %s8786_s28 }
 0xe7e   : > { %4339 = vmatpush.bf16.msrb.mxu0 %v4302_v40  ;;  %4532 = vperm.xlu0 %8431, %v9824_v28   ;;  %v7752_v40 = vld [vmem:[#allocation3 + $0x4c0] sm:$0xff] }
 0xe82   : > { %4340 = vmatpush.bf16.msrb.mxu0 %v4301_v34  ;;  %v7754_v34 = vld [vmem:[#allocation3 + $0x4d0] sm:$0xff] }
 0xe85   : > { %8412 = vrot.lane.b32.xlu2 %v8416_v30, %s8786_s28  ;;  %8402 = vrot.lane.b32.xlu1 %v8391_v37, %s8787_s11 }
 0xe86   : > { %4341 = vmatpush.bf16.msrb.mxu0 %v4300_v24  ;;  %4520 = vperm.xlu0 %8431, %v9850_v3  }
 0xe8a   : > { %4342 = vmatpush.bf16.msrb.mxu0 %v4299_v21 }
 0xe8d   : > { %8427 = vrot.lane.b32.xlu2 %v8426_v47, %s8787_s11  ;;  %8422 = vrot.lane.b32.xlu1 %v8426_v47, %s8786_s28 }
 0xe8e   : > { %7174 = vmatmul.msk.bf16.vlgmr.msrb.gmra.mxu0 %vm414_vm0, %v7748_v57 }
 0xe95   : > { %4536 = vperm.xlu1 %8432, %v9818_v61   ;;  %4524 = vperm.xlu2 %8433, %v9812_v23  }
 0xe9d   : > { %4528 = vperm.xlu1 %8432, %v9839_v4   ;;  %4516 = vperm.xlu2 %8433, %v9706_v1  }
 0xe9e   : > { %7175 = vmatmul.msk.bf16.gmra.mxu0 %vm414_vm0, %v7749_v46 }
 0xea5   : > { %4508 = vperm.xlu1 %8432, %v9694_v17   ;;  %4512 = vperm.xlu2 %8433, %v9719_v26   ;;  %v7750_v17 = vld [vmem:[#allocation3 + $0x4b0] sm:$0xff]  ;;  %v7744_v26 = vld [vmem:[#allocation3 + $0x480] sm:$0xff] }
 0xeae   : > { %7176 = vmatmul.msk.bf16.gmra.mxu0 %vm414_vm0, %v7750_v17 }
 0xebe   : > { %7177 = vmatmul.msk.bf16.gmra.mxu0 %vm414_vm0, %v7751_v48 }
 0xed7   : > { %v8408_v49 = vpop.permute.xlu2 %8407 }
 0xed8   : > { %v8410_v13 = vunpack.i.h.bf16 %v8408_v49  ;;  %v8409_v50 = vunpack.i.l.bf16 %v8408_v49 }
 0xeda   : > { %v7195_v43 = vpack.c.bf16 %v8410_v13, %v8409_v50 }
 0xedc   : > { %7196 = vmatpush.bf16.msk.msrb.mxu1 %vm8978_vm4, %v7195_v43 }
 0xedf   : > { %v8393_v12 = vpop.permute.xlu0 %8392  ;;  %v8413_v9 = vpop.permute.xlu2 %8412 }
 0xee0   : > { %v8395_v11 = vunpack.i.h.bf16 %v8393_v12  ;;  %v8394_v44 = vunpack.i.l.bf16 %v8393_v12  ;;  %v8415_v54 = vunpack.i.h.bf16 %v8413_v9  ;;  %v8414_v0 = vunpack.i.l.bf16 %v8413_v9 }
 0xee2   : > { %v7230_v33 = vpack.c.bf16 %v8395_v11, %v8394_v44  ;;  %v7233_v53 = vpack.c.bf16 %v8415_v54, %v8414_v0 }
 0xee7   : > { %v8418_v22 = vpop.permute.xlu0 %8417  ;;  %v8428_v18 = vpop.permute.xlu2 %8427 }
 0xee8   : > { %v8420_v51 = vunpack.i.h.bf16 %v8418_v22  ;;  %v8419_v1 = vunpack.i.l.bf16 %v8418_v22  ;;  %v8430_v10 = vunpack.i.h.bf16 %v8428_v18  ;;  %v8429_v45 = vunpack.i.l.bf16 %v8428_v18 }
 0xeea   : > { %v7201_v39 = vpack.c.bf16 %v8420_v51, %v8419_v1  ;;  %v7204_v29 = vpack.c.bf16 %v8430_v10, %v8429_v45 }
 0xeef   : > { %v8398_v58 = vpop.permute.xlu1 %8397 }
 0xef0   : > { %v8400_v5 = vunpack.i.h.bf16 %v8398_v58  ;;  %v8399_v59 = vunpack.i.l.bf16 %v8398_v58 }
 0xef2   : > { %v7227_v37 = vpack.c.bf16 %v8400_v5, %v8399_v59 }
 0xef4   : > { %7228 = vmatpush.bf16.msk.msrb.mxu2 %vm8958_vm2, %v7227_v37  ;;  %v4533_v37 = vpop.permute.xlu0 %4532 }
 0xef7   : > { %v8403_v60 = vpop.permute.xlu1 %8402 }
 0xef8   : > { %v8405_v15 = vunpack.i.h.bf16 %v8403_v60  ;;  %v8404_v62 = vunpack.i.l.bf16 %v8403_v60  ;;  %7231 = vmatpush.bf16.msk.msrb.mxu2 %vm8958_vm2, %v7230_v33  ;;  %v4525_v60 = vpop.permute.xlu2 %4524 }
 0xefa   : > { %v7198_v30 = vpack.c.bf16 %v8405_v15, %v8404_v62 }
 0xefc   : > { %7199 = vmatpush.bf16.msk.msrb.mxu1 %vm8978_vm4, %v7198_v30  ;;  %7234 = vmatpush.bf16.msk.msrb.mxu2 %vm8958_vm2, %v7233_v53 }
 0xeff   : > { %v8423_v16 = vpop.permute.xlu1 %8422 }
 0xf00   : > { %v8425_v56 = vunpack.i.h.bf16 %v8423_v16  ;;  %v8424_v55 = vunpack.i.l.bf16 %v8423_v16  ;;  %7202 = vmatpush.bf16.msk.msrb.mxu1 %vm8978_vm4, %v7201_v39  ;;  %v4521_v16 = vpop.permute.xlu0 %4520 }
 0xf02   : > { %v7236_v35 = vpack.c.bf16 %v8425_v56, %v8424_v55 }
 0xf04   : > { %7205 = vmatpush.bf16.msk.msrb.mxu1 %vm8978_vm4, %v7204_v29  ;;  %7237 = vmatpush.bf16.msk.msrb.mxu2 %vm8958_vm2, %v7236_v35 }
 0xf07   : > { %7206 = vmatmul.msk.bf16.vlgmr.msrb.gmra.mxu1 %vm414_vm0, %v7744_v26  ;;  %7238 = vmatmul.msk.bf16.vlgmr.msrb.gmra.mxu2 %vm414_vm0, %v7752_v40  ;;  %v4537_v11 = vpop.permute.xlu1 %4536  ;;  %v4517_v40 = vpop.permute.xlu2 %4516 }
 0xf0b   : > { %v4344_v24 = vpop.f32.mrf.mxu0 }
 0xf0f   : > { %v4529_v18 = vpop.permute.xlu1 %4528 }
 0xf13   : > { %v4346_v21 = vpop.f32.mrf.mxu0 }
 0xf17   : > { %7207 = vmatmul.msk.bf16.gmra.mxu1 %vm414_vm0, %v7745_v8  ;;  %7239 = vmatmul.msk.bf16.gmra.mxu2 %vm414_vm0, %v7753_v41 }
 0xf1b   : > { %v4349_v43 = vpop.f32.mrf.mxu0 }
 0xf23   : > { %v4351_v12 = vpop.f32.mrf.mxu0 }
 0xf27   : > { %7208 = vmatmul.msk.bf16.gmra.mxu1 %vm414_vm0, %v7746_v20  ;;  %7240 = vmatmul.msk.bf16.gmra.mxu2 %vm414_vm0, %v7754_v34 }
 0xf2b   : > { %v4354_v59 = vpop.f32.mrf.mxu0 }
 0xf33   : > { %v4356_v54 = vpop.f32.mrf.mxu0 }
 0xf37   : > { %7209 = vmatmul.msk.bf16.gmra.mxu1 %vm414_vm0, %v7747_v14  ;;  %7241 = vmatmul.msk.bf16.gmra.mxu2 %vm414_vm0, %v7755_v2 }
 0xf3b   : > { %v4359_v56 = vpop.f32.mrf.mxu0 }
 0xf84   : > { %v4405_v36 = vpop.f32.mrf.mxu1 }
 0xf85   : > { %v4406_v47 = vadd.f32 %v4405_v36, %v4344_v24  ;;  %v4361_v24 = vpop.f32.mrf.mxu0 }
 0xf8a   : > { %v4479_v49 = vpop.f32.mrf.mxu2 }
 0xf8b   : > { %v9907_v13 = vadd.f32 %v4479_v49, %v4406_v47 }
 0xf8c   : > { %v4407_v50 = vpop.f32.mrf.mxu1 }
 0xf92   : > { %v4481_v57 = vpop.f32.mrf.mxu2 }
 0xf94   : > { %v4410_v6 = vpop.f32.mrf.mxu1 }
 0xf95   : > { %v4411_v53 = vadd.f32 %v4410_v6, %v4349_v43 }
 0xf9a   : > { %v4484_v58 = vpop.f32.mrf.mxu2 }
 0xf9b   : > { %v4501_v55 = vadd.f32 %v4484_v58, %v4411_v53  ;;  %v4408_v58 = vadd.f32 %v4407_v50, %v4346_v21 }
 0xf9c   : > { %v4412_v5 = vpop.f32.mrf.mxu1 }
 0xf9d   : > { %v4413_v51 = vadd.f32 %v4412_v5, %v4351_v12  ;;  %v4541_v8 = vadd.f32 %v4517_v40, %v4501_v55 }
 0xf9f   : > { %v4549_v14 = vadd.f32 %v4541_v8, %v9765_v42  ;;  %v4513_v42 = vpop.permute.xlu2 %4512 }
 0xfa2   : > { %v4486_v46 = vpop.f32.mrf.mxu2 }
 0xfa3   : > { %v4502_v10 = vadd.f32 %v4486_v46, %v4413_v51  ;;  %v4509_v46 = vpop.permute.xlu1 %4508 }
 0xfa4   : > { %v4415_v9 = vpop.f32.mrf.mxu1 }
 0xfa5   : > { %v4416_v33 = vadd.f32 %v4415_v9, %v4354_v59  ;;  %v4542_v35 = vadd.f32 %v4521_v16, %v4502_v10  ;;  %v4500_v59 = vadd.f32 %v4481_v57, %v4408_v58  ;;  %v7765_v58 = vld [vmem:[#allocation3 + $0x528] sm:$0xff] }
 0xfa7   : > { %v4550_v20 = vadd.f32 %v4542_v35, %v9763_v19  ;;  %v4540_v9 = vadd.f32 %v4513_v42, %v4500_v59  ;;  %v7759_v59 = vld [vmem:[#allocation3 + $0x4f8] sm:$0xff] }
 0xfa8   : > { %v7767_v42 = vld [vmem:[#allocation3 + $0x538] sm:$0xff] }
 0xfa9   : > { %v8459_v36 = vpack.i.bf16 %v4550_v20, %v4549_v14  ;;  %v9927_v21 = vpack.c.bf16 %v4550_v20, %v4549_v14 }
 0xfaa   : > { %v4489_v44 = vpop.f32.mrf.mxu2 }
 0xfab   : > { %v4503_v22 = vadd.f32 %v4489_v44, %v4416_v33 }
 0xfac   : > { %v4417_v0 = vpop.f32.mrf.mxu1 }
 0xfad   : > { %v4418_v15 = vadd.f32 %v4417_v0, %v4356_v54  ;;  %v4543_v1 = vadd.f32 %v4525_v60, %v4503_v22 }
 0xfaf   : > { %v4551_v17 = vadd.f32 %v4543_v1, %v9756_v31 }
 0xfb2   : > { %v4491_v62 = vpop.f32.mrf.mxu2 }
 0xfb3   : > { %v4504_v30 = vadd.f32 %v4491_v62, %v4418_v15 }
 0xfb4   : > { %v4420_v39 = vpop.f32.mrf.mxu1 }
 0xfb5   : > { %v4544_v45 = vadd.f32 %v4529_v18, %v4504_v30  ;;  %v4421_v41 = vadd.f32 %v4420_v39, %v4359_v56  ;;  %v9946_v30 = vld [vmem:[%s10277_s2] sm:$0xff]  ;;  %v9956_v18 = vld [vmem:[%s10277_s2 + $0x10] sm:$0xff] }
 0xfb6   : > { %v7762_v56 = vld [vmem:[#allocation3 + $0x510] sm:$0xff] }
 0xfb7   : > { %v4552_v29 = vadd.f32 %v4544_v45, %v9758_v63 }
 0xfb9   : > { %v8434_v26 = vpack.i.bf16 %v4552_v29, %v4551_v17  ;;  %v9922_v44 = vpack.c.bf16 %v4552_v29, %v4551_v17 }
 0xfba   : > { %v4494_v48 = vpop.f32.mrf.mxu2 }
 0xfbb   : > { %8435 = vrot.lane.b32.xlu2 %v8434_v26, %s8787_s11  ;;  %v4505_v2 = vadd.f32 %v4494_v48, %v4421_v41  ;;  %v9970_v41 = vld [vmem:[%s10277_s2 + $0x8] sm:$0xff] }
 0xfbc   : > { %v4422_v34 = vpop.f32.mrf.mxu1 }
 0xfbd   : > { %v4423_v47 = vadd.f32 %v4422_v34, %v4361_v24  ;;  %v4545_v49 = vadd.f32 %v4533_v37, %v4505_v2  ;;  %v8803_v37 = vmov 15  }
 0xfbe   : > { %8475 = vset.pattern.permute.xlu0 %v8803_v37  ;;  %8476 = vset.pattern.permute.xlu1 %v8803_v37 }
 0xfbf   : > { %v4553_v6 = vadd.f32 %v4545_v49, %v9773_v7  ;;  %v4539_v7 = vadd.f32 %v4509_v46, %v9907_v13  ;;  %v7761_v13 = vld [vmem:[#allocation3 + $0x508] sm:$0xff]  ;;  %8474 = vset.pattern.permute.xlu2 %v8803_v37 }
 0xfc1   : > { %v4547_v50 = vadd.f32 %v4539_v7, %v9752_v25 }
 0xfc2   : > { %v4496_v31 = vpop.f32.mrf.mxu2 }
 0xfc3   : > { %v4506_v63 = vadd.f32 %v4496_v31, %v4423_v47  ;;  %8460 = vrot.lane.b32.xlu2 %v8459_v36, %s8786_s28 }
 0xfc5   : > { %v4546_v43 = vadd.f32 %v4537_v11, %v4506_v63  ;;  %v7756_v63 = vld [vmem:[#allocation3 + $0x4e0] sm:$0xff] }
 0xfc7   : > { %v4554_v12 = vadd.f32 %v4546_v43, %v9775_v32  ;;  %v4548_v32 = vadd.f32 %v4540_v9, %v9787_v27  ;;  %v7760_v27 = vld [vmem:[#allocation3 + $0x500] sm:$0xff] }
 0xfc8   : > { %v7764_v43 = vld [vmem:[#allocation3 + $0x520] sm:$0xff] }
 0xfc9   : > { %v8449_v5 = vpack.i.bf16 %v4554_v12, %v4553_v6  ;;  %v9917_v19 = vpack.c.bf16 %v4554_v12, %v4553_v6  ;;  %v9933_v57 = vpack.c.bf16 %v4548_v32, %v4547_v50  ;;  %v8469_v11 = vpack.i.bf16 %v4548_v32, %v4547_v50  ;;  %v7763_v6 = vld [vmem:[#allocation3 + $0x518] sm:$0xff]  ;;  %v7757_v12 = vld [vmem:[#allocation3 + $0x4e8] sm:$0xff] }
 0xfcb   : > { %8450 = vrot.lane.b32.xlu1 %v8449_v5, %s8786_s28  ;;  %8440 = vrot.lane.b32.xlu0 %v8449_v5, %s8787_s11  ;;  %v7758_v5 = vld [vmem:[#allocation3 + $0x4f0] sm:$0xff] }
 0xfcc   : > { %4665 = vmatpush.bf16.msrb.mxu3 %v9917_v19  ;;  %4858 = vperm.xlu2 %8474, %v9824_v28  }
 0xfd0   : > { %4666 = vmatpush.bf16.msrb.mxu3 %v9922_v44 }
 0xfd3   : > { %8455 = vrot.lane.b32.xlu1 %v8459_v36, %s8787_s11  ;;  %8445 = vrot.lane.b32.xlu0 %v8434_v26, %s8786_s28 }
 0xfd4   : > { %4667 = vmatpush.bf16.msrb.mxu3 %v9927_v21  ;;  %4854 = vperm.xlu2 %8474, %v9839_v4  }
 0xfd8   : > { %4668 = vmatpush.bf16.msrb.mxu3 %v9933_v57 }
 0xfdb   : > { %8470 = vrot.lane.b32.xlu1 %v8469_v11, %s8786_s28  ;;  %8465 = vrot.lane.b32.xlu0 %v8469_v11, %s8787_s11 }
 0xfdc   : > { %7258 = vmatmul.msk.bf16.vlgmr.msrb.gmra.mxu3 %vm414_vm0, %v7760_v27  ;;  %4846 = vperm.xlu2 %8474, %v9850_v3  }
 0xfe3   : > { %4862 = vperm.xlu0 %8475, %v9818_v61   ;;  %4850 = vperm.xlu1 %8476, %v9812_v23  }
 0xfeb   : > { %4834 = vperm.xlu0 %8475, %v9946_v30   ;;  %4842 = vperm.xlu1 %8476, %v9956_v18  }
 0xfec   : > { %7259 = vmatmul.msk.bf16.gmra.mxu3 %vm414_vm0, %v7761_v13 }
 0xff3   : > { %4838 = vperm.xlu1 %8476, %v9970_v41  }
 0xffc   : > { %7260 = vmatmul.msk.bf16.gmra.mxu3 %vm414_vm0, %v7762_v56 }
0x100c   : > { %7261 = vmatmul.msk.bf16.gmra.mxu3 %vm414_vm0, %v7763_v6 }
0x1015   : > { %v8436_v25 = vpop.permute.xlu2 %8435 }
0x1016   : > { %v8438_v62 = vunpack.i.h.bf16 %v8436_v25  ;;  %v8437_v53 = vunpack.i.l.bf16 %v8436_v25 }
0x1018   : > { %v7282_v39 = vpack.c.bf16 %v8438_v62, %v8437_v53 }
0x101d   : > { %v8461_v10 = vpop.permute.xlu2 %8460 }
0x101e   : > { %v8463_v26 = vunpack.i.h.bf16 %v8461_v10  ;;  %v8462_v40 = vunpack.i.l.bf16 %v8461_v10 }
0x1020   : > { %v7317_v20 = vpack.c.bf16 %v8463_v26, %v8462_v40 }
0x1026   : > { %v4859_v32 = vpop.permute.xlu2 %4858 }
0x102e   : > { %v4855_v27 = vpop.permute.xlu2 %4854 }
0x1036   : > { %v4847_v62 = vpop.permute.xlu2 %4846 }
0x103d   : > { %v8451_v33 = vpop.permute.xlu1 %8450  ;;  %v8441_v54 = vpop.permute.xlu0 %8440 }
0x103e   : > { %v8453_v0 = vunpack.i.h.bf16 %v8451_v33  ;;  %v8452_v22 = vunpack.i.l.bf16 %v8451_v33  ;;  %v8443_v60 = vunpack.i.h.bf16 %v8441_v54  ;;  %v8442_v15 = vunpack.i.l.bf16 %v8441_v54 }
0x1040   : > { %v7311_v51 = vpack.c.bf16 %v8453_v0, %v8452_v22  ;;  %v7279_v1 = vpack.c.bf16 %v8443_v60, %v8442_v15 }
0x1042   : > { %7280 = vmatpush.bf16.msk.msra.mxu0 %vm8978_vm4, %v7279_v1  ;;  %7312 = vmatpush.bf16.msk.msra.mxu1 %vm8958_vm2, %v7311_v51 }
0x1045   : > { %v8456_v45 = vpop.permute.xlu1 %8455  ;;  %v8446_v16 = vpop.permute.xlu0 %8445 }
0x1046   : > { %v8458_v55 = vunpack.i.h.bf16 %v8456_v45  ;;  %v8457_v17 = vunpack.i.l.bf16 %v8456_v45  ;;  %v8448_v29 = vunpack.i.h.bf16 %v8446_v16  ;;  %v8447_v35 = vunpack.i.l.bf16 %v8446_v16  ;;  %7283 = vmatpush.bf16.msk.msra.mxu0 %vm8978_vm4, %v7282_v39 }
0x1048   : > { %v7285_v48 = vpack.c.bf16 %v8458_v55, %v8457_v17  ;;  %v7314_v8 = vpack.c.bf16 %v8448_v29, %v8447_v35 }
0x104a   : > { %7286 = vmatpush.bf16.msk.msra.mxu0 %vm8978_vm4, %v7285_v48  ;;  %7315 = vmatpush.bf16.msk.msra.mxu1 %vm8958_vm2, %v7314_v8 }
0x104d   : > { %v8471_v34 = vpop.permute.xlu1 %8470  ;;  %v8466_v14 = vpop.permute.xlu0 %8465 }
0x104e   : > { %v8473_v2 = vunpack.i.h.bf16 %v8471_v34  ;;  %v8472_v24 = vunpack.i.l.bf16 %v8471_v34  ;;  %v8468_v36 = vunpack.i.h.bf16 %v8466_v14  ;;  %v8467_v47 = vunpack.i.l.bf16 %v8466_v14  ;;  %7318 = vmatpush.bf16.msk.msra.mxu1 %vm8958_vm2, %v7317_v20 }
0x1050   : > { %v7320_v31 = vpack.c.bf16 %v8473_v2, %v8472_v24  ;;  %v7288_v49 = vpack.c.bf16 %v8468_v36, %v8467_v47 }
0x1052   : > { %7289 = vmatpush.bf16.msk.msra.mxu0 %vm8978_vm4, %v7288_v49  ;;  %7321 = vmatpush.bf16.msk.msra.mxu1 %vm8958_vm2, %v7320_v31 }
0x1055   : > { %7290 = vmatmul.msk.bf16.vlgmr.msra.gmra.mxu0 %vm414_vm0, %v7756_v63  ;;  %7322 = vmatmul.msk.bf16.vlgmr.msra.gmra.mxu1 %vm414_vm0, %v7764_v43  ;;  %v4851_v11 = vpop.permute.xlu1 %4850  ;;  %v4863_v29 = vpop.permute.xlu0 %4862 }
0x1056   : > { %5276 = vmatpush.bf16.msrb.mxu1 %v9917_v19  ;;  %v7766_v19 = vld [vmem:[#allocation3 + $0x530] sm:$0xff] }
0x105a   : > { %5277 = vmatpush.bf16.msrb.mxu1 %v9922_v44 }
0x105d   : > { %v4843_v15 = vpop.permute.xlu1 %4842  ;;  %v4835_v63 = vpop.permute.xlu0 %4834 }
0x105e   : > { %5278 = vmatpush.bf16.msrb.mxu1 %v9927_v21 }
0x105f   : > { %v4670_v46 = vpop.f32.mrf.mxu3 }
0x1062   : > { %5279 = vmatpush.bf16.msrb.mxu1 %v9933_v57 }
0x1065   : > { %7291 = vmatmul.msk.bf16.gmra.mxu0 %vm414_vm0, %v7757_v12  ;;  %7323 = vmatmul.msk.bf16.gmra.mxu1 %vm414_vm0, %v7765_v58  ;;  %v4839_v47 = vpop.permute.xlu1 %4838 }
0x1067   : > { %v4672_v9 = vpop.f32.mrf.mxu3 }
0x106f   : > { %v4675_v21 = vpop.f32.mrf.mxu3 }
0x1075   : > { %7292 = vmatmul.msk.bf16.gmra.mxu0 %vm414_vm0, %v7758_v5  ;;  %7324 = vmatmul.msk.bf16.gmra.mxu1 %vm414_vm0, %v7766_v19 }
0x1077   : > { %v4677_v25 = vpop.f32.mrf.mxu3 }
0x107f   : > { %v4680_v1 = vpop.f32.mrf.mxu3 }
0x1085   : > { %7293 = vmatmul.msk.bf16.gmra.mxu0 %vm414_vm0, %v7759_v59  ;;  %7325 = vmatmul.msk.bf16.gmra.mxu1 %vm414_vm0, %v7767_v42 }
0x1087   : > { %v4682_v35 = vpop.f32.mrf.mxu3 }
0x108f   : > { %v4685_v31 = vpop.f32.mrf.mxu3 }
0x10d2   : > { %v4731_v44 = vpop.f32.mrf.mxu0  ;;  %v4805_v7 = vpop.f32.mrf.mxu1 }
0x10d3   : > { %v4732_v34 = vadd.f32 %v4731_v44, %v4670_v46 }
0x10d5   : > { %v4825_v49 = vadd.f32 %v4805_v7, %v4732_v34 }
0x10d7   : > { %v4865_v59 = vadd.f32 %v4835_v63, %v4825_v49 }
0x10da   : > { %v4733_v50 = vpop.f32.mrf.mxu0  ;;  %v4807_v57 = vpop.f32.mrf.mxu1 }
0x10db   : > { %v4734_v8 = vadd.f32 %v4733_v50, %v4672_v9  ;;  %v4873_v9 = vmax.f32 %v4865_v59, 0.0 }
0x10dd   : > { %v4826_v24 = vadd.f32 %v4807_v57, %v4734_v8  ;;  %v7782_v8 = vld [vmem:[#allocation3 + $0x5b0] sm:$0xff] }
0x10df   : > { %v4866_v5 = vadd.f32 %v4839_v47, %v4826_v24 }
0x10e1   : > { %v4874_v46 = vmax.f32 %v4866_v5, 0.0 }
0x10e2   : > { %v4736_v13 = vpop.f32.mrf.mxu0  ;;  %v4810_v37 = vpop.f32.mrf.mxu1 }
0x10e3   : > { %v4737_v33 = vadd.f32 %v4736_v13, %v4675_v21  ;;  %v4687_v21 = vpop.f32.mrf.mxu3  ;;  %v8487_v57 = vpack.i.bf16 %v4874_v46, %v4873_v9 }
0x10e5   : > { %v4827_v54 = vadd.f32 %v4810_v37, %v4737_v33 }
0x10e7   : > { %v4867_v53 = vadd.f32 %v4843_v15, %v4827_v54  ;;  %v8804_v15 = vmov 16  }
0x10e8   : > { %8517 = vset.pattern.permute.xlu1 %v8804_v15  ;;  %8518 = vset.pattern.permute.xlu2 %v8804_v15 }
0x10e9   : > { %v4875_v10 = vmax.f32 %v4867_v53, 0.0  ;;  %v7780_v53 = vld [vmem:[#allocation3 + $0x5a0] sm:$0xff] }
0x10ea   : > { %v4738_v0 = vpop.f32.mrf.mxu0  ;;  %v4812_v22 = vpop.f32.mrf.mxu1  ;;  %7426 = vmatmul.msk.bf16.vlgmr.msrb.gmra.mxu1 %vm414_vm0, %v7780_v53 }
0x10eb   : > { %v4739_v60 = vadd.f32 %v4738_v0, %v4677_v25 }
0x10ed   : > { %v4828_v51 = vadd.f32 %v4812_v22, %v4739_v60 }
0x10ef   : > { %v4868_v39 = vadd.f32 %v4847_v62, %v4828_v51  ;;  %v8805_v62 = vmov 17   ;;  %v7772_v51 = vld [vmem:[#allocation3 + $0x560] sm:$0xff] }
0x10f0   : > { %8519 = vset.pattern.permute.xlu0 %v8805_v62 }
0x10f1   : > { %v4876_v45 = vmax.f32 %v4868_v39, 0.0 }
0x10f2   : > { %v4741_v16 = vpop.f32.mrf.mxu0  ;;  %v4815_v56 = vpop.f32.mrf.mxu1 }
0x10f3   : > { %v8477_v55 = vpack.i.bf16 %v4876_v45, %v4875_v10  ;;  %v4742_v17 = vadd.f32 %v4741_v16, %v4680_v1  ;;  %v4952_v60 = vpack.c.bf16 %v4876_v45, %v4875_v10  ;;  %v7781_v1 = vld [vmem:[#allocation3 + $0x5a8] sm:$0xff] }
0x10f5   : > { %8478 = vrot.lane.b32.xlu1 %v8477_v55, %s8787_s11  ;;  %v4829_v26 = vadd.f32 %v4815_v56, %v4742_v17 }
0x10f7   : > { %v4869_v14 = vadd.f32 %v4851_v11, %v4829_v26 }
0x10f9   : > { %v4877_v43 = vmax.f32 %v4869_v14, 0.0 }
0x10fa   : > { %v4743_v40 = vpop.f32.mrf.mxu0  ;;  %v4817_v48 = vpop.f32.mrf.mxu1  ;;  %7427 = vmatmul.msk.bf16.gmra.mxu1 %vm414_vm0, %v7781_v1 }
0x10fb   : > { %v4744_v20 = vadd.f32 %v4743_v40, %v4682_v35 }
0x10fd   : > { %v4830_v2 = vadd.f32 %v4817_v48, %v4744_v20 }
0x10ff   : > { %v4870_v36 = vadd.f32 %v4855_v27, %v4830_v2 }
0x1101   : > { %v4878_v6 = vmax.f32 %v4870_v36, 0.0 }
0x1102   : > { %v4746_v12 = vpop.f32.mrf.mxu0  ;;  %v4820_v58 = vpop.f32.mrf.mxu1 }
0x1103   : > { %v8492_v19 = vpack.i.bf16 %v4878_v6, %v4877_v43  ;;  %v4747_v42 = vadd.f32 %v4746_v12, %v4685_v31  ;;  %v4953_v22 = vpack.c.bf16 %v4878_v6, %v4877_v43 }
0x1105   : > { %8493 = vrot.lane.b32.xlu1 %v8492_v19, %s8786_s28  ;;  %8483 = vrot.lane.b32.xlu0 %v8492_v19, %s8787_s11  ;;  %v4831_v44 = vadd.f32 %v4820_v58, %v4747_v42  ;;  %v7768_v58 = vld [vmem:[#allocation3 + $0x540] sm:$0xff] }
0x1107   : > { %v4871_v27 = vadd.f32 %v4859_v32, %v4831_v44  ;;  %v4951_v32 = vpack.c.bf16 %v4874_v46, %v4873_v9  ;;  %v7783_v46 = vld [vmem:[#allocation3 + $0x5b8] sm:$0xff]  ;;  %v7776_v9 = vld [vmem:[#allocation3 + $0x580] sm:$0xff] }
0x1108   : > { %v7775_v44 = vld [vmem:[#allocation3 + $0x578] sm:$0xff] }
0x1109   : > { %v4879_v25 = vmax.f32 %v4871_v27, 0.0  ;;  %v7779_v27 = vld [vmem:[#allocation3 + $0x598] sm:$0xff] }
0x110a   : > { %v4748_v50 = vpop.f32.mrf.mxu0  ;;  %v4822_v11 = vpop.f32.mrf.mxu1  ;;  %7428 = vmatmul.msk.bf16.gmra.mxu1 %vm414_vm0, %v7782_v8 }
0x110b   : > { %v4749_v7 = vadd.f32 %v4748_v50, %v4687_v21  ;;  %v7769_v21 = vld [vmem:[#allocation3 + $0x548] sm:$0xff] }
0x110c   : > { %v7777_v50 = vld [vmem:[#allocation3 + $0x588] sm:$0xff] }
0x110d   : > { %v4832_v13 = vadd.f32 %v4822_v11, %v4749_v7  ;;  %8488 = vrot.lane.b32.xlu0 %v8487_v57, %s8787_s11  ;;  %5184 = vperm.xlu1 %8517, %v9824_v28   ;;  %v7778_v7 = vld [vmem:[#allocation3 + $0x590] sm:$0xff]  ;;  %v7771_v11 = vld [vmem:[#allocation3 + $0x558] sm:$0xff] }
0x110f   : > { %v4872_v37 = vadd.f32 %v4863_v29, %v4832_v13 }
0x1111   : > { %v4880_v33 = vmax.f32 %v4872_v37, 0.0 }
0x1113   : > { %v8497_v54 = vpack.i.bf16 %v4880_v33, %v4879_v25  ;;  %v4954_v0 = vpack.c.bf16 %v4880_v33, %v4879_v25 }
0x1115   : > { %8513 = vrot.lane.b32.xlu0 %v8487_v57, %s8786_s28  ;;  %8498 = vrot.lane.b32.xlu2 %v8497_v54, %s8787_s11  ;;  %v7770_v57 = vld [vmem:[#allocation3 + $0x550] sm:$0xff] }
0x1116   : > { %4991 = vmatpush.bf16.msra.mxu2 %v4954_v0  ;;  %8520 = vset.pattern.permute.xlu1 %v8805_v62 }
0x1117   : > { %5237 = vperm.xlu1 %8520, %v9818_v61  }
0x111a   : > { %4992 = vmatpush.bf16.msra.mxu2 %v4953_v22  ;;  %7429 = vmatmul.msk.bf16.gmra.mxu1 %vm414_vm0, %v7783_v46 }
0x111d   : > { %8503 = vrot.lane.b32.xlu2 %v8497_v54, %s8786_s28  ;;  %5233 = vperm.xlu0 %8519, %v9824_v28  }
0x111e   : > { %4993 = vmatpush.bf16.msra.mxu2 %v4952_v60 }
0x111f   : > { %8521 = vset.pattern.permute.xlu1 %v8804_v15 }
0x1120   : > { %5180 = vperm.xlu1 %8521, %v9839_v4  }
0x1122   : > { %4994 = vmatpush.bf16.msra.mxu2 %v4951_v32 }
0x1125   : > { %8508 = vrot.lane.b32.xlu2 %v8477_v55, %s8786_s28  ;;  %7342 = vmatmul.msk.bf16.vlgmr.msra.gmra.mxu2 %vm414_vm0, %v7772_v51 }
0x1126   : > { %5229 = vperm.xlu0 %8519, %v9839_v4  }
0x1128   : > { %5168 = vperm.xlu1 %8521, %v9956_v18  }
0x112d   : > { %5188 = vperm.xlu2 %8518, %v9818_v61   ;;  %v7773_v61 = vld [vmem:[#allocation3 + $0x568] sm:$0xff] }
0x112e   : > { %5217 = vperm.xlu0 %8519, %v9956_v18  }
0x1130   : > { %8524 = vset.pattern.permute.xlu1 %v8805_v62 }
0x1131   : > { %5221 = vperm.xlu1 %8524, %v9850_v3  }
0x1135   : > { %5176 = vperm.xlu2 %8518, %v9812_v23   ;;  %7343 = vmatmul.msk.bf16.gmra.mxu2 %vm414_vm0, %v7773_v61 }
0x1136   : > { %8525 = vset.pattern.permute.xlu0 %v8804_v15 }
0x1137   : > { %5164 = vperm.xlu0 %8525, %v9970_v41  }
0x1139   : > { %5209 = vperm.xlu1 %8524, %v9946_v30  }
0x113d   : > { %8522 = vset.pattern.permute.xlu2 %v8805_v62 }
0x113e   : > { %5225 = vperm.xlu2 %8522, %v9812_v23  }
0x1146   : > { %8523 = vset.pattern.permute.xlu2 %v8804_v15 }
0x1147   : > { %5172 = vperm.xlu2 %8523, %v9850_v3   ;;  %v7774_v3 = vld [vmem:[#allocation3 + $0x570] sm:$0xff] }
0x1148   : > { %7344 = vmatmul.msk.bf16.gmra.mxu2 %vm414_vm0, %v7774_v3 }
0x114f   : > { %5160 = vperm.xlu2 %8523, %v9946_v30  }
0x1157   : > { %8526 = vset.pattern.permute.xlu2 %v8805_v62 }
0x1158   : > { %5213 = vperm.xlu2 %8526, %v9970_v41   ;;  %7345 = vmatmul.msk.bf16.gmra.mxu2 %vm414_vm0, %v7775_v44 }
0x1167   : > { %v8479_v39 = vpop.permute.xlu1 %8478  ;;  %v10051_v25 = vpop.f32.mrf.mxu1 }
0x1168   : > { %v8481_v26 = vunpack.i.h.bf16 %v8479_v39  ;;  %v8480_v40 = vunpack.i.l.bf16 %v8479_v39 }
0x116a   : > { %v7369_v2 = vpack.c.bf16 %v8481_v26, %v8480_v40 }
0x116f   : > { %v8499_v28 = vpop.permute.xlu2 %8498  ;;  %v10057_v22 = vpop.f32.mrf.mxu1 }
0x1170   : > { %v8501_v10 = vunpack.i.h.bf16 %v8499_v28  ;;  %v8500_v45 = vunpack.i.l.bf16 %v8499_v28 }
0x1172   : > { %v7363_v4 = vpack.c.bf16 %v8501_v10, %v8500_v45 }
0x1174   : > { %7364 = vmatpush.bf16.msk.msra.mxu3 %vm8978_vm4, %v7363_v4 }
0x1177   : > { %v8484_v23 = vpop.permute.xlu0 %8483  ;;  %v8494_v16 = vpop.permute.xlu1 %8493 }
0x1178   : > { %v8486_v56 = vunpack.i.h.bf16 %v8484_v23  ;;  %v8485_v55 = vunpack.i.l.bf16 %v8484_v23  ;;  %v8504_v17 = vpop.permute.xlu2 %8503  ;;  %v8496_v20 = vunpack.i.h.bf16 %v8494_v16  ;;  %v8495_v34 = vunpack.i.l.bf16 %v8494_v16  ;;  %v5286_v1 = vpop.f32.mrf.mxu1 }
0x1179   : > { %v8506_v29 = vunpack.i.h.bf16 %v8504_v17  ;;  %v8505_v35 = vunpack.i.l.bf16 %v8504_v17 }
0x117a   : > { %v7366_v48 = vpack.c.bf16 %v8486_v56, %v8485_v55  ;;  %v7398_v24 = vpack.c.bf16 %v8496_v20, %v8495_v34 }
0x117b   : > { %v7395_v14 = vpack.c.bf16 %v8506_v29, %v8505_v35 }
0x117c   : > { %7367 = vmatpush.bf16.msk.msra.mxu3 %vm8978_vm4, %v7366_v48 }
0x117d   : > { %7396 = vmatpush.bf16.msk.msrb.mxu0 %vm8958_vm2, %v7395_v14 }
0x117f   : > { %v8489_v36 = vpop.permute.xlu0 %8488  ;;  %v10049_v37 = vpop.permute.xlu1 %5184 }
0x1180   : > { %v8491_v47 = vunpack.i.h.bf16 %v8489_v36  ;;  %v8490_v31 = vunpack.i.l.bf16 %v8489_v36  ;;  %v8509_v49 = vpop.permute.xlu2 %8508  ;;  %7370 = vmatpush.bf16.msk.msra.mxu3 %vm8978_vm4, %v7369_v2  ;;  %v5288_v16 = vpop.f32.mrf.mxu1 }
0x1181   : > { %v8511_v63 = vunpack.i.h.bf16 %v8509_v49  ;;  %v8510_v43 = vunpack.i.l.bf16 %v8509_v49  ;;  %7399 = vmatpush.bf16.msk.msrb.mxu0 %vm8958_vm2, %v7398_v24 }
0x1182   : > { %v7372_v6 = vpack.c.bf16 %v8491_v47, %v8490_v31 }
0x1183   : > { %v7401_v12 = vpack.c.bf16 %v8511_v63, %v8510_v43 }
0x1184   : > { %7373 = vmatpush.bf16.msk.msra.mxu3 %vm8978_vm4, %v7372_v6 }
0x1185   : > { %7402 = vmatpush.bf16.msk.msrb.mxu0 %vm8958_vm2, %v7401_v12 }
0x1187   : > { %v8514_v5 = vpop.permute.xlu0 %8513  ;;  %7374 = vmatmul.msk.bf16.vlgmr.msra.gmra.mxu3 %vm414_vm0, %v7768_v58 }
0x1188   : > { %v8516_v19 = vunpack.i.h.bf16 %v8514_v5  ;;  %v8515_v59 = vunpack.i.l.bf16 %v8514_v5  ;;  %v10053_v54 = vpop.permute.xlu2 %5188  ;;  %v5291_v2 = vpop.f32.mrf.mxu1 }
0x1189   : > { %v10055_v0 = vpop.permute.xlu1 %5237 }
0x118a   : > { %v7404_v42 = vpack.c.bf16 %v8516_v19, %v8515_v59 }
0x118c   : > { %7405 = vmatpush.bf16.msk.msrb.mxu0 %vm8958_vm2, %v7404_v42 }
0x118f   : > { %7406 = vmatmul.msk.bf16.vlgmr.msrb.gmra.mxu0 %vm414_vm0, %v7776_v9  ;;  %v10059_v15 = vpop.permute.xlu0 %5233 }
0x1190   : > { %v5177_v53 = vpop.permute.xlu2 %5176  ;;  %v5293_v5 = vpop.f32.mrf.mxu1 }
0x1192   : > { %v5181_v51 = vpop.permute.xlu1 %5180 }
0x1197   : > { %7375 = vmatmul.msk.bf16.gmra.mxu3 %vm414_vm0, %v7769_v21 }
0x1198   : > { %v5230_v39 = vpop.permute.xlu0 %5229  ;;  %v5226_v4 = vpop.permute.xlu2 %5225 }
0x1199   : > { %v5292_v21 = vadd.f32 %v5291_v2, %v5226_v4 }
0x119a   : > { %v5169_v23 = vpop.permute.xlu1 %5168 }
0x119f   : > { %7407 = vmatmul.msk.bf16.gmra.mxu0 %vm414_vm0, %v7777_v50 }
0x11a0   : > { %v5218_v35 = vpop.permute.xlu0 %5217 }
0x11a1   : > { %v5173_v8 = vpop.permute.xlu2 %5172  ;;  %v5287_v20 = vadd.f32 %v5286_v1, %v5218_v35 }
0x11a3   : > { %v5222_v3 = vpop.permute.xlu1 %5221 }
0x11a4   : > { %v5289_v24 = vadd.f32 %v5288_v16, %v5222_v3 }
0x11a7   : > { %7376 = vmatmul.msk.bf16.gmra.mxu3 %vm414_vm0, %v7770_v57 }
0x11a8   : > { %v4996_v13 = vpop.f32.mrf.mxu2 }
0x11a9   : > { %v5161_v58 = vpop.permute.xlu2 %5160 }
0x11af   : > { %7408 = vmatmul.msk.bf16.gmra.mxu0 %vm414_vm0, %v7778_v7 }
0x11b0   : > { %v4998_v33 = vpop.f32.mrf.mxu2 }
0x11b7   : > { %7377 = vmatmul.msk.bf16.gmra.mxu3 %vm414_vm0, %v7771_v11  ;;  %v5294_v11 = vadd.f32 %v5293_v5, %v5230_v39 }
0x11b8   : > { %v5001_v62 = vpop.f32.mrf.mxu2 }
0x11bf   : > { %7409 = vmatmul.msk.bf16.gmra.mxu0 %vm414_vm0, %v7779_v27 }
0x11c0   : > { %v5003_v10 = vpop.f32.mrf.mxu2 }
0x11cb   : > { %v5006_v40 = vpop.f32.mrf.mxu2 }
0x11d3   : > { %v5008_v12 = vpop.f32.mrf.mxu2 }
0x11db   : > { %v5011_v1 = vpop.f32.mrf.mxu2 }
0x120a   : > { %v5057_v60 = vpop.f32.mrf.mxu3 }
0x120b   : > { %v5058_v44 = vadd.f32 %v5057_v60, %v4996_v13 }
0x120c   : > { %v5131_v32 = vpop.f32.mrf.mxu0 }
0x1212   : > { %v5059_v61 = vpop.f32.mrf.mxu3 }
0x1213   : > { %v5060_v42 = vadd.f32 %v5059_v61, %v4998_v33 }
0x1214   : > { %v5133_v28 = vpop.f32.mrf.mxu0 }
0x1215   : > { %v5152_v7 = vadd.f32 %v5133_v28, %v5060_v42 }
0x121a   : > { %v5062_v45 = vpop.f32.mrf.mxu3 }
0x121b   : > { %v5063_v55 = vadd.f32 %v5062_v45, %v5001_v62  ;;  %v5165_v62 = vpop.permute.xlu0 %5164  ;;  %v5210_v45 = vpop.permute.xlu1 %5209 }
0x121c   : > { %v5136_v56 = vpop.f32.mrf.mxu0  ;;  %v5192_v61 = vadd.f32 %v5165_v62, %v5152_v7  ;;  %v5282_v60 = vadd.f32 %v10051_v25, %v5210_v45 }
0x121d   : > { %v5153_v17 = vadd.f32 %v5136_v56, %v5063_v55  ;;  %v5296_v55 = vpop.f32.mrf.mxu1 }
0x121f   : > { %v5193_v34 = vadd.f32 %v5169_v23, %v5153_v17  ;;  %v5214_v23 = vpop.permute.xlu2 %5213 }
0x1221   : > { %v10061_v47 = vadd.f32 %v5287_v20, %v5193_v34  ;;  %v5297_v20 = vadd.f32 %v5296_v55, %v10059_v15  ;;  %v7788_v15 = vld [vmem:[#allocation3 + $0x5e0] sm:$0xff] }
0x1222   : > { %v5064_v29 = vpop.f32.mrf.mxu3 }
0x1223   : > { %v5065_v26 = vadd.f32 %v5064_v29, %v5003_v10  ;;  %v5151_v10 = vadd.f32 %v5131_v32, %v5058_v44  ;;  %v5013_v29 = vpop.f32.mrf.mxu2 }
0x1224   : > { %v5138_v48 = vpop.f32.mrf.mxu0 }
0x1225   : > { %v5154_v14 = vadd.f32 %v5138_v48, %v5065_v26  ;;  %v5191_v28 = vadd.f32 %v5161_v58, %v5151_v10 }
0x1227   : > { %v5194_v36 = vadd.f32 %v5173_v8, %v5154_v14  ;;  %v10083_v4 = vadd.f32 %v5282_v60, %v5191_v28  ;;  %v7790_v60 = vld [vmem:[#allocation3 + $0x5f0] sm:$0xff] }
0x1229   : > { %v10063_v31 = vadd.f32 %v5289_v24, %v5194_v36 }
0x122a   : > { %v5067_v49 = vpop.f32.mrf.mxu3 }
0x122b   : > { %v10067_v63 = vpack.i.bf16 %v10063_v31, %v10061_v47  ;;  %v5068_v6 = vadd.f32 %v5067_v49, %v5006_v40  ;;  %v5298_v40 = vpop.f32.mrf.mxu1  ;;  %v8806_v49 = vmov 18  }
0x122c   : > { %v5141_v43 = vpop.f32.mrf.mxu0  ;;  %v5299_v34 = vadd.f32 %v5298_v40, %v10055_v0  ;;  %8568 = vset.pattern.permute.xlu1 %v8806_v49  ;;  %8567 = vset.pattern.permute.xlu0 %v8806_v49  ;;  %v7792_v40 = vld [vmem:[#allocation3 + $0x600] sm:$0xff] }
0x122d   : > { %8528 = vrot.lane.b32.xlu0 %v10067_v63, %s8787_s11  ;;  %v5155_v19 = vadd.f32 %v5141_v43, %v5068_v6  ;;  %v10115_v43 = vld [vmem:[%s10277_s2 + $0x38] sm:$0xff]  ;;  %8569 = vset.pattern.permute.xlu2 %v8806_v49  ;;  %v7789_v6 = vld [vmem:[#allocation3 + $0x5e8] sm:$0xff] }
0x122f   : > { %v5195_v50 = vadd.f32 %v5177_v53, %v5155_v19 }
0x1231   : > { %v10071_v16 = vadd.f32 %v5292_v21, %v5195_v50  ;;  %v10140_v50 = vld [vmem:[%s10277_s2 + $0x18] sm:$0xff] }
0x1232   : > { %v5069_v59 = vpop.f32.mrf.mxu3 }
0x1233   : > { %v5070_v46 = vadd.f32 %v5069_v59, %v5008_v12  ;;  %v10121_v12 = vld [vmem:[%s10277_s2 + $0x30] sm:$0xff] }
0x1234   : > { %v5143_v9 = vpop.f32.mrf.mxu0 }
0x1235   : > { %v5156_v57 = vadd.f32 %v5143_v9, %v5070_v46  ;;  %v10134_v46 = vld [vmem:[%s10277_s2 + $0x28] sm:$0xff] }
0x1237   : > { %v5196_v27 = vadd.f32 %v5181_v51, %v5156_v57  ;;  %v5284_v51 = vadd.f32 %v10057_v22, %v5214_v23 }
0x1239   : > { %v10073_v56 = vadd.f32 %v5294_v11, %v5196_v27  ;;  %v10081_v32 = vadd.f32 %v5284_v51, %v5192_v61 }
0x123a   : > { %v5072_v33 = vpop.f32.mrf.mxu3 }
0x123b   : > { %v8542_v13 = vpack.i.bf16 %v10073_v56, %v10071_v16  ;;  %v5073_v39 = vadd.f32 %v5072_v33, %v5011_v1  ;;  %v8537_v25 = vpack.i.bf16 %v10081_v32, %v10083_v4  ;;  %v5379_v0 = vpack.c.bf16 %v10081_v32, %v10083_v4 }
0x123c   : > { %v5146_v53 = vpop.f32.mrf.mxu0 }
0x123d   : > { %8543 = vrot.lane.b32.xlu0 %v8542_v13, %s8786_s28  ;;  %8533 = vrot.lane.b32.xlu2 %v8542_v13, %s8787_s11  ;;  %v5157_v17 = vadd.f32 %v5146_v53, %v5073_v39 }
0x123f   : > { %v5197_v22 = vadd.f32 %v10049_v37, %v5157_v17  ;;  %v5381_v37 = vpack.c.bf16 %v10073_v56, %v10071_v16 }
0x1241   : > { %v10092_v3 = vadd.f32 %v5297_v20, %v5197_v22  ;;  %v7785_v22 = vld [vmem:[#allocation3 + $0x5c8] sm:$0xff]  ;;  %v7786_v20 = vld [vmem:[#allocation3 + $0x5d0] sm:$0xff] }
0x1242   : > { %v5074_v35 = vpop.f32.mrf.mxu3 }
0x1243   : > { %v5075_v26 = vadd.f32 %v5074_v35, %v5013_v29 }
0x1244   : > { %v5148_v48 = vpop.f32.mrf.mxu0 }
0x1245   : > { %v5158_v8 = vadd.f32 %v5148_v48, %v5075_v26  ;;  %8538 = vrot.lane.b32.xlu2 %v8537_v25, %s8787_s11  ;;  %5612 = vperm.xlu0 %8567, %v10121_v12   ;;  %v7791_v48 = vld [vmem:[#allocation3 + $0x5f8] sm:$0xff] }
0x1247   : > { %v5198_v14 = vadd.f32 %v10053_v54, %v5158_v8  ;;  %v5380_v54 = vpack.c.bf16 %v10063_v31, %v10061_v47  ;;  %v7793_v8 = vld [vmem:[#allocation3 + $0x608] sm:$0xff] }
0x1249   : > { %v10094_v2 = vadd.f32 %v5299_v34, %v5198_v14  ;;  %v7794_v34 = vld [vmem:[#allocation3 + $0x610] sm:$0xff]  ;;  %v7787_v14 = vld [vmem:[#allocation3 + $0x5d8] sm:$0xff] }
0x124b   : > { %v8547_v24 = vpack.i.bf16 %v10094_v2, %v10092_v3  ;;  %v5382_v36 = vpack.c.bf16 %v10094_v2, %v10092_v3 }
0x124d   : > { %8563 = vrot.lane.b32.xlu2 %v8537_v25, %s8786_s28  ;;  %8548 = vrot.lane.b32.xlu1 %v8547_v24, %s8787_s11 }
0x124e   : > { %5419 = vmatpush.bf16.msrb.mxu2 %v5382_v36  ;;  %5600 = vperm.xlu0 %8567, %v10140_v50  }
0x1252   : > { %5420 = vmatpush.bf16.msrb.mxu2 %v5381_v37 }
0x1255   : > { %8553 = vrot.lane.b32.xlu1 %v8547_v24, %s8786_s28  ;;  %v7795_v24 = vld [vmem:[#allocation3 + $0x618] sm:$0xff] }
0x1256   : > { %5421 = vmatpush.bf16.msrb.mxu2 %v5380_v54 }
0x125a   : > { %5422 = vmatpush.bf16.msrb.mxu2 %v5379_v0 }
0x125d   : > { %8558 = vrot.lane.b32.xlu1 %v10067_v63, %s8786_s28  ;;  %7446 = vmatmul.msk.bf16.vlgmr.msrb.gmra.mxu2 %vm414_vm0, %v7788_v15  ;;  %v10127_v63 = vld [vmem:[%s10277_s2 + $0x20] sm:$0xff] }
0x125e   : > { %5604 = vperm.xlu2 %8569, %v10127_v63  }
0x1265   : > { %5616 = vperm.xlu1 %8568, %v10115_v43  }
0x1266   : > { %5596 = vperm.xlu2 %8569, %v9956_v18  }
0x126d   : > { %7447 = vmatmul.msk.bf16.gmra.mxu2 %vm414_vm0, %v7789_v6  ;;  %5608 = vperm.xlu1 %8568, %v10134_v46  }
0x126e   : > { %5592 = vperm.xlu2 %8569, %v9970_v41  }
0x1275   : > { %5588 = vperm.xlu1 %8568, %v9946_v30   ;;  %v7784_v30 = vld [vmem:[#allocation3 + $0x5c0] sm:$0xff] }
0x127d   : > { %7448 = vmatmul.msk.bf16.gmra.mxu2 %vm414_vm0, %v7790_v60 }
0x128d   : > { %7449 = vmatmul.msk.bf16.gmra.mxu2 %vm414_vm0, %v7791_v48 }
0x1297   : > { %v8534_v58 = vpop.permute.xlu2 %8533 }
0x1298   : > { %v8536_v9 = vunpack.i.h.bf16 %v8534_v58  ;;  %v8535_v44 = vunpack.i.l.bf16 %v8534_v58 }
0x129a   : > { %v7470_v7 = vpack.c.bf16 %v8536_v9, %v8535_v44 }
0x129f   : > { %v8529_v5 = vpop.permute.xlu0 %8528  ;;  %v8539_v57 = vpop.permute.xlu2 %8538 }
0x12a0   : > { %v8531_v11 = vunpack.i.h.bf16 %v8529_v5  ;;  %v8530_v27 = vunpack.i.l.bf16 %v8529_v5  ;;  %v8541_v23 = vunpack.i.h.bf16 %v8539_v57  ;;  %v8540_v55 = vunpack.i.l.bf16 %v8539_v57 }
0x12a2   : > { %v7473_v33 = vpack.c.bf16 %v8531_v11, %v8530_v27  ;;  %v7476_v53 = vpack.c.bf16 %v8541_v23, %v8540_v55 }
0x12a7   : > { %v8564_v51 = vpop.permute.xlu2 %8563 }
0x12a8   : > { %v8566_v41 = vunpack.i.h.bf16 %v8564_v51  ;;  %v8565_v35 = vunpack.i.l.bf16 %v8564_v51 }
0x12aa   : > { %v7508_v25 = vpack.c.bf16 %v8566_v41, %v8565_v35 }
0x12af   : > { %v8544_v62 = vpop.permute.xlu0 %8543 }
0x12b0   : > { %v8546_v18 = vunpack.i.h.bf16 %v8544_v62  ;;  %v8545_v61 = vunpack.i.l.bf16 %v8544_v62 }
0x12b2   : > { %v7502_v28 = vpack.c.bf16 %v8546_v18, %v8545_v61 }
0x12b7   : > { %v5613_v62 = vpop.permute.xlu0 %5612 }
0x12bf   : > { %v8549_v19 = vpop.permute.xlu1 %8548 }
0x12c0   : > { %v8551_v59 = vunpack.i.h.bf16 %v8549_v19  ;;  %v8550_v42 = vunpack.i.l.bf16 %v8549_v19 }
0x12c2   : > { %v7467_v21 = vpack.c.bf16 %v8551_v59, %v8550_v42 }
0x12c4   : > { %7468 = vmatpush.bf16.msk.msrb.mxu3 %vm8978_vm4, %v7467_v21 }
0x12c7   : > { %v8554_v1 = vpop.permute.xlu1 %8553 }
0x12c8   : > { %v8556_v10 = vunpack.i.h.bf16 %v8554_v1  ;;  %v8555_v45 = vunpack.i.l.bf16 %v8554_v1  ;;  %7471 = vmatpush.bf16.msk.msrb.mxu3 %vm8978_vm4, %v7470_v7 }
0x12ca   : > { %v7499_v13 = vpack.c.bf16 %v8556_v10, %v8555_v45  ;;  %v5605_v45 = vpop.permute.xlu2 %5604 }
0x12cc   : > { %7474 = vmatpush.bf16.msk.msrb.mxu3 %vm8978_vm4, %v7473_v33  ;;  %7500 = vmatpush.bf16.msk.msra.mxu0 %vm8958_vm2, %v7499_v13 }
0x12cf   : > { %v8559_v39 = vpop.permute.xlu1 %8558 }
0x12d0   : > { %v8561_v17 = vunpack.i.h.bf16 %v8559_v39  ;;  %v8560_v29 = vunpack.i.l.bf16 %v8559_v39  ;;  %7477 = vmatpush.bf16.msk.msrb.mxu3 %vm8978_vm4, %v7476_v53  ;;  %7503 = vmatpush.bf16.msk.msra.mxu0 %vm8958_vm2, %v7502_v28  ;;  %v5601_v39 = vpop.permute.xlu0 %5600 }
0x12d2   : > { %v7505_v26 = vpack.c.bf16 %v8561_v17, %v8560_v29 }
0x12d3   : > { %7478 = vmatmul.msk.bf16.vlgmr.msrb.gmra.mxu3 %vm414_vm0, %v7784_v30 }
0x12d4   : > { %7506 = vmatpush.bf16.msk.msra.mxu0 %vm8958_vm2, %v7505_v26 }
0x12d7   : > { %v5617_v7 = vpop.permute.xlu1 %5616 }
0x12d8   : > { %7509 = vmatpush.bf16.msk.msra.mxu0 %vm8958_vm2, %v7508_v25 }
0x12db   : > { %7510 = vmatmul.msk.bf16.vlgmr.msra.gmra.mxu0 %vm414_vm0, %v7792_v40  ;;  %v5597_v40 = vpop.permute.xlu2 %5596 }
0x12df   : > { %v5609_v53 = vpop.permute.xlu1 %5608 }
0x12e0   : > { %v5424_v36 = vpop.f32.mrf.mxu2 }
0x12e3   : > { %7479 = vmatmul.msk.bf16.gmra.mxu3 %vm414_vm0, %v7785_v22 }
0x12e8   : > { %v5426_v37 = vpop.f32.mrf.mxu2 }
0x12eb   : > { %7511 = vmatmul.msk.bf16.gmra.mxu0 %vm414_vm0, %v7793_v8 }
0x12f0   : > { %v5429_v6 = vpop.f32.mrf.mxu2 }
0x12f3   : > { %7480 = vmatmul.msk.bf16.gmra.mxu3 %vm414_vm0, %v7786_v20 }
0x12f8   : > { %v5431_v59 = vpop.f32.mrf.mxu2 }
0x12fb   : > { %7512 = vmatmul.msk.bf16.gmra.mxu0 %vm414_vm0, %v7794_v34 }
0x1300   : > { %v5434_v21 = vpop.f32.mrf.mxu2 }
0x1303   : > { %7481 = vmatmul.msk.bf16.gmra.mxu3 %vm414_vm0, %v7787_v14 }
0x1308   : > { %v5436_v1 = vpop.f32.mrf.mxu2 }
0x130b   : > { %7513 = vmatmul.msk.bf16.gmra.mxu0 %vm414_vm0, %v7795_v24 }
0x1310   : > { %v5439_v30 = vpop.f32.mrf.mxu2 }
0x1318   : > { %v5441_v24 = vpop.f32.mrf.mxu2 }
0x1356   : > { %v5485_v54 = vpop.f32.mrf.mxu3 }
0x1357   : > { %v5486_v0 = vadd.f32 %v5485_v54, %v5424_v36 }
0x1358   : > { %v5559_v15 = vpop.f32.mrf.mxu0 }
0x1359   : > { %v10172_v49 = vadd.f32 %v5559_v15, %v5486_v0 }
0x135e   : > { %v5487_v58 = vpop.f32.mrf.mxu3 }
0x1360   : > { %v5561_v5 = vpop.f32.mrf.mxu0 }
0x1366   : > { %v5490_v19 = vpop.f32.mrf.mxu3 }
0x1367   : > { %v5491_v61 = vadd.f32 %v5490_v19, %v5429_v6 }
0x1368   : > { %v5564_v42 = vpop.f32.mrf.mxu0 }
0x1369   : > { %v5581_v17 = vadd.f32 %v5564_v42, %v5491_v61  ;;  %v5488_v42 = vadd.f32 %v5487_v58, %v5426_v37 }
0x136b   : > { %v5621_v22 = vadd.f32 %v5597_v40, %v5581_v17  ;;  %v7801_v17 = vld [vmem:[#allocation3 + $0x648] sm:$0xff] }
0x136d   : > { %v5629_v34 = vmax.f32 %v5621_v22, 0.0 }
0x136e   : > { %v5492_v9 = vpop.f32.mrf.mxu3 }
0x136f   : > { %v5493_v55 = vadd.f32 %v5492_v9, %v5431_v59 }
0x1370   : > { %v5566_v44 = vpop.f32.mrf.mxu0 }
0x1371   : > { %v5582_v28 = vadd.f32 %v5566_v44, %v5493_v55  ;;  %v7800_v55 = vld [vmem:[#allocation3 + $0x640] sm:$0xff] }
0x1373   : > { %v5622_v26 = vadd.f32 %v5601_v39, %v5582_v28 }
0x1375   : > { %v5630_v20 = vmax.f32 %v5622_v26, 0.0 }
0x1376   : > { %v5495_v57 = vpop.f32.mrf.mxu3 }
0x1377   : > { %v5496_v27 = vadd.f32 %v5495_v57, %v5434_v21  ;;  %v8595_v54 = vpack.i.bf16 %v5630_v20, %v5629_v34 }
0x1378   : > { %v5569_v11 = vpop.f32.mrf.mxu0 }
0x1379   : > { %v5583_v10 = vadd.f32 %v5569_v11, %v5496_v27  ;;  %v5580_v11 = vadd.f32 %v5561_v5, %v5488_v42  ;;  %v5593_v27 = vpop.permute.xlu2 %5592 }
0x137b   : > { %v5623_v13 = vadd.f32 %v5605_v45, %v5583_v10  ;;  %v5620_v10 = vadd.f32 %v5593_v27, %v5580_v11  ;;  %v7796_v11 = vld [vmem:[#allocation3 + $0x620] sm:$0xff] }
0x137c   : > { %v7804_v27 = vld [vmem:[#allocation3 + $0x660] sm:$0xff] }
0x137d   : > { %v5631_v29 = vmax.f32 %v5623_v13, 0.0 }
0x137e   : > { %v5497_v23 = vpop.f32.mrf.mxu3 }
0x137f   : > { %v5498_v33 = vadd.f32 %v5497_v23, %v5436_v1  ;;  %v5589_v1 = vpop.permute.xlu1 %5588  ;;  %v5628_v23 = vmax.f32 %v5620_v10, 0.0  ;;  %v7799_v10 = vld [vmem:[#allocation3 + $0x638] sm:$0xff] }
0x1380   : > { %v5571_v18 = vpop.f32.mrf.mxu0 }
0x1381   : > { %v5584_v60 = vadd.f32 %v5571_v18, %v5498_v33 }
0x1383   : > { %v5624_v51 = vadd.f32 %v5609_v53, %v5584_v60 }
0x1385   : > { %v5632_v41 = vmax.f32 %v5624_v51, 0.0 }
0x1386   : > { %v5500_v35 = vpop.f32.mrf.mxu3 }
0x1387   : > { %v8570_v25 = vpack.i.bf16 %v5632_v41, %v5631_v29  ;;  %v5501_v8 = vadd.f32 %v5500_v35, %v5439_v30  ;;  %v5707_v45 = vpack.c.bf16 %v5632_v41, %v5631_v29 }
0x1388   : > { %v5574_v48 = vpop.f32.mrf.mxu0 }
0x1389   : > { %8571 = vrot.lane.b32.xlu2 %v8570_v25, %s8787_s11  ;;  %v5585_v14 = vadd.f32 %v5574_v48, %v5501_v8  ;;  %v8807_v8 = vmov 19  }
0x138a   : > { %8611 = vset.pattern.permute.xlu0 %v8807_v8  ;;  %8612 = vset.pattern.permute.xlu1 %v8807_v8 }
0x138b   : > { %v5625_v6 = vadd.f32 %v5613_v62, %v5585_v14  ;;  %v5619_v62 = vadd.f32 %v5589_v1, %v10172_v49  ;;  %8610 = vset.pattern.permute.xlu2 %v8807_v8  ;;  %v7802_v1 = vld [vmem:[#allocation3 + $0x650] sm:$0xff] }
0x138d   : > { %v5633_v9 = vmax.f32 %v5625_v6, 0.0  ;;  %v5627_v37 = vmax.f32 %v5619_v62, 0.0 }
0x138e   : > { %v5502_v36 = vpop.f32.mrf.mxu3 }
0x138f   : > { %v5503_v0 = vadd.f32 %v5502_v36, %v5441_v24  ;;  %v5705_v58 = vpack.c.bf16 %v5628_v23, %v5627_v37  ;;  %v8605_v5 = vpack.i.bf16 %v5628_v23, %v5627_v37 }
0x1390   : > { %v5576_v15 = vpop.f32.mrf.mxu0 }
0x1391   : > { %v5586_v19 = vadd.f32 %v5576_v15, %v5503_v0  ;;  %8596 = vrot.lane.b32.xlu2 %v8595_v54, %s8786_s28  ;;  %v8647_v0 = vld [vmem:[%s10277_s2] sm:$0xff] }
0x1393   : > { %v5626_v59 = vadd.f32 %v5617_v7, %v5586_v19  ;;  %v5706_v7 = vpack.c.bf16 %v5630_v20, %v5629_v34  ;;  %v8645_v20 = vld [vmem:[%s10277_s2 + $0x8] sm:$0xff] }
0x1395   : > { %v5634_v44 = vmax.f32 %v5626_v59, 0.0 }
0x1397   : > { %v8585_v21 = vpack.i.bf16 %v5634_v44, %v5633_v9  ;;  %v5708_v57 = vpack.c.bf16 %v5634_v44, %v5633_v9 }
0x1399   : > { %8586 = vrot.lane.b32.xlu1 %v8585_v21, %s8786_s28  ;;  %8576 = vrot.lane.b32.xlu0 %v8585_v21, %s8787_s11 }
0x139a   : > { %5745 = vmatpush.bf16.msra.mxu1 %v5708_v57  ;;  %5914 = vperm.xlu2 %8610, %v8647_v0  }
0x139e   : > { %5746 = vmatpush.bf16.msra.mxu1 %v5707_v45  ;;  %v7807_v45 = vld [vmem:[#allocation3 + $0x678] sm:$0xff] }
0x13a1   : > { %8591 = vrot.lane.b32.xlu1 %v8595_v54, %s8787_s11  ;;  %8581 = vrot.lane.b32.xlu0 %v8570_v25, %s8786_s28  ;;  %v8646_v54 = vld [vmem:[%s10277_s2 + $0x10] sm:$0xff] }
0x13a2   : > { %5747 = vmatpush.bf16.msra.mxu1 %v5706_v7  ;;  %5926 = vperm.xlu2 %8610, %v10140_v50   ;;  %v7803_v50 = vld [vmem:[#allocation3 + $0x658] sm:$0xff] }
0x13a6   : > { %5748 = vmatpush.bf16.msra.mxu1 %v5705_v58 }
0x13a9   : > { %8606 = vrot.lane.b32.xlu1 %v8605_v5, %s8786_s28  ;;  %8601 = vrot.lane.b32.xlu0 %v8605_v5, %s8787_s11  ;;  %s8728_s28 = scalar_lea.hbm %s10279_s4, 2 }
0x13aa   : > { %7530 = vmatmul.msk.bf16.vlgmr.msra.gmra.mxu1 %vm414_vm0, %v7800_v55  ;;  %5934 = vperm.xlu2 %8610, %v10134_v46   ;;  %p8730_p7 = scmp.lt.s32.totalorder %s8728_s28, %s8724_s5 }
0x13ac   : > { %p8731_p8 = por %p8730_p7, %p8729_p5 }
0x13ae   : > { %p8732_p9 = pnand %p8731_p8, %p8727_p4 }
0x13b1   : > { %5918 = vperm.xlu0 %8611, %v8645_v20   ;;  %5922 = vperm.xlu1 %8612, %v8646_v54  }
0x13b9   : > { %5938 = vperm.xlu0 %8611, %v10121_v12   ;;  %5930 = vperm.xlu1 %8612, %v10127_v63   ;;  %v7797_v12 = vld [vmem:[#allocation3 + $0x628] sm:$0xff] }
0x13ba   : > { %7531 = vmatmul.msk.bf16.gmra.mxu1 %vm414_vm0, %v7801_v17  ;;  %v7805_v63 = vld [vmem:[#allocation3 + $0x668] sm:$0xff] }
0x13c1   : > { %5942 = vperm.xlu1 %8612, %v10115_v43  }
0x13ca   : > { %7532 = vmatmul.msk.bf16.gmra.mxu1 %vm414_vm0, %v7802_v1 }
0x13da   : > { %7533 = vmatmul.msk.bf16.gmra.mxu1 %vm414_vm0, %v7803_v50 }
0x13e3   : > { %v8572_v49 = vpop.permute.xlu2 %8571 }
0x13e4   : > { %v8574_v28 = vunpack.i.h.bf16 %v8572_v49  ;;  %v8573_v51 = vunpack.i.l.bf16 %v8572_v49 }
0x13e6   : > { %v7554_v29 = vpack.c.bf16 %v8574_v28, %v8573_v51 }
0x13eb   : > { %v8597_v41 = vpop.permute.xlu2 %8596 }
0x13ec   : > { %v8599_v34 = vunpack.i.h.bf16 %v8597_v41  ;;  %v8598_v14 = vunpack.i.l.bf16 %v8597_v41 }
0x13ee   : > { %v7589_v15 = vpack.c.bf16 %v8599_v34, %v8598_v14 }
0x13f4   : > { %v5915_v37 = vpop.permute.xlu2 %5914 }
0x13fc   : > { %v5927_v8 = vpop.permute.xlu2 %5926 }
0x140b   : > { %v8587_v33 = vpop.permute.xlu1 %8586  ;;  %v8577_v18 = vpop.permute.xlu0 %8576 }
0x140c   : > { %v8589_v61 = vunpack.i.h.bf16 %v8587_v33  ;;  %v8588_v13 = vunpack.i.l.bf16 %v8587_v33  ;;  %v8579_v60 = vunpack.i.h.bf16 %v8577_v18  ;;  %v8578_v53 = vunpack.i.l.bf16 %v8577_v18 }
0x140e   : > { %v7583_v39 = vpack.c.bf16 %v8589_v61, %v8588_v13  ;;  %v7551_v30 = vpack.c.bf16 %v8579_v60, %v8578_v53 }
0x1410   : > { %7552 = vmatpush.bf16.msk.msra.mxu2 %vm8978_vm4, %v7551_v30  ;;  %7584 = vmatpush.bf16.msk.msra.mxu3 %vm8958_vm2, %v7583_v39 }
0x1413   : > { %v8592_v35 = vpop.permute.xlu1 %8591  ;;  %v8582_v26 = vpop.permute.xlu0 %8581 }
0x1414   : > { %v8594_v25 = vunpack.i.h.bf16 %v8592_v35  ;;  %v8593_v40 = vunpack.i.l.bf16 %v8592_v35  ;;  %v8584_v48 = vunpack.i.h.bf16 %v8582_v26  ;;  %v8583_v22 = vunpack.i.l.bf16 %v8582_v26  ;;  %7555 = vmatpush.bf16.msk.msra.mxu2 %vm8978_vm4, %v7554_v29 }
0x1416   : > { %v7557_v24 = vpack.c.bf16 %v8594_v25, %v8593_v40  ;;  %v7586_v36 = vpack.c.bf16 %v8584_v48, %v8583_v22 }
0x1418   : > { %7558 = vmatpush.bf16.msk.msra.mxu2 %vm8978_vm4, %v7557_v24  ;;  %7587 = vmatpush.bf16.msk.msra.mxu3 %vm8958_vm2, %v7586_v36 }
0x141b   : > { %v8607_v6 = vpop.permute.xlu1 %8606  ;;  %v8602_v19 = vpop.permute.xlu0 %8601 }
0x141c   : > { %v8609_v59 = vunpack.i.h.bf16 %v8607_v6  ;;  %v8608_v42 = vunpack.i.l.bf16 %v8607_v6  ;;  %v8604_v9 = vunpack.i.h.bf16 %v8602_v19  ;;  %v8603_v44 = vunpack.i.l.bf16 %v8602_v19  ;;  %7590 = vmatpush.bf16.msk.msra.mxu3 %vm8958_vm2, %v7589_v15 }
0x141e   : > { %v7592_v21 = vpack.c.bf16 %v8609_v59, %v8608_v42  ;;  %v7560_v57 = vpack.c.bf16 %v8604_v9, %v8603_v44  ;;  %v5935_v9 = vpop.permute.xlu2 %5934 }
0x1420   : > { %7561 = vmatpush.bf16.msk.msra.mxu2 %vm8978_vm4, %v7560_v57  ;;  %7593 = vmatpush.bf16.msk.msra.mxu3 %vm8958_vm2, %v7592_v21 }
0x1423   : > { %7562 = vmatmul.msk.bf16.vlgmr.msra.gmra.mxu2 %vm414_vm0, %v7796_v11  ;;  %7594 = vmatmul.msk.bf16.vlgmr.msra.gmra.mxu3 %vm414_vm0, %v7804_v27  ;;  %v5919_v13 = vpop.permute.xlu0 %5918  ;;  %v5923_v29 = vpop.permute.xlu1 %5922 }
0x1427   : > { %v5750_v43 = vpop.f32.mrf.mxu1 }
0x142b   : > { %v5931_v54 = vpop.permute.xlu1 %5930 }
0x142f   : > { %v5752_v46 = vpop.f32.mrf.mxu1 }
0x1433   : > { %7563 = vmatmul.msk.bf16.gmra.mxu2 %vm414_vm0, %v7797_v12  ;;  %7595 = vmatmul.msk.bf16.gmra.mxu3 %vm414_vm0, %v7805_v63  ;;  %v5939_v12 = vpop.permute.xlu0 %5938 }
0x1437   : > { %v5755_v55 = vpop.f32.mrf.mxu1 }
0x143f   : > { %v5757_v51 = vpop.f32.mrf.mxu1 }
0x1443   : > { %7564 = vmatmul.msk.bf16.gmra.mxu2 %vm414_vm0, %v7798_v38  ;;  %7596 = vmatmul.msk.bf16.gmra.mxu3 %vm414_vm0, %v7806_v52 }
0x1447   : > { %v5760_v48 = vpop.f32.mrf.mxu1 }
0x144f   : > { %v5762_v0 = vpop.f32.mrf.mxu1 }
0x1453   : > { %7565 = vmatmul.msk.bf16.gmra.mxu2 %vm414_vm0, %v7799_v10  ;;  %7597 = vmatmul.msk.bf16.gmra.mxu3 %vm414_vm0, %v7807_v45 }
0x14a6   : > { %v5811_v62 = vpop.f32.mrf.mxu2  ;;  %v5885_v23 = vpop.f32.mrf.mxu3 }
0x14a7   : > { %v5812_v7 = vadd.f32 %v5811_v62, %v5750_v43  ;;  %v5943_v43 = vpop.permute.xlu1 %5942 }
0x14a9   : > { %v5905_v58 = vadd.f32 %v5885_v23, %v5812_v7 }
0x14ab   : > { %v5945_v5 = vadd.f32 %v5915_v37, %v5905_v58 }
0x14ad   : > { %v5953_v49 = vadd.f32 %v5945_v5, %v10083_v4 }
0x14ae   : > { %v5813_v33 = vpop.f32.mrf.mxu2  ;;  %v5887_v18 = vpop.f32.mrf.mxu3 }
0x14af   : > { %v5814_v61 = vadd.f32 %v5813_v33, %v5752_v46  ;;  %5978 = vmax.xlane.f32.xlu1 %v5953_v49  ;;  %5994 = vadd.xlane.f32.xlu2 %v5953_v49  ;;  %v5970_v33 = vld [vmem:[#allocation6 + $0x48] sm:$0xff] }
0x14b1   : > { %v5906_v60 = vadd.f32 %v5887_v18, %v5814_v61 }
0x14b3   : > { %v5946_v53 = vadd.f32 %v5919_v13, %v5906_v60  ;;  %v5969_v13 = vld [vmem:[#allocation6 + $0x40] sm:$0xff]  ;;  %v5962_v60 = vld [vmem:[#allocation6 + $0x8] sm:$0xff] }
0x14b5   : > { %v5954_v28 = vadd.f32 %v5946_v53, %v10081_v32 }
0x14b6   : > { %v5816_v39 = vpop.f32.mrf.mxu2  ;;  %v5890_v30 = vpop.f32.mrf.mxu3 }
0x14b7   : > { %v5817_v17 = vadd.f32 %v5816_v39, %v5755_v55  ;;  %5980 = vmax.xlane.f32.xlu2 %v5954_v28  ;;  %5996 = vadd.xlane.f32.xlu0 %v5954_v28 }
0x14b9   : > { %v5907_v41 = vadd.f32 %v5890_v30, %v5817_v17  ;;  %v5961_v30 = vld [vmem:[#allocation6] sm:$0xff] }
0x14bb   : > { %v5947_v35 = vadd.f32 %v5923_v29, %v5907_v41 }
0x14bd   : > { %v5955_v4 = vadd.f32 %v5947_v35, %v10061_v47  ;;  %v5963_v35 = vld [vmem:[#allocation6 + $0x10] sm:$0xff] }
0x14be   : > { %v5818_v26 = vpop.f32.mrf.mxu2  ;;  %v5892_v25 = vpop.f32.mrf.mxu3 }
0x14bf   : > { %v5819_v40 = vadd.f32 %v5818_v26, %v5757_v51  ;;  %5982 = vmax.xlane.f32.xlu0 %v5955_v4  ;;  %5998 = vadd.xlane.f32.xlu2 %v5955_v4  ;;  %v5971_v51 = vld [vmem:[#allocation6 + $0x50] sm:$0xff]  ;;  %v5972_v4 = vld [vmem:[#allocation6 + $0x58] sm:$0xff] }
0x14c1   : > { %v5908_v22 = vadd.f32 %v5892_v25, %v5819_v40 }
0x14c3   : > { %v5948_v32 = vadd.f32 %v5927_v8, %v5908_v22  ;;  %v5964_v22 = vld [vmem:[#allocation6 + $0x18] sm:$0xff]  ;;  %v5973_v8 = vld [vmem:[#allocation6 + $0x60] sm:$0xff] }
0x14c5   : > { %v5956_v20 = vadd.f32 %v5948_v32, %v10063_v31  ;;  %v5765_v31 = vpop.f32.mrf.mxu1 }
0x14c6   : > { %v5821_v34 = vpop.f32.mrf.mxu2  ;;  %v5895_v14 = vpop.f32.mrf.mxu3 }
0x14c7   : > { %v5822_v24 = vadd.f32 %v5821_v34, %v5760_v48  ;;  %5984 = vmax.xlane.f32.xlu2 %v5956_v20  ;;  %6000 = vadd.xlane.f32.xlu1 %v5956_v20 }
0x14c9   : > { %v5909_v36 = vadd.f32 %v5895_v14, %v5822_v24  ;;  %v5965_v24 = vld [vmem:[#allocation6 + $0x20] sm:$0xff] }
0x14cb   : > { %v5949_v47 = vadd.f32 %v5931_v54, %v5909_v36  ;;  %v5974_v36 = vld [vmem:[#allocation6 + $0x68] sm:$0xff] }
0x14cd   : > { %v5957_v15 = vadd.f32 %v5949_v47, %v10071_v16  ;;  %v5767_v50 = vpop.f32.mrf.mxu1 }
0x14ce   : > { %v5823_v6 = vpop.f32.mrf.mxu2  ;;  %v5897_v19 = vpop.f32.mrf.mxu3 }
0x14cf   : > { %v5824_v59 = vadd.f32 %v5823_v6, %v5762_v0  ;;  %5986 = vmax.xlane.f32.xlu1 %v5957_v15  ;;  %6002 = vadd.xlane.f32.xlu0 %v5957_v15  ;;  %v5966_v6 = vld [vmem:[#allocation6 + $0x28] sm:$0xff] }
0x14d1   : > { %v5910_v42 = vadd.f32 %v5897_v19, %v5824_v59  ;;  %v5975_v59 = vld [vmem:[#allocation6 + $0x70] sm:$0xff] }
0x14d3   : > { %v5950_v44 = vadd.f32 %v5935_v9, %v5910_v42 }
0x14d5   : > { %v5958_v21 = vadd.f32 %v5950_v44, %v10073_v56 }
0x14d6   : > { %v5826_v57 = vpop.f32.mrf.mxu2  ;;  %v5900_v11 = vpop.f32.mrf.mxu3 }
0x14d7   : > { %v5827_v27 = vadd.f32 %v5826_v57, %v5765_v31  ;;  %5988 = vmax.xlane.f32.xlu0 %v5958_v21  ;;  %6004 = vadd.xlane.f32.xlu2 %v5958_v21 }
0x14d9   : > { %v5911_v1 = vadd.f32 %v5900_v11, %v5827_v27  ;;  %v5967_v11 = vld [vmem:[#allocation6 + $0x30] sm:$0xff] }
0x14db   : > { %v5951_v63 = vadd.f32 %v5939_v12, %v5911_v1 }
0x14dd   : > { %v5959_v16 = vadd.f32 %v5951_v63, %v10092_v3 }
0x14de   : > { %v5828_v38 = vpop.f32.mrf.mxu2  ;;  %v5902_v10 = vpop.f32.mrf.mxu3 }
0x14df   : > { %v5829_v52 = vadd.f32 %v5828_v38, %v5767_v50  ;;  %5990 = vmax.xlane.f32.xlu2 %v5959_v16  ;;  %6006 = vadd.xlane.f32.xlu1 %v5959_v16 }
0x14e1   : > { %v5912_v45 = vadd.f32 %v5902_v10, %v5829_v52 }
0x14e3   : > { %v5952_v46 = vadd.f32 %v5943_v43, %v5912_v45 }
0x14e5   : > { %v5960_v56 = vadd.f32 %v5952_v46, %v10094_v2 }
0x14e7   : > { %5992 = vmax.xlane.f32.xlu1 %v5960_v56  ;;  %6008 = vadd.xlane.f32.xlu0 %v5960_v56 }
0x1522   : > { %v5995_v62 = vpop.xlane.xlu2 %5994  ;;  %v5979_v37 = vpop.xlane.xlu1 %5978 }
0x1523   : > { %v6010_v18 = vmul.f32 0.0078125, %v5995_v62  ;;  %v6018_v40 = vmul.f32 %v5979_v37, %v5961_v30  ;;  %v5968_v62 = vld [vmem:[#allocation6 + $0x38] sm:$0xff] }
0x1525   : > { %v6026_v29 = vmul.f32 %v6010_v18, %v5969_v13 }
0x1527   : > { %v6034_v14 = vadd.f32 %v6026_v29, %v6018_v40 }
0x1529   : > { %v6043_v57 = vsel %vm6042_vm5, %v6034_v14, 0.0 }
0x152a   : > { %v5981_v23 = vpop.xlane.xlu2 %5980  ;;  %v5997_v7 = vpop.xlane.xlu0 %5996 }
0x152b   : > { %v6011_v49 = vmul.f32 0.0078125, %v5997_v7  ;;  %v6019_v41 = vmul.f32 %v5981_v23, %v5962_v60  ;;  %v5976_v7 = vld [vmem:[#allocation6 + $0x78] sm:$0xff] }
0x152d   : > { %v6027_v28 = vmul.f32 %v6011_v49, %v5970_v33 }
0x152f   : > { %v6035_v48 = vadd.f32 %v6027_v28, %v6019_v41 }
0x1531   : > { %v6044_v15 = vsel %vm6042_vm5, %v6035_v48, 0.0 }
0x1532   : > { %v5999_v58 = vpop.xlane.xlu2 %5998  ;;  %v5983_v5 = vpop.xlane.xlu0 %5982  ;;  %v6045_v50 = vadd.f32 %v6044_v15, %v6043_v57 }
0x1533   : > { %v6012_v53 = vmul.f32 0.0078125, %v5999_v58  ;;  %v6020_v32 = vmul.f32 %v5983_v5, %v5963_v35 }
0x1535   : > { %v6028_v26 = vmul.f32 %v6012_v53, %v5971_v51 }
0x1537   : > { %v6036_v54 = vadd.f32 %v6028_v26, %v6020_v32 }
0x1539   : > { %v6046_v1 = vsel %vm6042_vm5, %v6036_v54, 0.0 }
0x153a   : > { %v6001_v3 = vpop.xlane.xlu1 %6000  ;;  %v5985_v55 = vpop.xlane.xlu2 %5984  ;;  %v6047_v45 = vadd.f32 %v6046_v1, %v6045_v50 }
0x153b   : > { %v6013_v17 = vmul.f32 0.0078125, %v6001_v3  ;;  %v6021_v0 = vmul.f32 %v5985_v55, %v5964_v22 }
0x153d   : > { %v6029_v20 = vmul.f32 %v6013_v17, %v5972_v4  ;;  %v5977_v17 = vld [vmem:[#allocation6 + $0x80] sm:$0x1] }
0x153f   : > { %v6037_v9 = vadd.f32 %v6029_v20, %v6021_v0 }
0x1541   : > { %v6048_v38 = vsel %vm6042_vm5, %v6037_v9, 0.0 }
0x1542   : > { %v6003_v61 = vpop.xlane.xlu0 %6002  ;;  %v5987_v2 = vpop.xlane.xlu1 %5986  ;;  %v6049_v56 = vadd.f32 %v6048_v38, %v6047_v45 }
0x1543   : > { %v6014_v25 = vmul.f32 0.0078125, %v6003_v61  ;;  %v6022_v44 = vmul.f32 %v5987_v2, %v5965_v24 }
0x1545   : > { %v6030_v47 = vmul.f32 %v6014_v25, %v5973_v8 }
0x1547   : > { %v6038_v12 = vadd.f32 %v6030_v47, %v6022_v44 }
0x1549   : > { %v6050_v43 = vsel %vm6042_vm5, %v6038_v12, 0.0 }
0x154a   : > { %v6005_v39 = vpop.xlane.xlu2 %6004  ;;  %v5989_v19 = vpop.xlane.xlu0 %5988  ;;  %v6051_v3 = vadd.f32 %v6050_v43, %v6049_v56 }
0x154b   : > { %v6015_v34 = vmul.f32 0.0078125, %v6005_v39  ;;  %v6023_v63 = vmul.f32 %v5989_v19, %v5966_v6 }
0x154d   : > { %v6031_v31 = vmul.f32 %v6015_v34, %v5974_v36 }
0x154f   : > { %v6039_v52 = vadd.f32 %v6031_v31, %v6023_v63 }
0x1551   : > { %v6052_v58 = vsel %vm6042_vm5, %v6039_v52, 0.0 }
0x1552   : > { %v6007_v42 = vpop.xlane.xlu1 %6006  ;;  %v5991_v27 = vpop.xlane.xlu2 %5990  ;;  %v6053_v18 = vadd.f32 %v6052_v58, %v6051_v3 }
0x1553   : > { %v6016_v21 = vmul.f32 0.0078125, %v6007_v42  ;;  %v6024_v10 = vmul.f32 %v5991_v27, %v5967_v11 }
0x1555   : > { %v6032_v16 = vmul.f32 %v6016_v21, %v5975_v59 }
0x1557   : > { %v6040_v46 = vadd.f32 %v6032_v16, %v6024_v10 }
0x1559   : > { %v6054_v55 = vsel %vm6042_vm5, %v6040_v46, 0.0 }
0x155a   : > { %v5993_v23 = vpop.xlane.xlu1 %5992  ;;  %v6009_v37 = vpop.xlane.xlu0 %6008  ;;  %v6055_v13 = vadd.f32 %v6054_v55, %v6053_v18 }
0x155b   : > { %v6017_v5 = vmul.f32 0.0078125, %v6009_v37  ;;  %v6025_v49 = vmul.f32 %v5993_v23, %v5968_v62 }
0x155d   : > { %v6033_v33 = vmul.f32 %v6017_v5, %v5976_v7 }
0x155f   : > { %v6041_v61 = vadd.f32 %v6033_v33, %v6025_v49 }
0x1561   : > { %v6056_v60 = vsel %vm6042_vm5, %v6041_v61, 0.0 }
0x1562   : > { %v6057_v53 = vadd.f32 %v6056_v60, %v6055_v13 }
0x1564   : > { %v6058_v28 = vrot.slane %v6057_v53, 4 }
0x1566   : > { %v6059_v51 = vadd.f32 %v6058_v28, %v6057_v53 }
0x1568   : > { %v6060_v2 = vrot.slane %v6059_v51, 2 }
0x156a   : > { %v6061_v39 = vadd.f32 %v6060_v2, %v6059_v51 }
0x156c   : > { %v6062_v30 = vrot.slane %v6061_v39, 1 }
0x156e   : > { %v6063_v29 = vadd.f32 %v6062_v30, %v6061_v39 }
0x1570   : > { %v6064_v41 = vadd.f32 %v6063_v29, %v5977_v17 }
0x1572   : > { %6066 = vst.msk [vmem:[%s291_s20] sm:$0x1] %vm6065_vm6, %v6064_v41 }
0x1573   : > { %8735 = shalt.err (!%p8732_p9)
}
0x1574   : > { %7816 = dma.vmem_to_hbm [thread:$0]  (%p8876_p6), %s6079_s22, 16, %s6081_s23, %s6068_s29  }
0x1575 PF: > { %s6092_s25 = sand.u32 1, %s8766_s15   ;;  %p7826_p11 = pnand %p6167_p1, %p8882_p10 }
0x1576   : > { %s6093_s8 = scalar_lea.sflag [#allocation5], %s6092_s25 }
0x1577   : > { %p7827_p12 = pneg %p7826_p11 }
0x1579   : > { %8761 = dma.done.wait (%p7827_p12), %s6093_s8, 16  }
0x157a   : > { %8763 = vsyncadd (%p7827_p12), %s6093_s8, 4294967280  ;;  %p16_p13 = scmp.ge.s32.totalorder %s8858_s21, 4   ;;  %s10288_s15 = smov %s8770_s16 }
0x157b   : > { %s10289_s16 = smov %s8774_s17  ;;  %s10290_s17 = smov %s8870_s24 }
0x157c   : > { %s10291_s18 = smov %s8858_s21  ;;  %18 = sbr.rel (!%p16_p13) target bundleno = 5 (0x5), region = 174 }
0x1581   :  { %6098 = vsyncpa [#allocation4], 1 }
0x1582   :  { %6100 = vsyncpa [#allocation4 + $0x1], 1 }
0x1583   :  { %6101 = vsyncpa [#allocation7], 1 }
0x1584   :  { %6102 = vsyncpa [#allocation5], 1 }
0x1585   :  { %6104 = vsyncpa [#allocation5 + $0x1], 1 }

</bundles_post_ra>
